<compile_context>
chip_gen: v5e
topology: v5e:2x2
jax: 0.10.0
libtpu: 0.0.40
codegen_flags: <defaults>
</compile_context>

<pallas_src>
import jax
import jax.numpy as jnp
from jax.experimental import pallas as pl
from jax.experimental.pallas import tpu as pltpu

# ---- small CLIP/ViT config ----
B = 2
C = 4
IMG = 16
PATCH = 4
N_PATCH = (IMG // PATCH) ** 2          # 16 patches
T = N_PATCH + 1                        # 17 real tokens (cls + patches)
TP = ((T + 7) // 8) * 8                # 24: token axis padded to sublane multiple
BT = B * TP                            # 48 rows (batch folded into the row axis)
D = 32                                 # embed dim
NH = 4                                 # attention heads
HD = D // NH                           # 8
MLP = 4 * D                            # 128
DEPTH = 2                              # transformer blocks
NUM_CLASSES = 10
NC_PAD = 128                           # lane-dense (padded) head output width
K_IN = C * PATCH * PATCH               # 64 = unfolded patch length
EPS = 1e-6                             # timm ViT LayerNorm eps
LANES = 128                            # packed-slab lane width

# ---- static offsets inside the packed parameter slabs ----
# bf16 weight slab (row-stacked, all pieces padded to 128 lanes)
W_PATCH_OFF = 0                        # (K_IN, D)
W_LAYER_OFF = K_IN                     # per-layer block start
W_LAYER_ROWS = 3 * D + MLP             # qkv(D) + proj(D) + fc1(D) + fc2(MLP) = 224
W_HEAD_OFF = K_IN + DEPTH * W_LAYER_ROWS        # (D, NC_PAD)
W_ROWS = W_HEAD_OFF + D                          # 544 (multiple of 16 for bf16)

# f32 vector slab
V_TOK_OFF = 0                          # (BT, D)  tok bias pre-tiled over batch
V_LAYER_OFF = BT                       # per-layer block start (8 rows / layer)
V_LAYER_ROWS = 8                       # ln1w,ln1b,ln2w,ln2b,qkv_b,proj_b,fc1_b,fc2_b
V_FINAL_OFF = BT + DEPTH * V_LAYER_ROWS          # lnf_w, lnf_b, head_b
V_ROWS = ((V_FINAL_OFF + 3 + 7) // 8) * 8        # padded to sublane multiple


# ---------------- in-kernel helpers ----------------
def _layernorm(x, w, b):
    mu = jnp.mean(x, axis=-1, keepdims=True)
    xc = x - mu
    var = jnp.mean(xc * xc, axis=-1, keepdims=True)
    return xc * jax.lax.rsqrt(var + EPS) * w + b


# ---------------- fused Pallas kernel ----------------
def clip_fused_kernel(patches_ref, mask_ref, w_ref, v_ref, o_ref):
    f32 = jnp.float32
    bf16 = jnp.bfloat16

    # ---- patch embedding + (cls token + pos embed + patch bias) add ----
    # patches_ref rows: [img0 tok0..23, img1 tok0..23]; cls row & pad rows are 0.
    pw = w_ref[W_PATCH_OFF:W_PATCH_OFF + K_IN, 0:D]                 # (64, 32) bf16
    x = jnp.dot(patches_ref[...].astype(bf16), pw,
                preferred_element_type=f32)                         # (48, 32) f32
    x = x + v_ref[V_TOK_OFF:V_TOK_OFF + BT, 0:D]                    # fused token bias

    # additive attention mask: 0 where (same image) & (key token real), else -1e30
    mask = mask_ref[...]                                            # (48, 48) f32

    for d in range(DEPTH):                                          # static unroll
        bw = W_LAYER_OFF + d * W_LAYER_ROWS
        bv = V_LAYER_OFF + d * V_LAYER_ROWS

        # ---- multi-head self-attention (pre-norm) ----
        xn = _layernorm(x, v_ref[bv:bv + 1, 0:D], v_ref[bv + 1:bv + 2, 0:D])
        qkv = jnp.dot(xn.astype(bf16), w_ref[bw:bw + D, 0:3 * D],
                      preferred_element_type=f32) + v_ref[bv + 4:bv + 5, 0:3 * D]
        qkv = qkv.astype(bf16)                                      # (48, 96)

        heads = []
        for h in range(NH):                                         # static unroll
            lo = h * HD
            # 1/sqrt(HD) already folded into the Q projection weights.
            qh = qkv[:, lo:lo + HD]                                 # (48, 8)
            kh = qkv[:, D + lo:D + lo + HD]                         # (48, 8)
            vh = qkv[:, 2 * D + lo:2 * D + lo + HD]                 # (48, 8)
            # batch folded: one (48,8)@(8,48) score matmul (block-diag via mask)
            s = jax.lax.dot_general(qh, kh, (((1,), (1,)), ((), ())),
                                    preferred_element_type=f32) + mask
            s = s - jnp.max(s, axis=-1, keepdims=True)
            p = jnp.exp(s)
            p = p * pl.reciprocal(jnp.sum(p, axis=-1, keepdims=True), approx=True)
            heads.append(jnp.dot(p.astype(bf16), vh,
                                 preferred_element_type=f32))       # (48, 8)
        # single output projection (instead of per-head block matmuls)
        ctx = jnp.concatenate(heads, axis=-1).astype(bf16)          # (48, 32)
        attn = jnp.dot(ctx, w_ref[bw + D:bw + 2 * D, 0:D],
                       preferred_element_type=f32) + v_ref[bv + 5:bv + 6, 0:D]
        x = x + attn

        # ---- MLP (pre-norm) ----
        xn2 = _layernorm(x, v_ref[bv + 2:bv + 3, 0:D], v_ref[bv + 3:bv + 4, 0:D])
        h1 = jnp.dot(xn2.astype(bf16), w_ref[bw + 2 * D:bw + 3 * D, 0:MLP],
                     preferred_element_type=f32) + v_ref[bv + 6:bv + 7, 0:MLP]
        # TODO(synk): timm nn.GELU is exact (erf); tanh approximation used for safe TPU lowering.
        h1 = jax.nn.gelu(h1, approximate=True)
        x = x + jnp.dot(h1.astype(bf16), w_ref[bw + 3 * D:bw + 3 * D + MLP, 0:D],
                        preferred_element_type=f32) + v_ref[bv + 7:bv + 8, 0:D]

    # ---- head: final LN + linear on the cls rows only ----
    cls = x.reshape(B, TP, D)[:, 0, :]                              # (B, 32), single slice
    cls_n = _layernorm(cls, v_ref[V_FINAL_OFF:V_FINAL_OFF + 1, 0:D],
                       v_ref[V_FINAL_OFF + 1:V_FINAL_OFF + 2, 0:D])
    o_ref[...] = jnp.dot(cls_n.astype(bf16),
                         w_ref[W_HEAD_OFF:W_HEAD_OFF + D, 0:NC_PAD],
                         preferred_element_type=f32) \
                 + v_ref[V_FINAL_OFF + 2:V_FINAL_OFF + 3, 0:NC_PAD]  # (B, 128)


# ---------------- wrapper (single grid-less pallas_call, 4 inputs) ----------------
def fused_forward(patches_flat, prm):
    vmem = pl.BlockSpec(memory_space=pltpu.MemorySpace.VMEM)
    return pl.pallas_call(
        clip_fused_kernel,
        out_shape=jax.ShapeDtypeStruct((B, NC_PAD), jnp.float32),
        in_specs=[vmem, vmem, vmem, vmem],
        out_specs=vmem,
    )(patches_flat, prm['mask'], prm['w'], prm['v'])


# ---------------- glue (plain JAX) ----------------
def extract_patches(x):
    # x: (B, C, H, W) -> (B, N, C*P*P); flatten order (C, ph, pw) matches Conv2d weight (D, C, P, P)
    Bn, Cc, H, W = x.shape
    hn, wn = H // PATCH, W // PATCH
    x = x.reshape(Bn, Cc, hn, PATCH, wn, PATCH)
    x = x.transpose(0, 2, 4, 1, 3, 5)
    return x.reshape(Bn, hn * wn, Cc * PATCH * PATCH)


def clip_backbone_forward(x, params):
    patches = extract_patches(x)                                  # (B, N, K)
    Bn = x.shape[0]
    # row 0 = cls slot, rows 1..N = patches, rows N+1.. = padding
    pp = jnp.zeros((Bn, TP, K_IN), jnp.float32)
    pp = pp.at[:, 1:1 + N_PATCH, :].set(patches)
    logits_padded = fused_forward(pp.reshape(Bn * TP, K_IN), params)  # (B, 128)
    return logits_padded[:, :NUM_CLASSES]                         # (B, NUM_CLASSES)


# ---------------- deterministic synthetic parameters (packed slabs) ----------------
def init_params(key):
    ks = iter(jax.random.split(key, 32))

    def nrm(shape, scale=0.02):
        return (scale * jax.random.normal(next(ks), shape)).astype(jnp.float32)

    def pad_lanes(a):
        r, c = a.shape
        out = jnp.zeros((r, LANES), jnp.float32)
        return out.at[:, :c].set(a.astype(jnp.float32))

    # patch embedding (Conv2d(C, D, k=P, s=P) as matmul)
    conv_w = nrm((D, C, PATCH, PATCH))
    patch_w = conv_w.reshape(D, K_IN).T                 # (K_IN, D)
    patch_b = jnp.zeros((D,), jnp.float32)

    cls_token = nrm((1, 1, D))
    pos_embed = nrm((1, T, D))

    # token-row additive bias (cls+pos / pos+patch_b / 0 for pad), pre-tiled over batch
    tok_bias = jnp.zeros((TP, D), jnp.float32)
    tok_bias = tok_bias.at[0, :].set(cls_token[0, 0] + pos_embed[0, 0])
    tok_bias = tok_bias.at[1:T, :].set(pos_embed[0, 1:T] + patch_b)
    tok_bias_tiled = jnp.tile(tok_bias, (B, 1))         # (BT, D)

    scale = 1.0 / (HD ** 0.5)

    w_parts = [pad_lanes(patch_w)]
    v_parts = [pad_lanes(tok_bias_tiled)]

    for _ in range(DEPTH):
        qkv_w = nrm((D, 3 * D))
        qkv_b = jnp.zeros((1, 3 * D), jnp.float32)
        # fold the 1/sqrt(HD) attention scale into the Q projection (weights + bias)
        qkv_w = qkv_w.at[:, 0:D].multiply(scale)
        qkv_b = qkv_b.at[:, 0:D].multiply(scale)
        proj_w = nrm((D, D)); proj_b = jnp.zeros((1, D), jnp.float32)
        fc1_w = nrm((D, MLP)); fc1_b = jnp.zeros((1, MLP), jnp.float32)
        fc2_w = nrm((MLP, D)); fc2_b = jnp.zeros((1, D), jnp.float32)
        ln1_w = jnp.ones((1, D), jnp.float32); ln1_b = jnp.zeros((1, D), jnp.float32)
        ln2_w = jnp.ones((1, D), jnp.float32); ln2_b = jnp.zeros((1, D), jnp.float32)

        w_parts += [pad_lanes(qkv_w), pad_lanes(proj_w), pad_lanes(fc1_w), pad_lanes(fc2_w)]
        v_parts += [pad_lanes(ln1_w), pad_lanes(ln1_b), pad_lanes(ln2_w), pad_lanes(ln2_b),
                    pad_lanes(qkv_b), pad_lanes(proj_b), pad_lanes(fc1_b), pad_lanes(fc2_b)]

    # final LN + head (head output lane-padded to 128, sliced back in the wrapper)
    lnf_w = jnp.ones((1, D), jnp.float32); lnf_b = jnp.zeros((1, D), jnp.float32)
    head_w_small = nrm((D, NUM_CLASSES))
    head_w = jnp.zeros((D, NC_PAD), jnp.float32).at[:, :NUM_CLASSES].set(head_w_small)
    head_b = jnp.zeros((1, NC_PAD), jnp.float32)

    w_parts.append(pad_lanes(head_w))
    v_parts += [pad_lanes(lnf_w), pad_lanes(lnf_b), pad_lanes(head_b)]

    w_slab = jnp.concatenate(w_parts, axis=0).astype(jnp.bfloat16)   # (W_ROWS, 128) bf16
    v_slab = jnp.concatenate(v_parts, axis=0)                        # f32
    if v_slab.shape[0] < V_ROWS:
        v_slab = jnp.concatenate(
            [v_slab, jnp.zeros((V_ROWS - v_slab.shape[0], LANES), jnp.float32)], axis=0)
    assert w_slab.shape == (W_ROWS, LANES), w_slab.shape
    assert v_slab.shape == (V_ROWS, LANES), v_slab.shape

    # additive attention mask: block-diagonal over images + key-padding, 0 / -1e30
    row = jnp.arange(BT)
    col = jnp.arange(BT)
    same_img = (row[:, None] // TP) == (col[None, :] // TP)
    key_real = (col[None, :] % TP) < T
    mask = jnp.where(same_img & key_real,
                     jnp.float32(0.0), jnp.float32(-1e30))           # (BT, BT)

    return dict(w=w_slab, v=v_slab, mask=mask)


if __name__ == "__main__":
    key = jax.random.PRNGKey(0)
    pkey, xkey = jax.random.split(key)
    params = init_params(pkey)
    x = jax.random.normal(xkey, (B, C, IMG, IMG), jnp.float32)   # NCHW like PyTorch
    fwd = jax.jit(clip_backbone_forward)
    out = fwd(x, params)
    out = jax.block_until_ready(out)
    assert out.shape == (B, NUM_CLASSES), out.shape
    assert jnp.all(jnp.isfinite(out))
    print("KERNEL_OK")
</pallas_src>

<mosaic_0001>
module attributes {stable_mosaic.version = 11 : i64} {
  func.func @clip_fused_kernel(%arg0: memref<48x64xf32, #tpu.memory_space<vmem>>, %arg1: memref<48x48xf32, #tpu.memory_space<vmem>>, %arg2: memref<544x128xbf16, #tpu.memory_space<vmem>>, %arg3: memref<72x128xf32, #tpu.memory_space<vmem>>, %arg4: memref<2x128xf32, #tpu.memory_space<vmem>>) attributes {dimension_semantics = [], scalar_prefetch = 0 : i64, scratch_operands = 0 : i64, tpu.core_type = #tpu.core_type<tc>} {
    %c0 = arith.constant 0 : index
    %c0_0 = arith.constant 0 : index
    %0 = vector.load %arg2[%c0, %c0_0] : memref<544x128xbf16, #tpu.memory_space<vmem>>, vector<64x32xbf16>
    %c0_1 = arith.constant 0 : index
    %c0_2 = arith.constant 0 : index
    %1 = vector.load %arg0[%c0_1, %c0_2] : memref<48x64xf32, #tpu.memory_space<vmem>>, vector<48x64xf32>
    %2 = arith.truncf %1 : vector<48x64xf32> to vector<48x64xbf16>
    %cst = arith.constant dense<0.000000e+00> : vector<48x32xf32>
    %3 = tpu.matmul %2, %0, %cst {dimension_numbers = #tpu.dot_dimension_numbers<[1], [0], [0], [1], [0, 0, 1, 1], [], []>} : vector<48x64xbf16>, vector<64x32xbf16>, vector<48x32xf32> -> vector<48x32xf32>
    %c0_3 = arith.constant 0 : index
    %c0_4 = arith.constant 0 : index
    %4 = vector.load %arg3[%c0_3, %c0_4] : memref<72x128xf32, #tpu.memory_space<vmem>>, vector<48x32xf32>
    %5 = arith.addf %3, %4 : vector<48x32xf32>
    %c0_5 = arith.constant 0 : index
    %c0_6 = arith.constant 0 : index
    %6 = vector.load %arg1[%c0_5, %c0_6] : memref<48x48xf32, #tpu.memory_space<vmem>>, vector<48x48xf32>
    %c48 = arith.constant 48 : index
    %c0_7 = arith.constant 0 : index
    %7 = vector.load %arg3[%c48, %c0_7] : memref<72x128xf32, #tpu.memory_space<vmem>>, vector<1x32xf32>
    %c49 = arith.constant 49 : index
    %c0_8 = arith.constant 0 : index
    %8 = vector.load %arg3[%c49, %c0_8] : memref<72x128xf32, #tpu.memory_space<vmem>>, vector<1x32xf32>
    %cst_9 = arith.constant dense<0.000000e+00> : vector<48xf32>
    %9 = vector.multi_reduction <add>, %5, %cst_9 [1] : vector<48x32xf32> to vector<48xf32>
    %10 = vector.shape_cast %9 : vector<48xf32> to vector<48x1xf32>
    %cst_10 = arith.constant 3.200000e+01 : f32
    %11 = vector.broadcast %cst_10 : f32 to vector<48x1xf32>
    %12 = arith.divf %10, %11 : vector<48x1xf32>
    %13 = vector.broadcast %12 : vector<48x1xf32> to vector<48x32xf32>
    %14 = arith.subf %5, %13 : vector<48x32xf32>
    %15 = arith.mulf %14, %14 : vector<48x32xf32>
    %cst_11 = arith.constant dense<0.000000e+00> : vector<48xf32>
    %16 = vector.multi_reduction <add>, %15, %cst_11 [1] : vector<48x32xf32> to vector<48xf32>
    %17 = vector.shape_cast %16 : vector<48xf32> to vector<48x1xf32>
    %cst_12 = arith.constant 3.200000e+01 : f32
    %18 = vector.broadcast %cst_12 : f32 to vector<48x1xf32>
    %19 = arith.divf %17, %18 : vector<48x1xf32>
    %cst_13 = arith.constant 9.99999997E-7 : f32
    %20 = vector.broadcast %cst_13 : f32 to vector<48x1xf32>
    %21 = arith.addf %19, %20 : vector<48x1xf32>
    %22 = math.rsqrt %21 : vector<48x1xf32>
    %23 = vector.broadcast %22 : vector<48x1xf32> to vector<48x32xf32>
    %24 = arith.mulf %14, %23 : vector<48x32xf32>
    %25 = vector.broadcast %7 : vector<1x32xf32> to vector<48x32xf32>
    %26 = arith.mulf %24, %25 : vector<48x32xf32>
    %27 = vector.broadcast %8 : vector<1x32xf32> to vector<48x32xf32>
    %28 = arith.addf %26, %27 : vector<48x32xf32>
    %29 = arith.truncf %28 : vector<48x32xf32> to vector<48x32xbf16>
    %c64 = arith.constant 64 : index
    %c0_14 = arith.constant 0 : index
    %30 = vector.load %arg2[%c64, %c0_14] : memref<544x128xbf16, #tpu.memory_space<vmem>>, vector<32x96xbf16>
    %cst_15 = arith.constant dense<0.000000e+00> : vector<48x96xf32>
    %31 = tpu.matmul %29, %30, %cst_15 {dimension_numbers = #tpu.dot_dimension_numbers<[1], [0], [0], [1], [0, 0, 1, 1], [], []>} : vector<48x32xbf16>, vector<32x96xbf16>, vector<48x96xf32> -> vector<48x96xf32>
    %c52 = arith.constant 52 : index
    %c0_16 = arith.constant 0 : index
    %32 = vector.load %arg3[%c52, %c0_16] : memref<72x128xf32, #tpu.memory_space<vmem>>, vector<1x96xf32>
    %33 = vector.broadcast %32 : vector<1x96xf32> to vector<48x96xf32>
    %34 = arith.addf %31, %33 : vector<48x96xf32>
    %35 = arith.truncf %34 : vector<48x96xf32> to vector<48x96xbf16>
    %36 = vector.extract_strided_slice %35 {offsets = [0, 0], sizes = [48, 8], strides = [1, 1]} : vector<48x96xbf16> to vector<48x8xbf16>
    %37 = vector.extract_strided_slice %35 {offsets = [0, 32], sizes = [48, 8], strides = [1, 1]} : vector<48x96xbf16> to vector<48x8xbf16>
    %38 = vector.extract_strided_slice %35 {offsets = [0, 64], sizes = [48, 8], strides = [1, 1]} : vector<48x96xbf16> to vector<48x8xbf16>
    %cst_17 = arith.constant dense<0.000000e+00> : vector<48x48xf32>
    %39 = tpu.matmul %36, %37, %cst_17 {dimension_numbers = #tpu.dot_dimension_numbers<[1], [1], [0], [0], [0, 0, 1, 0], [], []>} : vector<48x8xbf16>, vector<48x8xbf16>, vector<48x48xf32> -> vector<48x48xf32>
    %40 = arith.addf %39, %6 : vector<48x48xf32>
    %cst_18 = arith.constant dense<0xFF800000> : vector<48xf32>
    %41 = vector.multi_reduction <maximumf>, %40, %cst_18 [1] : vector<48x48xf32> to vector<48xf32>
    %42 = vector.shape_cast %41 : vector<48xf32> to vector<48x1xf32>
    %43 = vector.broadcast %42 : vector<48x1xf32> to vector<48x48xf32>
    %44 = arith.subf %40, %43 : vector<48x48xf32>
    %45 = math.exp %44 : vector<48x48xf32>
    %cst_19 = arith.constant dense<0.000000e+00> : vector<48xf32>
    %46 = vector.multi_reduction <add>, %45, %cst_19 [1] : vector<48x48xf32> to vector<48xf32>
    %47 = vector.shape_cast %46 : vector<48xf32> to vector<48x1xf32>
    %48 = tpu.reciprocal %47 {approx = true} : vector<48x1xf32> -> vector<48x1xf32>
    %49 = vector.broadcast %48 : vector<48x1xf32> to vector<48x48xf32>
    %50 = arith.mulf %45, %49 : vector<48x48xf32>
    %51 = arith.truncf %50 : vector<48x48xf32> to vector<48x48xbf16>
    %cst_20 = arith.constant dense<0.000000e+00> : vector<48x8xf32>
    %52 = tpu.matmul %51, %38, %cst_20 {dimension_numbers = #tpu.dot_dimension_numbers<[1], [0], [0], [1], [0, 0, 1, 1], [], []>} : vector<48x48xbf16>, vector<48x8xbf16>, vector<48x8xf32> -> vector<48x8xf32>
    %53 = vector.extract_strided_slice %35 {offsets = [0, 8], sizes = [48, 8], strides = [1, 1]} : vector<48x96xbf16> to vector<48x8xbf16>
    %54 = vector.extract_strided_slice %35 {offsets = [0, 40], sizes = [48, 8], strides = [1, 1]} : vector<48x96xbf16> to vector<48x8xbf16>
    %55 = vector.extract_strided_slice %35 {offsets = [0, 72], sizes = [48, 8], strides = [1, 1]} : vector<48x96xbf16> to vector<48x8xbf16>
    %cst_21 = arith.constant dense<0.000000e+00> : vector<48x48xf32>
    %56 = tpu.matmul %53, %54, %cst_21 {dimension_numbers = #tpu.dot_dimension_numbers<[1], [1], [0], [0], [0, 0, 1, 0], [], []>} : vector<48x8xbf16>, vector<48x8xbf16>, vector<48x48xf32> -> vector<48x48xf32>
    %57 = arith.addf %56, %6 : vector<48x48xf32>
    %cst_22 = arith.constant dense<0xFF800000> : vector<48xf32>
    %58 = vector.multi_reduction <maximumf>, %57, %cst_22 [1] : vector<48x48xf32> to vector<48xf32>
    %59 = vector.shape_cast %58 : vector<48xf32> to vector<48x1xf32>
    %60 = vector.broadcast %59 : vector<48x1xf32> to vector<48x48xf32>
    %61 = arith.subf %57, %60 : vector<48x48xf32>
    %62 = math.exp %61 : vector<48x48xf32>
    %cst_23 = arith.constant dense<0.000000e+00> : vector<48xf32>
    %63 = vector.multi_reduction <add>, %62, %cst_23 [1] : vector<48x48xf32> to vector<48xf32>
    %64 = vector.shape_cast %63 : vector<48xf32> to vector<48x1xf32>
    %65 = tpu.reciprocal %64 {approx = true} : vector<48x1xf32> -> vector<48x1xf32>
    %66 = vector.broadcast %65 : vector<48x1xf32> to vector<48x48xf32>
    %67 = arith.mulf %62, %66 : vector<48x48xf32>
    %68 = arith.truncf %67 : vector<48x48xf32> to vector<48x48xbf16>
    %cst_24 = arith.constant dense<0.000000e+00> : vector<48x8xf32>
    %69 = tpu.matmul %68, %55, %cst_24 {dimension_numbers = #tpu.dot_dimension_numbers<[1], [0], [0], [1], [0, 0, 1, 1], [], []>} : vector<48x48xbf16>, vector<48x8xbf16>, vector<48x8xf32> -> vector<48x8xf32>
    %70 = vector.extract_strided_slice %35 {offsets = [0, 16], sizes = [48, 8], strides = [1, 1]} : vector<48x96xbf16> to vector<48x8xbf16>
    %71 = vector.extract_strided_slice %35 {offsets = [0, 48], sizes = [48, 8], strides = [1, 1]} : vector<48x96xbf16> to vector<48x8xbf16>
    %72 = vector.extract_strided_slice %35 {offsets = [0, 80], sizes = [48, 8], strides = [1, 1]} : vector<48x96xbf16> to vector<48x8xbf16>
    %cst_25 = arith.constant dense<0.000000e+00> : vector<48x48xf32>
    %73 = tpu.matmul %70, %71, %cst_25 {dimension_numbers = #tpu.dot_dimension_numbers<[1], [1], [0], [0], [0, 0, 1, 0], [], []>} : vector<48x8xbf16>, vector<48x8xbf16>, vector<48x48xf32> -> vector<48x48xf32>
    %74 = arith.addf %73, %6 : vector<48x48xf32>
    %cst_26 = arith.constant dense<0xFF800000> : vector<48xf32>
    %75 = vector.multi_reduction <maximumf>, %74, %cst_26 [1] : vector<48x48xf32> to vector<48xf32>
    %76 = vector.shape_cast %75 : vector<48xf32> to vector<48x1xf32>
    %77 = vector.broadcast %76 : vector<48x1xf32> to vector<48x48xf32>
    %78 = arith.subf %74, %77 : vector<48x48xf32>
    %79 = math.exp %78 : vector<48x48xf32>
    %cst_27 = arith.constant dense<0.000000e+00> : vector<48xf32>
    %80 = vector.multi_reduction <add>, %79, %cst_27 [1] : vector<48x48xf32> to vector<48xf32>
    %81 = vector.shape_cast %80 : vector<48xf32> to vector<48x1xf32>
    %82 = tpu.reciprocal %81 {approx = true} : vector<48x1xf32> -> vector<48x1xf32>
    %83 = vector.broadcast %82 : vector<48x1xf32> to vector<48x48xf32>
    %84 = arith.mulf %79, %83 : vector<48x48xf32>
    %85 = arith.truncf %84 : vector<48x48xf32> to vector<48x48xbf16>
    %cst_28 = arith.constant dense<0.000000e+00> : vector<48x8xf32>
    %86 = tpu.matmul %85, %72, %cst_28 {dimension_numbers = #tpu.dot_dimension_numbers<[1], [0], [0], [1], [0, 0, 1, 1], [], []>} : vector<48x48xbf16>, vector<48x8xbf16>, vector<48x8xf32> -> vector<48x8xf32>
    %87 = vector.extract_strided_slice %35 {offsets = [0, 24], sizes = [48, 8], strides = [1, 1]} : vector<48x96xbf16> to vector<48x8xbf16>
    %88 = vector.extract_strided_slice %35 {offsets = [0, 56], sizes = [48, 8], strides = [1, 1]} : vector<48x96xbf16> to vector<48x8xbf16>
    %89 = vector.extract_strided_slice %35 {offsets = [0, 88], sizes = [48, 8], strides = [1, 1]} : vector<48x96xbf16> to vector<48x8xbf16>
    %cst_29 = arith.constant dense<0.000000e+00> : vector<48x48xf32>
    %90 = tpu.matmul %87, %88, %cst_29 {dimension_numbers = #tpu.dot_dimension_numbers<[1], [1], [0], [0], [0, 0, 1, 0], [], []>} : vector<48x8xbf16>, vector<48x8xbf16>, vector<48x48xf32> -> vector<48x48xf32>
    %91 = arith.addf %90, %6 : vector<48x48xf32>
    %cst_30 = arith.constant dense<0xFF800000> : vector<48xf32>
    %92 = vector.multi_reduction <maximumf>, %91, %cst_30 [1] : vector<48x48xf32> to vector<48xf32>
    %93 = vector.shape_cast %92 : vector<48xf32> to vector<48x1xf32>
    %94 = vector.broadcast %93 : vector<48x1xf32> to vector<48x48xf32>
    %95 = arith.subf %91, %94 : vector<48x48xf32>
    %96 = math.exp %95 : vector<48x48xf32>
    %cst_31 = arith.constant dense<0.000000e+00> : vector<48xf32>
    %97 = vector.multi_reduction <add>, %96, %cst_31 [1] : vector<48x48xf32> to vector<48xf32>
    %98 = vector.shape_cast %97 : vector<48xf32> to vector<48x1xf32>
    %99 = tpu.reciprocal %98 {approx = true} : vector<48x1xf32> -> vector<48x1xf32>
    %100 = vector.broadcast %99 : vector<48x1xf32> to vector<48x48xf32>
    %101 = arith.mulf %96, %100 : vector<48x48xf32>
    %102 = arith.truncf %101 : vector<48x48xf32> to vector<48x48xbf16>
    %cst_32 = arith.constant dense<0.000000e+00> : vector<48x8xf32>
    %103 = tpu.matmul %102, %89, %cst_32 {dimension_numbers = #tpu.dot_dimension_numbers<[1], [0], [0], [1], [0, 0, 1, 1], [], []>} : vector<48x48xbf16>, vector<48x8xbf16>, vector<48x8xf32> -> vector<48x8xf32>
    %104 = tpu.concatenate %52, %69, %86, %103 in 1 : vector<48x8xf32>, vector<48x8xf32>, vector<48x8xf32>, vector<48x8xf32> -> vector<48x32xf32>
    %105 = arith.truncf %104 : vector<48x32xf32> to vector<48x32xbf16>
    %c96 = arith.constant 96 : index
    %c0_33 = arith.constant 0 : index
    %106 = vector.load %arg2[%c96, %c0_33] : memref<544x128xbf16, #tpu.memory_space<vmem>>, vector<32x32xbf16>
    %cst_34 = arith.constant dense<0.000000e+00> : vector<48x32xf32>
    %107 = tpu.matmul %105, %106, %cst_34 {dimension_numbers = #tpu.dot_dimension_numbers<[1], [0], [0], [1], [0, 0, 1, 1], [], []>} : vector<48x32xbf16>, vector<32x32xbf16>, vector<48x32xf32> -> vector<48x32xf32>
    %c53 = arith.constant 53 : index
    %c0_35 = arith.constant 0 : index
    %108 = vector.load %arg3[%c53, %c0_35] : memref<72x128xf32, #tpu.memory_space<vmem>>, vector<1x32xf32>
    %109 = vector.broadcast %108 : vector<1x32xf32> to vector<48x32xf32>
    %110 = arith.addf %107, %109 : vector<48x32xf32>
    %111 = arith.addf %5, %110 : vector<48x32xf32>
    %c50 = arith.constant 50 : index
    %c0_36 = arith.constant 0 : index
    %112 = vector.load %arg3[%c50, %c0_36] : memref<72x128xf32, #tpu.memory_space<vmem>>, vector<1x32xf32>
    %c51 = arith.constant 51 : index
    %c0_37 = arith.constant 0 : index
    %113 = vector.load %arg3[%c51, %c0_37] : memref<72x128xf32, #tpu.memory_space<vmem>>, vector<1x32xf32>
    %cst_38 = arith.constant dense<0.000000e+00> : vector<48xf32>
    %114 = vector.multi_reduction <add>, %111, %cst_38 [1] : vector<48x32xf32> to vector<48xf32>
    %115 = vector.shape_cast %114 : vector<48xf32> to vector<48x1xf32>
    %cst_39 = arith.constant 3.200000e+01 : f32
    %116 = vector.broadcast %cst_39 : f32 to vector<48x1xf32>
    %117 = arith.divf %115, %116 : vector<48x1xf32>
    %118 = vector.broadcast %117 : vector<48x1xf32> to vector<48x32xf32>
    %119 = arith.subf %111, %118 : vector<48x32xf32>
    %120 = arith.mulf %119, %119 : vector<48x32xf32>
    %cst_40 = arith.constant dense<0.000000e+00> : vector<48xf32>
    %121 = vector.multi_reduction <add>, %120, %cst_40 [1] : vector<48x32xf32> to vector<48xf32>
    %122 = vector.shape_cast %121 : vector<48xf32> to vector<48x1xf32>
    %cst_41 = arith.constant 3.200000e+01 : f32
    %123 = vector.broadcast %cst_41 : f32 to vector<48x1xf32>
    %124 = arith.divf %122, %123 : vector<48x1xf32>
    %cst_42 = arith.constant 9.99999997E-7 : f32
    %125 = vector.broadcast %cst_42 : f32 to vector<48x1xf32>
    %126 = arith.addf %124, %125 : vector<48x1xf32>
    %127 = math.rsqrt %126 : vector<48x1xf32>
    %128 = vector.broadcast %127 : vector<48x1xf32> to vector<48x32xf32>
    %129 = arith.mulf %119, %128 : vector<48x32xf32>
    %130 = vector.broadcast %112 : vector<1x32xf32> to vector<48x32xf32>
    %131 = arith.mulf %129, %130 : vector<48x32xf32>
    %132 = vector.broadcast %113 : vector<1x32xf32> to vector<48x32xf32>
    %133 = arith.addf %131, %132 : vector<48x32xf32>
    %134 = arith.truncf %133 : vector<48x32xf32> to vector<48x32xbf16>
    %c128 = arith.constant 128 : index
    %c0_43 = arith.constant 0 : index
    %135 = vector.load %arg2[%c128, %c0_43] : memref<544x128xbf16, #tpu.memory_space<vmem>>, vector<32x128xbf16>
    %cst_44 = arith.constant dense<0.000000e+00> : vector<48x128xf32>
    %136 = tpu.matmul %134, %135, %cst_44 {dimension_numbers = #tpu.dot_dimension_numbers<[1], [0], [0], [1], [0, 0, 1, 1], [], []>} : vector<48x32xbf16>, vector<32x128xbf16>, vector<48x128xf32> -> vector<48x128xf32>
    %c54 = arith.constant 54 : index
    %c0_45 = arith.constant 0 : index
    %137 = vector.load %arg3[%c54, %c0_45] : memref<72x128xf32, #tpu.memory_space<vmem>>, vector<1x128xf32>
    %138 = vector.broadcast %137 : vector<1x128xf32> to vector<48x128xf32>
    %139 = arith.addf %136, %138 : vector<48x128xf32>
    %140 = arith.mulf %139, %139 : vector<48x128xf32>
    %141 = arith.mulf %139, %140 : vector<48x128xf32>
    %cst_46 = arith.constant 4.471500e-02 : f32
    %142 = vector.broadcast %cst_46 : f32 to vector<48x128xf32>
    %143 = arith.mulf %142, %141 : vector<48x128xf32>
    %144 = arith.addf %139, %143 : vector<48x128xf32>
    %cst_47 = arith.constant 0.797884583 : f32
    %145 = vector.broadcast %cst_47 : f32 to vector<48x128xf32>
    %146 = arith.mulf %145, %144 : vector<48x128xf32>
    %147 = math.tanh %146 : vector<48x128xf32>
    %cst_48 = arith.constant 1.000000e+00 : f32
    %148 = vector.broadcast %cst_48 : f32 to vector<48x128xf32>
    %149 = arith.addf %148, %147 : vector<48x128xf32>
    %cst_49 = arith.constant 5.000000e-01 : f32
    %150 = vector.broadcast %cst_49 : f32 to vector<48x128xf32>
    %151 = arith.mulf %150, %149 : vector<48x128xf32>
    %152 = arith.mulf %139, %151 : vector<48x128xf32>
    %153 = arith.truncf %152 : vector<48x128xf32> to vector<48x128xbf16>
    %c160 = arith.constant 160 : index
    %c0_50 = arith.constant 0 : index
    %154 = vector.load %arg2[%c160, %c0_50] : memref<544x128xbf16, #tpu.memory_space<vmem>>, vector<128x32xbf16>
    %cst_51 = arith.constant dense<0.000000e+00> : vector<48x32xf32>
    %155 = tpu.matmul %153, %154, %cst_51 {dimension_numbers = #tpu.dot_dimension_numbers<[1], [0], [0], [1], [0, 0, 1, 1], [], []>} : vector<48x128xbf16>, vector<128x32xbf16>, vector<48x32xf32> -> vector<48x32xf32>
    %156 = arith.addf %111, %155 : vector<48x32xf32>
    %c55 = arith.constant 55 : index
    %c0_52 = arith.constant 0 : index
    %157 = vector.load %arg3[%c55, %c0_52] : memref<72x128xf32, #tpu.memory_space<vmem>>, vector<1x32xf32>
    %158 = vector.broadcast %157 : vector<1x32xf32> to vector<48x32xf32>
    %159 = arith.addf %156, %158 : vector<48x32xf32>
    %c56 = arith.constant 56 : index
    %c0_53 = arith.constant 0 : index
    %160 = vector.load %arg3[%c56, %c0_53] : memref<72x128xf32, #tpu.memory_space<vmem>>, vector<1x32xf32>
    %c57 = arith.constant 57 : index
    %c0_54 = arith.constant 0 : index
    %161 = vector.load %arg3[%c57, %c0_54] : memref<72x128xf32, #tpu.memory_space<vmem>>, vector<1x32xf32>
    %cst_55 = arith.constant dense<0.000000e+00> : vector<48xf32>
    %162 = vector.multi_reduction <add>, %159, %cst_55 [1] : vector<48x32xf32> to vector<48xf32>
    %163 = vector.shape_cast %162 : vector<48xf32> to vector<48x1xf32>
    %cst_56 = arith.constant 3.200000e+01 : f32
    %164 = vector.broadcast %cst_56 : f32 to vector<48x1xf32>
    %165 = arith.divf %163, %164 : vector<48x1xf32>
    %166 = vector.broadcast %165 : vector<48x1xf32> to vector<48x32xf32>
    %167 = arith.subf %159, %166 : vector<48x32xf32>
    %168 = arith.mulf %167, %167 : vector<48x32xf32>
    %cst_57 = arith.constant dense<0.000000e+00> : vector<48xf32>
    %169 = vector.multi_reduction <add>, %168, %cst_57 [1] : vector<48x32xf32> to vector<48xf32>
    %170 = vector.shape_cast %169 : vector<48xf32> to vector<48x1xf32>
    %cst_58 = arith.constant 3.200000e+01 : f32
    %171 = vector.broadcast %cst_58 : f32 to vector<48x1xf32>
    %172 = arith.divf %170, %171 : vector<48x1xf32>
    %cst_59 = arith.constant 9.99999997E-7 : f32
    %173 = vector.broadcast %cst_59 : f32 to vector<48x1xf32>
    %174 = arith.addf %172, %173 : vector<48x1xf32>
    %175 = math.rsqrt %174 : vector<48x1xf32>
    %176 = vector.broadcast %175 : vector<48x1xf32> to vector<48x32xf32>
    %177 = arith.mulf %167, %176 : vector<48x32xf32>
    %178 = vector.broadcast %160 : vector<1x32xf32> to vector<48x32xf32>
    %179 = arith.mulf %177, %178 : vector<48x32xf32>
    %180 = vector.broadcast %161 : vector<1x32xf32> to vector<48x32xf32>
    %181 = arith.addf %179, %180 : vector<48x32xf32>
    %182 = arith.truncf %181 : vector<48x32xf32> to vector<48x32xbf16>
    %c288 = arith.constant 288 : index
    %c0_60 = arith.constant 0 : index
    %183 = vector.load %arg2[%c288, %c0_60] : memref<544x128xbf16, #tpu.memory_space<vmem>>, vector<32x96xbf16>
    %cst_61 = arith.constant dense<0.000000e+00> : vector<48x96xf32>
    %184 = tpu.matmul %182, %183, %cst_61 {dimension_numbers = #tpu.dot_dimension_numbers<[1], [0], [0], [1], [0, 0, 1, 1], [], []>} : vector<48x32xbf16>, vector<32x96xbf16>, vector<48x96xf32> -> vector<48x96xf32>
    %c60 = arith.constant 60 : index
    %c0_62 = arith.constant 0 : index
    %185 = vector.load %arg3[%c60, %c0_62] : memref<72x128xf32, #tpu.memory_space<vmem>>, vector<1x96xf32>
    %186 = vector.broadcast %185 : vector<1x96xf32> to vector<48x96xf32>
    %187 = arith.addf %184, %186 : vector<48x96xf32>
    %188 = arith.truncf %187 : vector<48x96xf32> to vector<48x96xbf16>
    %189 = vector.extract_strided_slice %188 {offsets = [0, 0], sizes = [48, 8], strides = [1, 1]} : vector<48x96xbf16> to vector<48x8xbf16>
    %190 = vector.extract_strided_slice %188 {offsets = [0, 32], sizes = [48, 8], strides = [1, 1]} : vector<48x96xbf16> to vector<48x8xbf16>
    %191 = vector.extract_strided_slice %188 {offsets = [0, 64], sizes = [48, 8], strides = [1, 1]} : vector<48x96xbf16> to vector<48x8xbf16>
    %cst_63 = arith.constant dense<0.000000e+00> : vector<48x48xf32>
    %192 = tpu.matmul %189, %190, %cst_63 {dimension_numbers = #tpu.dot_dimension_numbers<[1], [1], [0], [0], [0, 0, 1, 0], [], []>} : vector<48x8xbf16>, vector<48x8xbf16>, vector<48x48xf32> -> vector<48x48xf32>
    %193 = arith.addf %192, %6 : vector<48x48xf32>
    %cst_64 = arith.constant dense<0xFF800000> : vector<48xf32>
    %194 = vector.multi_reduction <maximumf>, %193, %cst_64 [1] : vector<48x48xf32> to vector<48xf32>
    %195 = vector.shape_cast %194 : vector<48xf32> to vector<48x1xf32>
    %196 = vector.broadcast %195 : vector<48x1xf32> to vector<48x48xf32>
    %197 = arith.subf %193, %196 : vector<48x48xf32>
    %198 = math.exp %197 : vector<48x48xf32>
    %cst_65 = arith.constant dense<0.000000e+00> : vector<48xf32>
    %199 = vector.multi_reduction <add>, %198, %cst_65 [1] : vector<48x48xf32> to vector<48xf32>
    %200 = vector.shape_cast %199 : vector<48xf32> to vector<48x1xf32>
    %201 = tpu.reciprocal %200 {approx = true} : vector<48x1xf32> -> vector<48x1xf32>
    %202 = vector.broadcast %201 : vector<48x1xf32> to vector<48x48xf32>
    %203 = arith.mulf %198, %202 : vector<48x48xf32>
    %204 = arith.truncf %203 : vector<48x48xf32> to vector<48x48xbf16>
    %cst_66 = arith.constant dense<0.000000e+00> : vector<48x8xf32>
    %205 = tpu.matmul %204, %191, %cst_66 {dimension_numbers = #tpu.dot_dimension_numbers<[1], [0], [0], [1], [0, 0, 1, 1], [], []>} : vector<48x48xbf16>, vector<48x8xbf16>, vector<48x8xf32> -> vector<48x8xf32>
    %206 = vector.extract_strided_slice %188 {offsets = [0, 8], sizes = [48, 8], strides = [1, 1]} : vector<48x96xbf16> to vector<48x8xbf16>
    %207 = vector.extract_strided_slice %188 {offsets = [0, 40], sizes = [48, 8], strides = [1, 1]} : vector<48x96xbf16> to vector<48x8xbf16>
    %208 = vector.extract_strided_slice %188 {offsets = [0, 72], sizes = [48, 8], strides = [1, 1]} : vector<48x96xbf16> to vector<48x8xbf16>
    %cst_67 = arith.constant dense<0.000000e+00> : vector<48x48xf32>
    %209 = tpu.matmul %206, %207, %cst_67 {dimension_numbers = #tpu.dot_dimension_numbers<[1], [1], [0], [0], [0, 0, 1, 0], [], []>} : vector<48x8xbf16>, vector<48x8xbf16>, vector<48x48xf32> -> vector<48x48xf32>
    %210 = arith.addf %209, %6 : vector<48x48xf32>
    %cst_68 = arith.constant dense<0xFF800000> : vector<48xf32>
    %211 = vector.multi_reduction <maximumf>, %210, %cst_68 [1] : vector<48x48xf32> to vector<48xf32>
    %212 = vector.shape_cast %211 : vector<48xf32> to vector<48x1xf32>
    %213 = vector.broadcast %212 : vector<48x1xf32> to vector<48x48xf32>
    %214 = arith.subf %210, %213 : vector<48x48xf32>
    %215 = math.exp %214 : vector<48x48xf32>
    %cst_69 = arith.constant dense<0.000000e+00> : vector<48xf32>
    %216 = vector.multi_reduction <add>, %215, %cst_69 [1] : vector<48x48xf32> to vector<48xf32>
    %217 = vector.shape_cast %216 : vector<48xf32> to vector<48x1xf32>
    %218 = tpu.reciprocal %217 {approx = true} : vector<48x1xf32> -> vector<48x1xf32>
    %219 = vector.broadcast %218 : vector<48x1xf32> to vector<48x48xf32>
    %220 = arith.mulf %215, %219 : vector<48x48xf32>
    %221 = arith.truncf %220 : vector<48x48xf32> to vector<48x48xbf16>
    %cst_70 = arith.constant dense<0.000000e+00> : vector<48x8xf32>
    %222 = tpu.matmul %221, %208, %cst_70 {dimension_numbers = #tpu.dot_dimension_numbers<[1], [0], [0], [1], [0, 0, 1, 1], [], []>} : vector<48x48xbf16>, vector<48x8xbf16>, vector<48x8xf32> -> vector<48x8xf32>
    %223 = vector.extract_strided_slice %188 {offsets = [0, 16], sizes = [48, 8], strides = [1, 1]} : vector<48x96xbf16> to vector<48x8xbf16>
    %224 = vector.extract_strided_slice %188 {offsets = [0, 48], sizes = [48, 8], strides = [1, 1]} : vector<48x96xbf16> to vector<48x8xbf16>
    %225 = vector.extract_strided_slice %188 {offsets = [0, 80], sizes = [48, 8], strides = [1, 1]} : vector<48x96xbf16> to vector<48x8xbf16>
    %cst_71 = arith.constant dense<0.000000e+00> : vector<48x48xf32>
    %226 = tpu.matmul %223, %224, %cst_71 {dimension_numbers = #tpu.dot_dimension_numbers<[1], [1], [0], [0], [0, 0, 1, 0], [], []>} : vector<48x8xbf16>, vector<48x8xbf16>, vector<48x48xf32> -> vector<48x48xf32>
    %227 = arith.addf %226, %6 : vector<48x48xf32>
    %cst_72 = arith.constant dense<0xFF800000> : vector<48xf32>
    %228 = vector.multi_reduction <maximumf>, %227, %cst_72 [1] : vector<48x48xf32> to vector<48xf32>
    %229 = vector.shape_cast %228 : vector<48xf32> to vector<48x1xf32>
    %230 = vector.broadcast %229 : vector<48x1xf32> to vector<48x48xf32>
    %231 = arith.subf %227, %230 : vector<48x48xf32>
    %232 = math.exp %231 : vector<48x48xf32>
    %cst_73 = arith.constant dense<0.000000e+00> : vector<48xf32>
    %233 = vector.multi_reduction <add>, %232, %cst_73 [1] : vector<48x48xf32> to vector<48xf32>
    %234 = vector.shape_cast %233 : vector<48xf32> to vector<48x1xf32>
    %235 = tpu.reciprocal %234 {approx = true} : vector<48x1xf32> -> vector<48x1xf32>
    %236 = vector.broadcast %235 : vector<48x1xf32> to vector<48x48xf32>
    %237 = arith.mulf %232, %236 : vector<48x48xf32>
    %238 = arith.truncf %237 : vector<48x48xf32> to vector<48x48xbf16>
    %cst_74 = arith.constant dense<0.000000e+00> : vector<48x8xf32>
    %239 = tpu.matmul %238, %225, %cst_74 {dimension_numbers = #tpu.dot_dimension_numbers<[1], [0], [0], [1], [0, 0, 1, 1], [], []>} : vector<48x48xbf16>, vector<48x8xbf16>, vector<48x8xf32> -> vector<48x8xf32>
    %240 = vector.extract_strided_slice %188 {offsets = [0, 24], sizes = [48, 8], strides = [1, 1]} : vector<48x96xbf16> to vector<48x8xbf16>
    %241 = vector.extract_strided_slice %188 {offsets = [0, 56], sizes = [48, 8], strides = [1, 1]} : vector<48x96xbf16> to vector<48x8xbf16>
    %242 = vector.extract_strided_slice %188 {offsets = [0, 88], sizes = [48, 8], strides = [1, 1]} : vector<48x96xbf16> to vector<48x8xbf16>
    %cst_75 = arith.constant dense<0.000000e+00> : vector<48x48xf32>
    %243 = tpu.matmul %240, %241, %cst_75 {dimension_numbers = #tpu.dot_dimension_numbers<[1], [1], [0], [0], [0, 0, 1, 0], [], []>} : vector<48x8xbf16>, vector<48x8xbf16>, vector<48x48xf32> -> vector<48x48xf32>
    %244 = arith.addf %243, %6 : vector<48x48xf32>
    %cst_76 = arith.constant dense<0xFF800000> : vector<48xf32>
    %245 = vector.multi_reduction <maximumf>, %244, %cst_76 [1] : vector<48x48xf32> to vector<48xf32>
    %246 = vector.shape_cast %245 : vector<48xf32> to vector<48x1xf32>
    %247 = vector.broadcast %246 : vector<48x1xf32> to vector<48x48xf32>
    %248 = arith.subf %244, %247 : vector<48x48xf32>
    %249 = math.exp %248 : vector<48x48xf32>
    %cst_77 = arith.constant dense<0.000000e+00> : vector<48xf32>
    %250 = vector.multi_reduction <add>, %249, %cst_77 [1] : vector<48x48xf32> to vector<48xf32>
    %251 = vector.shape_cast %250 : vector<48xf32> to vector<48x1xf32>
    %252 = tpu.reciprocal %251 {approx = true} : vector<48x1xf32> -> vector<48x1xf32>
    %253 = vector.broadcast %252 : vector<48x1xf32> to vector<48x48xf32>
    %254 = arith.mulf %249, %253 : vector<48x48xf32>
    %255 = arith.truncf %254 : vector<48x48xf32> to vector<48x48xbf16>
    %cst_78 = arith.constant dense<0.000000e+00> : vector<48x8xf32>
    %256 = tpu.matmul %255, %242, %cst_78 {dimension_numbers = #tpu.dot_dimension_numbers<[1], [0], [0], [1], [0, 0, 1, 1], [], []>} : vector<48x48xbf16>, vector<48x8xbf16>, vector<48x8xf32> -> vector<48x8xf32>
    %257 = tpu.concatenate %205, %222, %239, %256 in 1 : vector<48x8xf32>, vector<48x8xf32>, vector<48x8xf32>, vector<48x8xf32> -> vector<48x32xf32>
    %258 = arith.truncf %257 : vector<48x32xf32> to vector<48x32xbf16>
    %c320 = arith.constant 320 : index
    %c0_79 = arith.constant 0 : index
    %259 = vector.load %arg2[%c320, %c0_79] : memref<544x128xbf16, #tpu.memory_space<vmem>>, vector<32x32xbf16>
    %cst_80 = arith.constant dense<0.000000e+00> : vector<48x32xf32>
    %260 = tpu.matmul %258, %259, %cst_80 {dimension_numbers = #tpu.dot_dimension_numbers<[1], [0], [0], [1], [0, 0, 1, 1], [], []>} : vector<48x32xbf16>, vector<32x32xbf16>, vector<48x32xf32> -> vector<48x32xf32>
    %c61 = arith.constant 61 : index
    %c0_81 = arith.constant 0 : index
    %261 = vector.load %arg3[%c61, %c0_81] : memref<72x128xf32, #tpu.memory_space<vmem>>, vector<1x32xf32>
    %262 = vector.broadcast %261 : vector<1x32xf32> to vector<48x32xf32>
    %263 = arith.addf %260, %262 : vector<48x32xf32>
    %264 = arith.addf %159, %263 : vector<48x32xf32>
    %c58 = arith.constant 58 : index
    %c0_82 = arith.constant 0 : index
    %265 = vector.load %arg3[%c58, %c0_82] : memref<72x128xf32, #tpu.memory_space<vmem>>, vector<1x32xf32>
    %c59 = arith.constant 59 : index
    %c0_83 = arith.constant 0 : index
    %266 = vector.load %arg3[%c59, %c0_83] : memref<72x128xf32, #tpu.memory_space<vmem>>, vector<1x32xf32>
    %cst_84 = arith.constant dense<0.000000e+00> : vector<48xf32>
    %267 = vector.multi_reduction <add>, %264, %cst_84 [1] : vector<48x32xf32> to vector<48xf32>
    %268 = vector.shape_cast %267 : vector<48xf32> to vector<48x1xf32>
    %cst_85 = arith.constant 3.200000e+01 : f32
    %269 = vector.broadcast %cst_85 : f32 to vector<48x1xf32>
    %270 = arith.divf %268, %269 : vector<48x1xf32>
    %271 = vector.broadcast %270 : vector<48x1xf32> to vector<48x32xf32>
    %272 = arith.subf %264, %271 : vector<48x32xf32>
    %273 = arith.mulf %272, %272 : vector<48x32xf32>
    %cst_86 = arith.constant dense<0.000000e+00> : vector<48xf32>
    %274 = vector.multi_reduction <add>, %273, %cst_86 [1] : vector<48x32xf32> to vector<48xf32>
    %275 = vector.shape_cast %274 : vector<48xf32> to vector<48x1xf32>
    %cst_87 = arith.constant 3.200000e+01 : f32
    %276 = vector.broadcast %cst_87 : f32 to vector<48x1xf32>
    %277 = arith.divf %275, %276 : vector<48x1xf32>
    %cst_88 = arith.constant 9.99999997E-7 : f32
    %278 = vector.broadcast %cst_88 : f32 to vector<48x1xf32>
    %279 = arith.addf %277, %278 : vector<48x1xf32>
    %280 = math.rsqrt %279 : vector<48x1xf32>
    %281 = vector.broadcast %280 : vector<48x1xf32> to vector<48x32xf32>
    %282 = arith.mulf %272, %281 : vector<48x32xf32>
    %283 = vector.broadcast %265 : vector<1x32xf32> to vector<48x32xf32>
    %284 = arith.mulf %282, %283 : vector<48x32xf32>
    %285 = vector.broadcast %266 : vector<1x32xf32> to vector<48x32xf32>
    %286 = arith.addf %284, %285 : vector<48x32xf32>
    %287 = arith.truncf %286 : vector<48x32xf32> to vector<48x32xbf16>
    %c352 = arith.constant 352 : index
    %c0_89 = arith.constant 0 : index
    %288 = vector.load %arg2[%c352, %c0_89] : memref<544x128xbf16, #tpu.memory_space<vmem>>, vector<32x128xbf16>
    %cst_90 = arith.constant dense<0.000000e+00> : vector<48x128xf32>
    %289 = tpu.matmul %287, %288, %cst_90 {dimension_numbers = #tpu.dot_dimension_numbers<[1], [0], [0], [1], [0, 0, 1, 1], [], []>} : vector<48x32xbf16>, vector<32x128xbf16>, vector<48x128xf32> -> vector<48x128xf32>
    %c62 = arith.constant 62 : index
    %c0_91 = arith.constant 0 : index
    %290 = vector.load %arg3[%c62, %c0_91] : memref<72x128xf32, #tpu.memory_space<vmem>>, vector<1x128xf32>
    %291 = vector.broadcast %290 : vector<1x128xf32> to vector<48x128xf32>
    %292 = arith.addf %289, %291 : vector<48x128xf32>
    %293 = arith.mulf %292, %292 : vector<48x128xf32>
    %294 = arith.mulf %292, %293 : vector<48x128xf32>
    %cst_92 = arith.constant 4.471500e-02 : f32
    %295 = vector.broadcast %cst_92 : f32 to vector<48x128xf32>
    %296 = arith.mulf %295, %294 : vector<48x128xf32>
    %297 = arith.addf %292, %296 : vector<48x128xf32>
    %cst_93 = arith.constant 0.797884583 : f32
    %298 = vector.broadcast %cst_93 : f32 to vector<48x128xf32>
    %299 = arith.mulf %298, %297 : vector<48x128xf32>
    %300 = math.tanh %299 : vector<48x128xf32>
    %cst_94 = arith.constant 1.000000e+00 : f32
    %301 = vector.broadcast %cst_94 : f32 to vector<48x128xf32>
    %302 = arith.addf %301, %300 : vector<48x128xf32>
    %cst_95 = arith.constant 5.000000e-01 : f32
    %303 = vector.broadcast %cst_95 : f32 to vector<48x128xf32>
    %304 = arith.mulf %303, %302 : vector<48x128xf32>
    %305 = arith.mulf %292, %304 : vector<48x128xf32>
    %306 = arith.truncf %305 : vector<48x128xf32> to vector<48x128xbf16>
    %c384 = arith.constant 384 : index
    %c0_96 = arith.constant 0 : index
    %307 = vector.load %arg2[%c384, %c0_96] : memref<544x128xbf16, #tpu.memory_space<vmem>>, vector<128x32xbf16>
    %cst_97 = arith.constant dense<0.000000e+00> : vector<48x32xf32>
    %308 = tpu.matmul %306, %307, %cst_97 {dimension_numbers = #tpu.dot_dimension_numbers<[1], [0], [0], [1], [0, 0, 1, 1], [], []>} : vector<48x128xbf16>, vector<128x32xbf16>, vector<48x32xf32> -> vector<48x32xf32>
    %309 = arith.addf %264, %308 : vector<48x32xf32>
    %c63 = arith.constant 63 : index
    %c0_98 = arith.constant 0 : index
    %310 = vector.load %arg3[%c63, %c0_98] : memref<72x128xf32, #tpu.memory_space<vmem>>, vector<1x32xf32>
    %311 = vector.broadcast %310 : vector<1x32xf32> to vector<48x32xf32>
    %312 = arith.addf %309, %311 : vector<48x32xf32>
    %313 = vector.shape_cast %312 : vector<48x32xf32> to vector<2x24x32xf32>
    %314 = vector.extract_strided_slice %313 {offsets = [0, 0, 0], sizes = [2, 1, 32], strides = [1, 1, 1]} : vector<2x24x32xf32> to vector<2x1x32xf32>
    %315 = vector.shape_cast %314 : vector<2x1x32xf32> to vector<2x32xf32>
    %c64_99 = arith.constant 64 : index
    %c0_100 = arith.constant 0 : index
    %316 = vector.load %arg3[%c64_99, %c0_100] : memref<72x128xf32, #tpu.memory_space<vmem>>, vector<1x32xf32>
    %c65 = arith.constant 65 : index
    %c0_101 = arith.constant 0 : index
    %317 = vector.load %arg3[%c65, %c0_101] : memref<72x128xf32, #tpu.memory_space<vmem>>, vector<1x32xf32>
    %cst_102 = arith.constant dense<0.000000e+00> : vector<2xf32>
    %318 = vector.multi_reduction <add>, %315, %cst_102 [1] : vector<2x32xf32> to vector<2xf32>
    %319 = vector.shape_cast %318 : vector<2xf32> to vector<2x1xf32>
    %cst_103 = arith.constant 3.200000e+01 : f32
    %320 = vector.broadcast %cst_103 : f32 to vector<2x1xf32>
    %321 = arith.divf %319, %320 : vector<2x1xf32>
    %322 = vector.broadcast %321 : vector<2x1xf32> to vector<2x32xf32>
    %323 = arith.subf %315, %322 : vector<2x32xf32>
    %324 = arith.mulf %323, %323 : vector<2x32xf32>
    %cst_104 = arith.constant dense<0.000000e+00> : vector<2xf32>
    %325 = vector.multi_reduction <add>, %324, %cst_104 [1] : vector<2x32xf32> to vector<2xf32>
    %326 = vector.shape_cast %325 : vector<2xf32> to vector<2x1xf32>
    %cst_105 = arith.constant 3.200000e+01 : f32
    %327 = vector.broadcast %cst_105 : f32 to vector<2x1xf32>
    %328 = arith.divf %326, %327 : vector<2x1xf32>
    %cst_106 = arith.constant 9.99999997E-7 : f32
    %329 = vector.broadcast %cst_106 : f32 to vector<2x1xf32>
    %330 = arith.addf %328, %329 : vector<2x1xf32>
    %331 = math.rsqrt %330 : vector<2x1xf32>
    %332 = vector.broadcast %331 : vector<2x1xf32> to vector<2x32xf32>
    %333 = arith.mulf %323, %332 : vector<2x32xf32>
    %334 = vector.broadcast %316 : vector<1x32xf32> to vector<2x32xf32>
    %335 = arith.mulf %333, %334 : vector<2x32xf32>
    %336 = vector.broadcast %317 : vector<1x32xf32> to vector<2x32xf32>
    %337 = arith.addf %335, %336 : vector<2x32xf32>
    %338 = arith.truncf %337 : vector<2x32xf32> to vector<2x32xbf16>
    %c512 = arith.constant 512 : index
    %c0_107 = arith.constant 0 : index
    %339 = vector.load %arg2[%c512, %c0_107] : memref<544x128xbf16, #tpu.memory_space<vmem>>, vector<32x128xbf16>
    %cst_108 = arith.constant dense<0.000000e+00> : vector<2x128xf32>
    %340 = tpu.matmul %338, %339, %cst_108 {dimension_numbers = #tpu.dot_dimension_numbers<[1], [0], [0], [1], [0, 0, 1, 1], [], []>} : vector<2x32xbf16>, vector<32x128xbf16>, vector<2x128xf32> -> vector<2x128xf32>
    %c66 = arith.constant 66 : index
    %c0_109 = arith.constant 0 : index
    %341 = vector.load %arg3[%c66, %c0_109] : memref<72x128xf32, #tpu.memory_space<vmem>>, vector<1x128xf32>
    %342 = vector.broadcast %341 : vector<1x128xf32> to vector<2x128xf32>
    %343 = arith.addf %340, %342 : vector<2x128xf32>
    %c0_110 = arith.constant 0 : index
    %c0_111 = arith.constant 0 : index
    %344 = vector.load %arg4[%c0_110, %c0_111] : memref<2x128xf32, #tpu.memory_space<vmem>>, vector<2x128xf32>
    tpu.vector_store %arg4[%c0_110, %c0_111], %343 {strides = array<i32>} : memref<2x128xf32, #tpu.memory_space<vmem>>, vector<2x128xf32>,
    return
  }
}

</mosaic_0001>

<bundles_post_ra>
// kernel: clip_backbone_forward.1
= control target key start
LH: loop header
LB: loop body
LE: loop exit
PB: predicated region body
PF: predicated region fallthrough
CT: control target
= control target key end

     0   :  { %s5164_s0 = inlined_call_operand.vmem [shape: f32[48,64], index: 0, kind: input, shape index: {}]   ;;  %s5165_s1 = inlined_call_operand.vmem [shape: f32[48,48], index: 1, kind: input, shape index: {}]   ;;  %s5166_s2 = inlined_call_operand.vmem [shape: bf16[544,128], index: 2, kind: input, shape index: {}]   ;;  %s5167_s3 = inlined_call_operand.vmem [shape: f32[72,128], index: 3, kind: input, shape index: {}]   ;;  %s5168_s4 = inlined_call_operand.hbm [shape: f32[2,128], index: 4, kind: output, shape index: {}]  }
   0x1   :  { %v3204_v0 = vld [vmem:[%s5166_s2 + $0x18] sm:$0xff]  ;;  %v3203_v1 = vld [vmem:[%s5166_s2 + $0x10] sm:$0xff]  ;;  %v3202_v2 = vld [vmem:[%s5166_s2 + $0x8] sm:$0xff] }
   0x2   :  { %80 = vmatpush.bf16.msra.mxu0 %v3204_v0 }
   0x6   :  { %81 = vmatpush.bf16.msra.mxu0 %v3203_v1 }
   0x7   :  { %9 = vsyncpa [#allocation3], 0  ;;  %v3201_v3 = vld [vmem:[%s5166_s2] sm:$0xff]  ;;  %v28_v5 = vld [vmem:[%s5164_s0 + $0x8] sm:$0xff]  ;;  %vm66_vm0 = vcmask 523264   ;;  %vm108_vm1 = vcmask 261120  }
   0x8   :  { %v27_v4 = vld [vmem:[%s5164_s0] sm:$0xff]  ;;  %v29_v7 = vld [vmem:[%s5164_s0 + $0x10] sm:$0xff]  ;;  %v30_v8 = vld [vmem:[%s5164_s0 + $0x18] sm:$0xff]  ;;  %v3665_v37 = vmov 32.0   ;;  %s3666_s30 = smov 96   ;;  %s3667_s5 = smov 80  }
   0x9   :  { %v33_v6 = vpack.c.bf16 %v28_v5, %v27_v4  ;;  %v34_v9 = vpack.c.bf16 %v30_v8, %v29_v7  ;;  %v31_v10 = vld [vmem:[%s5164_s0 + $0x20] sm:$0xff]  ;;  %v32_v11 = vld [vmem:[%s5164_s0 + $0x28] sm:$0xff]  ;;  %v38_v21 = vld [vmem:[%s5167_s3 + $0x10] sm:$0xff]  ;;  %3365 = vrcp.f32 %v3665_v37  ;;  %s3668_s6 = smov 88   ;;  %s3669_s7 = smov 112  }
   0xa   :  { %82 = vmatpush.bf16.msra.mxu0 %v3202_v2  ;;  %v35_v12 = vpack.c.bf16 %v32_v11, %v31_v10  ;;  %v36_v13 = vld [vmem:[%s5167_s3] sm:$0xff]  ;;  %v37_v17 = vld [vmem:[%s5167_s3 + $0x8] sm:$0xff]  ;;  %v39_v25 = vld [vmem:[%s5167_s3 + $0x18] sm:$0xff]  ;;  %s3670_s8 = smov 120   ;;  %s3671_s9 = smov 72  }
   0xb   :  { %v40_v29 = vld [vmem:[%s5167_s3 + $0x20] sm:$0xff]  ;;  %v41_v33 = vld [vmem:[%s5167_s3 + $0x28] sm:$0xff]  ;;  %s3672_s10 = smov 104   ;;  %s3673_s11 = smov 56  }
   0xc   :  { %v3206_v10 = vld [vmem:[%s5166_s2 + $0x28] sm:$0xff]  ;;  %s3674_s12 = smov 64   ;;  %s3675_s24 = smov 48  }
   0xd   :  { %298 = vmatpush.bf16.msra.mxu1 %v3206_v10  ;;  %3235 = vmatpush.bf16.msra.mxu2 %v3206_v10  ;;  %s3676_s25 = smov 40   ;;  %s3677_s26 = smov 8  }
   0xe   :  { %83 = vmatpush.bf16.msra.mxu0 %v3201_v3  ;;  %s3678_s27 = smov 16   ;;  %s3679_s28 = smov 24  }
   0xf   :  { %v3366_v38 = vpop.eup %3365  ;;  %s3680_s15 = smov [#allocation2]  }
  0x10   :  { %v128_v39 = vmul.f32 32.0, %v3366_v38  ;;  %vm132_vm2 = vweird.f32 %v3366_v38 }
  0x11   :  { %3011 = vmatmul.msk.bf16.vlgmr.msra.gmra.mxu0 %vm66_vm0, %v33_v6 }
  0x12   :  { %v129_v40 = vsub.f32 1.0, %v128_v39 }
  0x14   :  { %v130_v41 = vmul.f32 %v3366_v38, %v129_v40  ;;  %v3835_v40 = vld [vmem:[%s5167_s3 + $0x30] ss:$0 sm:$0xff] }
  0x16   :  { %v131_v42 = vadd.f32 %v3366_v38, %v130_v41 }
  0x18   :  { %v3778_v43 = vsel %vm132_vm2, %v3366_v38, %v131_v42 }
  0x21   :  { %3012 = vmatmul.msk.bf16.gmra.mxu0 %vm66_vm0, %v34_v9 }
  0x31   :  { %3013 = vmatmul.msk.bf16.gmra.mxu0 %vm66_vm0, %v35_v12 }
  0x8e   :  { %v85_v14 = vpop.f32.mrf.mxu0 }
  0x8f   :  { %v3739_v15 = vadd.f32 %v85_v14, %v36_v13  ;;  %v3205_v13 = vld [vmem:[%s5166_s2 + $0x20] sm:$0xff] }
  0x90   :  { %299 = vmatpush.bf16.msra.mxu1 %v3205_v13  ;;  %3236 = vmatpush.bf16.msra.mxu2 %v3205_v13 }
  0x91   :  { %v109_v16 = vsel %vm108_vm1, %v3739_v15, 0.0 }
  0x92   :  { %110 = vadd.xlane.f32.xlu0 %v109_v16 }
  0x96   :  { %v87_v18 = vpop.f32.mrf.mxu0 }
  0x97   :  { %v3746_v19 = vadd.f32 %v87_v18, %v37_v17 }
  0x99   :  { %v112_v20 = vsel %vm108_vm1, %v3746_v19, 0.0 }
  0x9a   :  { %113 = vadd.xlane.f32.xlu0 %v112_v20 }
  0x9e   :  { %v90_v22 = vpop.f32.mrf.mxu0 }
  0x9f   :  { %v3753_v23 = vadd.f32 %v90_v22, %v38_v21 }
  0xa1   :  { %v115_v24 = vsel %vm108_vm1, %v3753_v23, 0.0 }
  0xa2   :  { %116 = vadd.xlane.f32.xlu2 %v115_v24 }
  0xa6   :  { %v92_v26 = vpop.f32.mrf.mxu0 }
  0xa7   :  { %v3760_v27 = vadd.f32 %v92_v26, %v39_v25 }
  0xa9   :  { %v118_v28 = vsel %vm108_vm1, %v3760_v27, 0.0 }
  0xaa   :  { %119 = vadd.xlane.f32.xlu2 %v118_v28 }
  0xae   :  { %v95_v30 = vpop.f32.mrf.mxu0 }
  0xaf   :  { %v3767_v31 = vadd.f32 %v95_v30, %v40_v29 }
  0xb1   :  { %v121_v32 = vsel %vm108_vm1, %v3767_v31, 0.0 }
  0xb2   :  { %122 = vadd.xlane.f32.xlu1 %v121_v32 }
  0xb6   :  { %v97_v34 = vpop.f32.mrf.mxu0 }
  0xb7   :  { %v3774_v35 = vadd.f32 %v97_v34, %v41_v33 }
  0xb9   :  { %v124_v36 = vsel %vm108_vm1, %v3774_v35, 0.0 }
  0xba   :  { %125 = vadd.xlane.f32.xlu1 %v124_v36 }
 0x105   :  { %v111_v44 = vpop.xlane.xlu0 %110 }
 0x106   :  { %v134_v45 = vmul.f32 %v3778_v43, %v111_v44 }
 0x108   :  { %v3782_v46 = vsub.f32 %v3739_v15, %v134_v45 }
 0x10a   :  { %v146_v47 = vmul.f32 %v3782_v46, %v3782_v46 }
 0x10c   :  { %v152_v48 = vsel %vm108_vm1, %v146_v47, 0.0  ;;  %v3842_v47 = vld [vmem:[%s5167_s3 + $0x31] ss:$0 sm:$0xff] }
 0x10d   :  { %153 = vadd.xlane.f32.xlu0 %v152_v48  ;;  %v114_v49 = vpop.xlane.xlu0 %113 }
 0x10e   :  { %v135_v50 = vmul.f32 %v3778_v43, %v114_v49 }
 0x110   :  { %v3789_v51 = vsub.f32 %v3746_v19, %v135_v50 }
 0x112   :  { %v147_v52 = vmul.f32 %v3789_v51, %v3789_v51 }
 0x114   :  { %v155_v53 = vsel %vm108_vm1, %v147_v52, 0.0 }
 0x115   :  { %v117_v54 = vpop.xlane.xlu2 %116  ;;  %156 = vadd.xlane.f32.xlu1 %v155_v53 }
 0x116   :  { %v136_v55 = vmul.f32 %v3778_v43, %v117_v54 }
 0x118   :  { %v3796_v56 = vsub.f32 %v3753_v23, %v136_v55 }
 0x11a   :  { %v148_v57 = vmul.f32 %v3796_v56, %v3796_v56 }
 0x11c   :  { %v158_v58 = vsel %vm108_vm1, %v148_v57, 0.0 }
 0x11d   :  { %159 = vadd.xlane.f32.xlu1 %v158_v58  ;;  %v120_v59 = vpop.xlane.xlu2 %119 }
 0x11e   :  { %v137_v62 = vmul.f32 %v3778_v43, %v120_v59 }
 0x120   :  { %v3809_v1 = vsub.f32 %v3760_v27, %v137_v62 }
 0x122   :  { %v149_v6 = vmul.f32 %v3809_v1, %v3809_v1 }
 0x124   :  { %v161_v8 = vsel %vm108_vm1, %v149_v6, 0.0 }
 0x125   :  { %v123_v60 = vpop.xlane.xlu1 %122 }
 0x126   :  { %v138_v61 = vmul.f32 %v3778_v43, %v123_v60 }
 0x128   :  { %v3804_v63 = vsub.f32 %v3767_v31, %v138_v61 }
 0x12a   :  { %v150_v0 = vmul.f32 %v3804_v63, %v3804_v63 }
 0x12c   :  { %v164_v2 = vsel %vm108_vm1, %v150_v0, 0.0 }
 0x12d   :  { %v126_v3 = vpop.xlane.xlu1 %125  ;;  %165 = vadd.xlane.f32.xlu2 %v164_v2 }
 0x12e   :  { %v139_v4 = vmul.f32 %v3778_v43, %v126_v3 }
 0x130   :  { %v3814_v5 = vsub.f32 %v3774_v35, %v139_v4 }
 0x132   :  { %v151_v7 = vmul.f32 %v3814_v5, %v3814_v5 }
 0x134   :  { %v167_v9 = vsel %vm108_vm1, %v151_v7, 0.0 }
 0x135   :  { %162 = vadd.xlane.f32.xlu2 %v161_v8  ;;  %168 = vadd.xlane.f32.xlu0 %v167_v9 }
 0x180   :  { %v154_v11 = vpop.xlane.xlu0 %153 }
 0x181   :  { %v170_v12 = vmul.f32 %v154_v11, %v3778_v43 }
 0x183   :  { %v176_v14 = vadd.f32 1e-06, %v170_v12 }
 0x185   :  { %3367 = vrsqrt.f32 %v176_v14  ;;  %vm188_vm4 = vweird.f32 %v176_v14 }
 0x188   :  { %v157_v16 = vpop.xlane.xlu1 %156 }
 0x189   :  { %v171_v17 = vmul.f32 %v157_v16, %v3778_v43 }
 0x18b   :  { %v3368_v18 = vpop.eup %3367  ;;  %v177_v20 = vadd.f32 1e-06, %v171_v17 }
 0x18c   :  { %v183_v21 = vmul.f32 %v3368_v18, %v176_v14  ;;  %vm189_vm3 = vweird.f32 %v3368_v18 }
 0x18d   :  { %3369 = vrsqrt.f32 %v177_v20  ;;  %vm190_vm5 = vmor %vm188_vm4, %vm189_vm3  ;;  %vm198_vm7 = vweird.f32 %v177_v20 }
 0x18e   :  { %v184_v22 = vmul.f32 %v3368_v18, %v183_v21 }
 0x190   :  { %v185_v24 = vmul.f32 0.5, %v184_v22  ;;  %v160_v25 = vpop.xlane.xlu1 %159 }
 0x191   :  { %v172_v29 = vmul.f32 %v160_v25, %v3778_v43 }
 0x192   :  { %v186_v26 = vsub.f32 1.5, %v185_v24 }
 0x193   :  { %v3370_v28 = vpop.eup %3369  ;;  %v178_v34 = vadd.f32 1e-06, %v172_v29 }
 0x194   :  { %v187_v30 = vmul.f32 %v3368_v18, %v186_v26  ;;  %v193_v32 = vmul.f32 %v3370_v28, %v177_v20  ;;  %vm199_vm6 = vweird.f32 %v3370_v28 }
 0x195   :  { %3371 = vrsqrt.f32 %v178_v34  ;;  %vm200_vm8 = vmor %vm198_vm7, %vm199_vm6  ;;  %vm208_vm11 = vweird.f32 %v178_v34  ;;  %vm343_vm6 = vcmask 64512   ;;  %vm386_vm7 = vcmask 392192  }
 0x196   :  { %v194_v33 = vmul.f32 %v3370_v28, %v193_v32  ;;  %v191_v36 = vsel %vm190_vm5, %v3368_v18, %v187_v30 }
 0x197   :  { %v242_v39 = vmul.f32 %v191_v36, %v3782_v46 }
 0x198   :  { %v195_v37 = vmul.f32 0.5, %v194_v33 }
 0x199   :  { %v249_v45 = vmul.f32 %v3835_v40, %v242_v39 }
 0x19a   :  { %v196_v38 = vsub.f32 1.5, %v195_v37 }
 0x19b   :  { %v3372_v46 = vpop.eup %3371  ;;  %v256_v53 = vadd.f32 %v3842_v47, %v249_v45 }
 0x19c   :  { %v197_v41 = vmul.f32 %v3370_v28, %v196_v38  ;;  %v203_v55 = vmul.f32 %v3372_v46, %v178_v34  ;;  %vm209_vm9 = vweird.f32 %v3372_v46 }
 0x19d   :  { %vm210_vm12 = vmor %vm208_vm11, %vm209_vm9  ;;  %vm1078_vm9 = vcmask 195584  }
 0x19e   :  { %v201_v42 = vsel %vm200_vm8, %v3370_v28, %v197_v41  ;;  %v204_v57 = vmul.f32 %v3372_v46, %v203_v55  ;;  %vm1071_vm8 = vcmask 130048  }
 0x19f   :  { %v243_v44 = vmul.f32 %v201_v42, %v3789_v51 }
 0x1a0   :  { %v166_v48 = vpop.xlane.xlu2 %165  ;;  %v205_v3 = vmul.f32 0.5, %v204_v57 }
 0x1a1   :  { %v174_v49 = vmul.f32 %v166_v48, %v3778_v43  ;;  %v250_v50 = vmul.f32 %v3835_v40, %v243_v44 }
 0x1a2   :  { %v206_v7 = vsub.f32 1.5, %v205_v3 }
 0x1a3   :  { %v180_v52 = vadd.f32 1e-06, %v174_v49  ;;  %v257_v54 = vadd.f32 %v3842_v47, %v250_v50 }
 0x1a4   :  { %v207_v12 = vmul.f32 %v3372_v46, %v206_v7 }
 0x1a5   :  { %3373 = vrsqrt.f32 %v180_v52  ;;  %v262_v51 = vpack.c.bf16 %v257_v54, %v256_v53  ;;  %vm228_vm13 = vweird.f32 %v180_v52 }
 0x1a6   :  { %v211_v20 = vsel %vm210_vm12, %v3372_v46, %v207_v12  ;;  %v3348_v46 = vld [vmem:[%s5167_s3 + $0x34] ss:$0 sm:$0xff] }
 0x1a7   :  { %3022 = vmatmul.msk.bf16.vlgmr.msra.gmra.mxu1 %vm108_vm1, %v262_v51  ;;  %v244_v28 = vmul.f32 %v211_v20, %v3796_v56 }
 0x1a8   :  { %v163_v58 = vpop.xlane.xlu2 %162  ;;  %v169_v59 = vpop.xlane.xlu0 %168 }
 0x1a9   :  { %v173_v60 = vmul.f32 %v163_v58, %v3778_v43  ;;  %v175_v61 = vmul.f32 %v169_v59, %v3778_v43  ;;  %v251_v37 = vmul.f32 %v3835_v40, %v244_v28 }
 0x1ab   :  { %v3374_v62 = vpop.eup %3373  ;;  %v179_v0 = vadd.f32 1e-06, %v173_v60  ;;  %v181_v2 = vadd.f32 1e-06, %v175_v61 }
 0x1ac   :  { %v223_v4 = vmul.f32 %v3374_v62, %v180_v52  ;;  %vm229_vm10 = vweird.f32 %v3374_v62 }
 0x1ad   :  { %3375 = vrsqrt.f32 %v179_v0  ;;  %vm230_vm14 = vmor %vm228_vm13, %vm229_vm10  ;;  %vm218_vm2 = vweird.f32 %v179_v0  ;;  %vm238_vm4 = vweird.f32 %v181_v2 }
 0x1ae   :  { %v224_v6 = vmul.f32 %v3374_v62, %v223_v4  ;;  %3377 = vrsqrt.f32 %v181_v2 }
 0x1b0   :  { %v225_v8 = vmul.f32 0.5, %v224_v6 }
 0x1b2   :  { %v226_v9 = vsub.f32 1.5, %v225_v8 }
 0x1b3   :  { %v3376_v10 = vpop.eup %3375 }
 0x1b4   :  { %v3378_v11 = vpop.eup %3377  ;;  %v213_v13 = vmul.f32 %v3376_v10, %v179_v0  ;;  %v227_v14 = vmul.f32 %v3374_v62, %v226_v9  ;;  %vm219_vm15 = vweird.f32 %v3376_v10 }
 0x1b5   :  { %v233_v16 = vmul.f32 %v3378_v11, %v181_v2  ;;  %vm239_vm0 = vweird.f32 %v3378_v11  ;;  %vm220_vm3 = vmor %vm218_vm2, %vm219_vm15 }
 0x1b6   :  { %v214_v17 = vmul.f32 %v3376_v10, %v213_v13  ;;  %v231_v22 = vsel %vm230_vm14, %v3374_v62, %v227_v14  ;;  %vm240_vm5 = vmor %vm238_vm4, %vm239_vm0 }
 0x1b7   :  { %v234_v18 = vmul.f32 %v3378_v11, %v233_v16  ;;  %v246_v30 = vmul.f32 %v231_v22, %v3804_v63  ;;  %v258_v63 = vadd.f32 %v3842_v47, %v251_v37 }
 0x1b8   :  { %v215_v21 = vmul.f32 0.5, %v214_v17 }
 0x1b9   :  { %v235_v24 = vmul.f32 0.5, %v234_v18  ;;  %v253_v39 = vmul.f32 %v3835_v40, %v246_v30 }
 0x1ba   :  { %v216_v25 = vsub.f32 1.5, %v215_v21 }
 0x1bb   :  { %v236_v26 = vsub.f32 1.5, %v235_v24  ;;  %v260_v44 = vadd.f32 %v3842_v47, %v253_v39 }
 0x1bc   :  { %v217_v29 = vmul.f32 %v3376_v10, %v216_v25 }
 0x1bd   :  { %v237_v32 = vmul.f32 %v3378_v11, %v236_v26 }
 0x1be   :  { %v221_v33 = vsel %vm220_vm3, %v3376_v10, %v217_v29 }
 0x1bf   :  { %v241_v34 = vsel %vm240_vm5, %v3378_v11, %v237_v32  ;;  %v245_v36 = vmul.f32 %v221_v33, %v3809_v1 }
 0x1c0   :  { %v247_v38 = vmul.f32 %v241_v34, %v3814_v5 }
 0x1c1   :  { %v252_v56 = vmul.f32 %v3835_v40, %v245_v36 }
 0x1c2   :  { %v254_v41 = vmul.f32 %v3835_v40, %v247_v38 }
 0x1c3   :  { %v259_v42 = vadd.f32 %v3842_v47, %v252_v56 }
 0x1c4   :  { %v261_v45 = vadd.f32 %v3842_v47, %v254_v41 }
 0x1c5   :  { %v263_v48 = vpack.c.bf16 %v259_v42, %v258_v63 }
 0x1c6   :  { %v264_v1 = vpack.c.bf16 %v261_v45, %v260_v44 }
 0x1c7   :  { %3023 = vmatmul.msk.bf16.gmra.mxu1 %vm108_vm1, %v263_v48 }
 0x1c8   :  { %3024 = vmatmul.msk.bf16.vlgmr.msra.gmra.mxu2 %vm108_vm1, %v264_v1 }
 0x224   :  { %v301_v5 = vpop.f32.mrf.mxu1 }
 0x225   :  { %v302_v40 = vadd.f32 %v3348_v46, %v301_v5 }
 0x227   :  { %v316_v50 = vpack.c.bf16 %v302_v40, %v302_v40 }
 0x229   :  { %v328_v54 = vunpack.c.l.b16 %v316_v50 }
 0x22c   :  { %v303_v49 = vpop.f32.mrf.mxu1 }
 0x22d   :  { %v304_v52 = vadd.f32 %v3348_v46, %v303_v49 }
 0x22f   :  { %v317_v53 = vpack.c.bf16 %v304_v52, %v304_v52 }
 0x231   :  { %v329_v55 = vunpack.c.l.b16 %v317_v53 }
 0x233   :  { %v3868_v51 = vpack.c.b16 %v329_v55, %v328_v54 }
 0x235   :  { %337 = vrot.lane.b32.xlu2 %v3868_v51, %s3666_s30 }
 0x244   :  { %v306_v47 = vpop.f32.mrf.mxu1 }
 0x245   :  { %v307_v57 = vadd.f32 %v3348_v46, %v306_v47 }
 0x247   :  { %v318_v60 = vpack.c.bf16 %v307_v57, %v307_v57 }
 0x249   :  { %v330_v2 = vunpack.c.l.b16 %v318_v60 }
 0x24b   :  { %v311_v58 = vpop.f32.mrf.mxu2 }
 0x24c   :  { %v308_v59 = vpop.f32.mrf.mxu1  ;;  %v312_v0 = vadd.f32 %v3348_v46, %v311_v58  ;;  %v3958_v58 = vld [vmem:[%s5165_s1] sm:$0xff] }
 0x24d   :  { %v309_v61 = vadd.f32 %v3348_v46, %v308_v59 }
 0x24e   :  { %v320_v7 = vpack.c.bf16 %v312_v0, %v312_v0 }
 0x24f   :  { %v319_v62 = vpack.c.bf16 %v309_v61, %v309_v61 }
 0x250   :  { %v332_v10 = vunpack.c.l.b16 %v320_v7  ;;  %v3976_v7 = vld [vmem:[%s5165_s1 + $0x8] sm:$0xff] }
 0x251   :  { %v331_v3 = vunpack.c.l.b16 %v319_v62 }
 0x253   :  { %v3872_v4 = vpack.c.b16 %v331_v3, %v330_v2  ;;  %v313_v6 = vpop.f32.mrf.mxu2 }
 0x254   :  { %v314_v8 = vadd.f32 %v3348_v46, %v313_v6 }
 0x255   :  { %339 = vrot.lane.b32.xlu1 %v3872_v4, %s3666_s30 }
 0x256   :  { %v321_v9 = vpack.c.bf16 %v314_v8, %v314_v8 }
 0x258   :  { %v333_v11 = vunpack.c.l.b16 %v321_v9 }
 0x25a   :  { %v3876_v12 = vpack.c.b16 %v333_v11, %v332_v10 }
 0x25c   :  { %673 = vrot.lane.b32.xlu2 %v3876_v12, %s3667_s5  ;;  %341 = vrot.lane.b32.xlu0 %v3876_v12, %s3666_s30 }
 0x25d   :  { %506 = vrot.lane.b32.xlu1 %v3872_v4, %s3668_s6 }
 0x264   :  { %504 = vrot.lane.b32.xlu2 %v3868_v51, %s3668_s6  ;;  %508 = vrot.lane.b32.xlu0 %v3876_v12, %s3668_s6 }
 0x265   :  { %669 = vrot.lane.b32.xlu1 %v3868_v51, %s3667_s5 }
 0x26c   :  { %663 = vrot.lane.b32.xlu2 %v3868_v51, %s3669_s7  ;;  %671 = vrot.lane.b32.xlu0 %v3872_v4, %s3667_s5 }
 0x26d   :  { %500 = vrot.lane.b32.xlu1 %v3872_v4, %s3670_s8 }
 0x274   :  { %838 = vrot.lane.b32.xlu2 %v3876_v12, %s3671_s9  ;;  %498 = vrot.lane.b32.xlu0 %v3868_v51, %s3670_s8 }
 0x275   :  { %502 = vrot.lane.b32.xlu1 %v3876_v12, %s3670_s8 }
 0x27c   :  { %836 = vrot.lane.b32.xlu2 %v3872_v4, %s3671_s9  ;;  %665 = vrot.lane.b32.xlu0 %v3872_v4, %s3669_s7 }
 0x27d   :  { %834 = vrot.lane.b32.xlu1 %v3868_v51, %s3671_s9 }
 0x284   :  { %830 = vrot.lane.b32.xlu2 %v3872_v4, %s3672_s10  ;;  %828 = vrot.lane.b32.xlu0 %v3868_v51, %s3672_s10 }
 0x285   :  { %832 = vrot.lane.b32.xlu1 %v3876_v12, %s3672_s10 }
 0x28c   :  { %623 = vrot.lane.b32.xlu2 %v3872_v4, %s3673_s11  ;;  %667 = vrot.lane.b32.xlu0 %v3876_v12, %s3669_s7 }
 0x28d   :  { %458 = vrot.lane.b32.xlu1 %v3872_v4, %s3674_s12 }
 0x28f   :  { %v338_v13 = vpop.permute.xlu2 %337 }
 0x290   :  { %v354_v37 = vsel %vm343_vm6, %v338_v13, 0 }
 0x294   :  { %460 = vrot.lane.b32.xlu2 %v3876_v12, %s3674_s12  ;;  %456 = vrot.lane.b32.xlu0 %v3868_v51, %s3674_s12 }
 0x295   :  { %625 = vrot.lane.b32.xlu1 %v3876_v12, %s3673_s11 }
 0x29c   :  { %621 = vrot.lane.b32.xlu0 %v3868_v51, %s3673_s11 }
 0x2b6   :  { %v674_v14 = vpop.permute.xlu2 %673 }
 0x2b7   :  { %v691_v16 = vsel %vm343_vm6, %v674_v14, 0 }
 0x2b8   :  { %698 = vmatpush.bf16.xpose.msrb.mxu0 %v691_v16 }
 0x2be   :  { %v505_v17 = vpop.permute.xlu2 %504 }
 0x2bf   :  { %v520_v42 = vsel %vm343_vm6, %v505_v17, 0 }
 0x2c6   :  { %v664_v18 = vpop.permute.xlu2 %663 }
 0x2c7   :  { %v340_v20 = vpop.permute.xlu1 %339 }
 0x2c8   :  { %v357_v30 = vsel %vm343_vm6, %v340_v20, 0 }
 0x2ce   :  { %v839_v21 = vpop.permute.xlu2 %838  ;;  %v342_v22 = vpop.permute.xlu0 %341 }
 0x2cf   :  { %v507_v24 = vpop.permute.xlu1 %506  ;;  %v360_v25 = vsel %vm343_vm6, %v342_v22, 0  ;;  %v856_v44 = vsel %vm343_vm6, %v839_v21, 0 }
 0x2d0   :  { %367 = vmatpush.bf16.xpose.msrb.mxu2 %v360_v25  ;;  %v523_v38 = vsel %vm343_vm6, %v507_v24, 0 }
 0x2d6   :  { %v837_v26 = vpop.permute.xlu2 %836  ;;  %v509_v28 = vpop.permute.xlu0 %508 }
 0x2d7   :  { %v670_v29 = vpop.permute.xlu1 %669  ;;  %v526_v32 = vsel %vm343_vm6, %v509_v28, 0  ;;  %v853_v46 = vsel %vm343_vm6, %v837_v26, 0  ;;  %v103_v28 = vld [vmem:[%s5165_s1 + $0x18] sm:$0xff] }
 0x2d8   :  { %368 = vmatpush.bf16.xpose.msrb.mxu2 %v357_v30  ;;  %533 = vmatpush.bf16.xpose.msrb.mxu1 %v526_v32  ;;  %v685_v45 = vsel %vm343_vm6, %v670_v29, 0 }
 0x2de   :  { %v831_v33 = vpop.permute.xlu2 %830  ;;  %v672_v34 = vpop.permute.xlu0 %671 }
 0x2df   :  { %v501_v36 = vpop.permute.xlu1 %500  ;;  %v688_v39 = vsel %vm343_vm6, %v672_v34, 0 }
 0x2e0   :  { %369 = vmatpush.bf16.xpose.msrb.mxu2 %v354_v37  ;;  %534 = vmatpush.bf16.xpose.msrb.mxu1 %v523_v38 }
 0x2e1   :  { %699 = vmatpush.bf16.xpose.msrb.mxu0 %v688_v39 }
 0x2e6   :  { %v624_v56 = vpop.permute.xlu2 %623  ;;  %v499_v41 = vpop.permute.xlu0 %498 }
 0x2e7   :  { %3025 = vmatmul.msk.bf16.vlgmr.msrb.gmra.mxu2 %vm343_vm6, %v3868_v51  ;;  %v503_v63 = vpop.permute.xlu1 %502 }
 0x2e8   :  { %535 = vmatpush.bf16.xpose.msrb.mxu1 %v520_v42 }
 0x2e9   :  { %700 = vmatpush.bf16.xpose.msrb.mxu0 %v685_v45  ;;  %v4026_v45 = vld [vmem:[%s5165_s1 + $0x20] sm:$0xff] }
 0x2ee   :  { %v461_v48 = vpop.permute.xlu2 %460  ;;  %v666_v1 = vpop.permute.xlu0 %665 }
 0x2ef   :  { %479 = vmatpush.bf16.msra.mxu3 %v461_v48  ;;  %3031 = vmatmul.msk.bf16.vlgmr.msrb.gmra.mxu1 %vm343_vm6, %v499_v41  ;;  %v835_v5 = vpop.permute.xlu1 %834 }
 0x2f0   :  { %3237 = vmatpush.bf16.xpose.msra.mxu1 %v856_v44  ;;  %3037 = vmatmul.msk.bf16.vlgmr.msrb.gmra.mxu0 %vm343_vm6, %v664_v18  ;;  %v850_v50 = vsel %vm343_vm6, %v835_v5, 0  ;;  %v102_v18 = vld [vmem:[%s5165_s1 + $0x10] sm:$0xff]  ;;  %v4036_v5 = vld [vmem:[%s5165_s1 + $0x28] sm:$0xff] }
 0x2f1   :  { %863 = vmatpush.bf16.xpose.msra.mxu0 %v856_v44 }
 0x2f6   :  { %v829_v40 = vpop.permute.xlu0 %828 }
 0x2f7   :  { %3026 = vmatmul.msk.bf16.gmra.mxu2 %vm343_vm6, %v3872_v4  ;;  %v833_v49 = vpop.permute.xlu1 %832 }
 0x2f8   :  { %3238 = vmatpush.bf16.xpose.msra.mxu1 %v853_v46 }
 0x2f9   :  { %864 = vmatpush.bf16.xpose.msra.mxu0 %v853_v46 }
 0x2fe   :  { %v668_v52 = vpop.permute.xlu0 %667 }
 0x2ff   :  { %3032 = vmatmul.msk.bf16.gmra.mxu1 %vm343_vm6, %v501_v36  ;;  %v459_v53 = vpop.permute.xlu1 %458 }
 0x300   :  { %3239 = vmatpush.bf16.xpose.msra.mxu1 %v850_v50  ;;  %3038 = vmatmul.msk.bf16.gmra.mxu0 %vm343_vm6, %v666_v1 }
 0x301   :  { %865 = vmatpush.bf16.xpose.msra.mxu0 %v850_v50  ;;  %480 = vmatpush.bf16.msra.mxu3 %v459_v53 }
 0x306   :  { %v457_v54 = vpop.permute.xlu0 %456 }
 0x307   :  { %3027 = vmatmul.msk.bf16.gmra.mxu2 %vm343_vm6, %v3876_v12  ;;  %481 = vmatpush.bf16.msra.mxu3 %v457_v54  ;;  %v626_v55 = vpop.permute.xlu1 %625 }
 0x30b   :  { %644 = vmatpush.bf16.msrb.mxu3 %v626_v55 }
 0x30e   :  { %v622_v47 = vpop.permute.xlu0 %621 }
 0x30f   :  { %645 = vmatpush.bf16.msrb.mxu3 %v624_v56  ;;  %3033 = vmatmul.msk.bf16.gmra.mxu1 %vm343_vm6, %v503_v63 }
 0x310   :  { %3039 = vmatmul.msk.bf16.gmra.mxu0 %vm343_vm6, %v668_v52 }
 0x313   :  { %646 = vmatpush.bf16.msrb.mxu3 %v622_v47 }
 0x31f   :  { %3044 = vmatmul.msk.bf16.vlgmr.msra.gmra.mxu1 %vm343_vm6, %v831_v33 }
 0x320   :  { %3043 = vmatmul.msk.bf16.vlgmr.msra.gmra.mxu0 %vm343_vm6, %v829_v40 }
 0x32f   :  { %3045 = vmatmul.msk.bf16.gmra.mxu1 %vm343_vm6, %v833_v49 }
 0x36a   :  { %v371_v57 = vpop.f32.mrf.mxu2 }
 0x36b   :  { %v3971_v6 = vadd.f32 %v371_v57, %v3958_v58 }
 0x36c   :  { %v537_v59 = vpop.f32.mrf.mxu1 }
 0x36d   :  { %v3961_v60 = vadd.f32 %v537_v59, %v3958_v58  ;;  %v702_v61 = vpop.f32.mrf.mxu0  ;;  %v387_v13 = vsel %vm386_vm7, %v3971_v6, -inf }
 0x36e   :  { %v3964_v62 = vadd.f32 %v702_v61, %v3958_v58 }
 0x36f   :  { %v552_v0 = vsel %vm386_vm7, %v3961_v60, -inf }
 0x370   :  { %v717_v2 = vsel %vm386_vm7, %v3964_v62, -inf  ;;  %553 = vmax.xlane.f32.xlu0 %v552_v0 }
 0x371   :  { %718 = vmax.xlane.f32.xlu1 %v717_v2 }
 0x372   :  { %v373_v3 = vpop.f32.mrf.mxu2 }
 0x373   :  { %v3998_v25 = vadd.f32 %v373_v3, %v3976_v7 }
 0x374   :  { %v539_v8 = vpop.f32.mrf.mxu1 }
 0x375   :  { %v3979_v9 = vadd.f32 %v539_v8, %v3976_v7  ;;  %v704_v10 = vpop.f32.mrf.mxu0  ;;  %v390_v34 = vsel %vm386_vm7, %v3998_v25, -inf }
 0x376   :  { %v3986_v14 = vadd.f32 %v704_v10, %v3976_v7 }
 0x377   :  { %v555_v11 = vsel %vm386_vm7, %v3979_v9, -inf }
 0x378   :  { %556 = vmax.xlane.f32.xlu2 %v555_v11  ;;  %388 = vmax.xlane.f32.xlu0 %v387_v13  ;;  %v720_v22 = vsel %vm386_vm7, %v3986_v14, -inf }
 0x37a   :  { %v376_v16 = vpop.f32.mrf.mxu2 }
 0x37b   :  { %v4000_v26 = vadd.f32 %v376_v16, %v102_v18 }
 0x37c   :  { %v542_v17 = vpop.f32.mrf.mxu1 }
 0x37d   :  { %v707_v20 = vpop.f32.mrf.mxu0  ;;  %v393_v37 = vsel %vm386_vm7, %v4000_v26, -inf  ;;  %v4013_v38 = vadd.f32 %v542_v17, %v102_v18 }
 0x37e   :  { %v3991_v21 = vadd.f32 %v707_v20, %v102_v18 }
 0x37f   :  { %v558_v42 = vsel %vm386_vm7, %v4013_v38, -inf }
 0x380   :  { %721 = vmax.xlane.f32.xlu2 %v720_v22  ;;  %v723_v24 = vsel %vm386_vm7, %v3991_v21, -inf }
 0x381   :  { %724 = vmax.xlane.f32.xlu1 %v723_v24 }
 0x382   :  { %v378_v30 = vpop.f32.mrf.mxu2 }
 0x383   :  { %v4028_v48 = vadd.f32 %v378_v30, %v103_v28 }
 0x384   :  { %v544_v29 = vpop.f32.mrf.mxu1 }
 0x385   :  { %v4005_v32 = vadd.f32 %v544_v29, %v103_v28  ;;  %v709_v33 = vpop.f32.mrf.mxu0  ;;  %v396_v52 = vsel %vm386_vm7, %v4028_v48, -inf }
 0x386   :  { %v4015_v39 = vadd.f32 %v709_v33, %v103_v28 }
 0x387   :  { %v561_v36 = vsel %vm386_vm7, %v4005_v32, -inf }
 0x388   :  { %391 = vmax.xlane.f32.xlu2 %v390_v34  ;;  %562 = vmax.xlane.f32.xlu0 %v561_v36  ;;  %v726_v44 = vsel %vm386_vm7, %v4015_v39, -inf }
 0x389   :  { %394 = vmax.xlane.f32.xlu1 %v393_v37 }
 0x38a   :  { %v381_v63 = vpop.f32.mrf.mxu2 }
 0x38b   :  { %v4031_v1 = vadd.f32 %v381_v63, %v4026_v45 }
 0x38c   :  { %v547_v56 = vpop.f32.mrf.mxu1 }
 0x38d   :  { %v4017_v41 = vpop.f32.mrf.mxu0  ;;  %v399_v50 = vsel %vm386_vm7, %v4031_v1, -inf  ;;  %v4048_v55 = vadd.f32 %v547_v56, %v4026_v45 }
 0x38f   :  { %v564_v2 = vsel %vm386_vm7, %v4048_v55, -inf }
 0x390   :  { %559 = vmax.xlane.f32.xlu2 %v558_v42  ;;  %727 = vmax.xlane.f32.xlu0 %v726_v44 }
 0x392   :  { %v383_v54 = vpop.f32.mrf.mxu2 }
 0x393   :  { %v4051_v47 = vadd.f32 %v383_v54, %v4036_v5 }
 0x394   :  { %v549_v46 = vpop.f32.mrf.mxu1 }
 0x395   :  { %v4039_v40 = vadd.f32 %v549_v46, %v4036_v5  ;;  %v714_v49 = vpop.f32.mrf.mxu0  ;;  %v402_v3 = vsel %vm386_vm7, %v4051_v47, -inf }
 0x397   :  { %v567_v53 = vsel %vm386_vm7, %v4039_v40, -inf }
 0x398   :  { %400 = vmax.xlane.f32.xlu2 %v399_v50  ;;  %397 = vmax.xlane.f32.xlu0 %v396_v52 }
 0x399   :  { %568 = vmax.xlane.f32.xlu1 %v567_v53 }
 0x39c   :  { %v872_v57 = vpop.f32.mrf.mxu1 }
 0x39d   :  { %v867_v59 = vpop.f32.mrf.mxu0  ;;  %v4053_v61 = vadd.f32 %v872_v57, %v102_v18  ;;  %v4072_v18 = vadd.f32 %v714_v49, %v4036_v5 }
 0x39e   :  { %v4062_v8 = vadd.f32 %v867_v59, %v3958_v58  ;;  %v4104_v59 = vadd.f32 %v4017_v41, %v4026_v45 }
 0x39f   :  { %v888_v0 = vsel %vm386_vm7, %v4053_v61, -inf  ;;  %v732_v58 = vsel %vm386_vm7, %v4072_v18, -inf }
 0x3a0   :  { %889 = vmax.xlane.f32.xlu2 %v888_v0  ;;  %565 = vmax.xlane.f32.xlu0 %v564_v2  ;;  %v882_v13 = vsel %vm386_vm7, %v4062_v8, -inf }
 0x3a1   :  { %403 = vmax.xlane.f32.xlu1 %v402_v3 }
 0x3a4   :  { %v874_v17 = vpop.f32.mrf.mxu1 }
 0x3a5   :  { %v869_v10 = vpop.f32.mrf.mxu0  ;;  %v4074_v20 = vadd.f32 %v874_v17, %v103_v28 }
 0x3a6   :  { %v4065_v11 = vadd.f32 %v869_v10, %v3976_v7 }
 0x3a7   :  { %v891_v7 = vsel %vm386_vm7, %v4074_v20, -inf }
 0x3a8   :  { %v885_v16 = vsel %vm386_vm7, %v4065_v11, -inf  ;;  %883 = vmax.xlane.f32.xlu0 %v882_v13 }
 0x3a9   :  { %886 = vmax.xlane.f32.xlu1 %v885_v16 }
 0x3ac   :  { %v877_v44 = vpop.f32.mrf.mxu1 }
 0x3b0   :  { %733 = vmax.xlane.f32.xlu0 %v732_v58  ;;  %v729_v58 = vsel %vm386_vm7, %v4104_v59, -inf }
 0x3b1   :  { %892 = vmax.xlane.f32.xlu1 %v891_v7 }
 0x3e3   :  { %v554_v22 = vpop.xlane.xlu0 %553 }
 0x3e4   :  { %v570_v24 = vsub.f32 %v3961_v60, %v554_v22  ;;  %v719_v34 = vpop.xlane.xlu1 %718  ;;  %v4088_v60 = vadd.f32 %v877_v44, %v4026_v45 }
 0x3e6   :  { %v576_v29 = vmul.f32 1.442695, %v570_v24  ;;  %v894_v52 = vsel %vm386_vm7, %v4088_v60, -inf  ;;  %v735_v24 = vsub.f32 %v3964_v62, %v719_v34 }
 0x3e8   :  { %3379 = vpow2.f32 %v576_v29 }
 0x3eb   :  { %v557_v30 = vpop.xlane.xlu2 %556  ;;  %v389_v33 = vpop.xlane.xlu0 %388 }
 0x3ec   :  { %v571_v36 = vsub.f32 %v3979_v9, %v557_v30  ;;  %v405_v28 = vsub.f32 %v3971_v6, %v389_v33 }
 0x3ee   :  { %v4083_v37 = vpop.eup %3379  ;;  %v578_v56 = vmul.f32 1.442695, %v571_v36  ;;  %v411_v63 = vmul.f32 1.442695, %v405_v28  ;;  %v741_v28 = vmul.f32 1.442695, %v735_v24 }
 0x3ef   :  { %v588_v42 = vsel %vm386_vm7, %v4083_v37, 0.0 }
 0x3f0   :  { %3381 = vpow2.f32 %v578_v56  ;;  %589 = vadd.xlane.f32.xlu2 %v588_v42 }
 0x3f1   :  { %3383 = vpow2.f32 %v411_v63 }
 0x3f3   :  { %v722_v46 = vpop.xlane.xlu2 %721 }
 0x3f4   :  { %v4090_v49 = vpop.xlane.xlu1 %724 }
 0x3f6   :  { %v4092_v9 = vpop.eup %3381 }
 0x3f7   :  { %v4094_v6 = vpop.eup %3383  ;;  %v591_v50 = vsel %vm386_vm7, %v4092_v9, 0.0 }
 0x3f8   :  { %592 = vadd.xlane.f32.xlu0 %v591_v50  ;;  %895 = vmax.xlane.f32.xlu2 %v894_v52  ;;  %v423_v53 = vsel %vm386_vm7, %v4094_v6, 0.0 }
 0x3f9   :  { %424 = vadd.xlane.f32.xlu1 %v423_v53 }
 0x3fb   :  { %v392_v54 = vpop.xlane.xlu2 %391  ;;  %v563_v57 = vpop.xlane.xlu0 %562 }
 0x3fc   :  { %v406_v0 = vsub.f32 %v3998_v25, %v392_v54  ;;  %v395_v2 = vpop.xlane.xlu1 %394  ;;  %v573_v3 = vsub.f32 %v4005_v32, %v563_v57  ;;  %v736_v32 = vsub.f32 %v3986_v14, %v722_v46 }
 0x3fd   :  { %v407_v10 = vsub.f32 %v4000_v26, %v395_v2 }
 0x3fe   :  { %v413_v13 = vmul.f32 1.442695, %v406_v0  ;;  %v582_v16 = vmul.f32 1.442695, %v573_v3  ;;  %v743_v36 = vmul.f32 1.442695, %v736_v32 }
 0x3ff   :  { %v415_v17 = vmul.f32 1.442695, %v407_v10 }
 0x400   :  { %3385 = vpow2.f32 %v413_v13 }
 0x401   :  { %3387 = vpow2.f32 %v415_v17  ;;  %730 = vmax.xlane.f32.xlu1 %v729_v58 }
 0x402   :  { %3389 = vpow2.f32 %v582_v16 }
 0x403   :  { %v560_v7 = vpop.xlane.xlu2 %559  ;;  %v4111_v41 = vpop.xlane.xlu0 %727 }
 0x404   :  { %v572_v25 = vsub.f32 %v4013_v38, %v560_v7  ;;  %v879_v38 = vpop.f32.mrf.mxu1 }
 0x405   :  { %v4129_v62 = vadd.f32 %v879_v38, %v4036_v5 }
 0x406   :  { %v4114_v45 = vpop.eup %3385  ;;  %v580_v26 = vmul.f32 1.442695, %v572_v25 }
 0x407   :  { %v4117_v22 = vpop.eup %3387  ;;  %v426_v29 = vsel %vm386_vm7, %v4114_v45, 0.0  ;;  %v897_v50 = vsel %vm386_vm7, %v4129_v62, -inf }
 0x408   :  { %v4122_v30 = vpop.eup %3389  ;;  %3391 = vpow2.f32 %v580_v26  ;;  %427 = vadd.xlane.f32.xlu0 %v426_v29  ;;  %v429_v33 = vsel %vm386_vm7, %v4117_v22, 0.0 }
 0x409   :  { %430 = vadd.xlane.f32.xlu1 %v429_v33  ;;  %v597_v14 = vsel %vm386_vm7, %v4122_v30, 0.0  ;;  %3393 = vpow2.f32 %v743_v36 }
 0x40a   :  { %598 = vadd.xlane.f32.xlu2 %v597_v14  ;;  %3395 = vpow2.f32 %v741_v28  ;;  %v737_v14 = vsub.f32 %v3991_v21, %v4090_v49 }
 0x40b   :  { %v398_v56 = vpop.xlane.xlu0 %397  ;;  %v401_v7 = vpop.xlane.xlu2 %400 }
 0x40c   :  { %v569_v34 = vpop.xlane.xlu1 %568  ;;  %v408_v63 = vsub.f32 %v4028_v48, %v398_v56  ;;  %v409_v32 = vsub.f32 %v4031_v1, %v401_v7  ;;  %v745_v36 = vmul.f32 1.442695, %v737_v14 }
 0x40d   :  { %v575_v38 = vsub.f32 %v4039_v40, %v569_v34 }
 0x40e   :  { %v4132_v42 = vpop.eup %3391  ;;  %v417_v44 = vmul.f32 1.442695, %v408_v63  ;;  %v419_v24 = vmul.f32 1.442695, %v409_v32 }
 0x40f   :  { %v594_v46 = vsel %vm386_vm7, %v4132_v42, 0.0  ;;  %v4138_v5 = vpop.eup %3393 }
 0x410   :  { %595 = vadd.xlane.f32.xlu0 %v594_v46  ;;  %3397 = vpow2.f32 %v417_v44  ;;  %v4141_v48 = vpop.eup %3395  ;;  %v756_v0 = vsel %vm386_vm7, %v4138_v5, 0.0 }
 0x411   :  { %898 = vmax.xlane.f32.xlu1 %v897_v50  ;;  %v753_v10 = vsel %vm386_vm7, %v4141_v48, 0.0 }
 0x413   :  { %v566_v52 = vpop.xlane.xlu0 %565  ;;  %v890_v34 = vpop.xlane.xlu2 %889 }
 0x414   :  { %v574_v53 = vsub.f32 %v4048_v55, %v566_v52  ;;  %v404_v54 = vpop.xlane.xlu1 %403 }
 0x415   :  { %v410_v3 = vsub.f32 %v4051_v47, %v404_v54 }
 0x416   :  { %v584_v57 = vmul.f32 1.442695, %v574_v53  ;;  %v4145_v2 = vpop.eup %3397 }
 0x417   :  { %v432_v13 = vsel %vm386_vm7, %v4145_v2, 0.0  ;;  %v421_v55 = vmul.f32 1.442695, %v410_v3 }
 0x418   :  { %757 = vadd.xlane.f32.xlu0 %v756_v0  ;;  %3399 = vpow2.f32 %v584_v57  ;;  %433 = vadd.xlane.f32.xlu2 %v432_v13 }
 0x419   :  { %754 = vadd.xlane.f32.xlu1 %v753_v10  ;;  %3401 = vpow2.f32 %v421_v55 }
 0x41a   :  { %3403 = vpow2.f32 %v419_v24 }
 0x41b   :  { %v884_v25 = vpop.xlane.xlu0 %883 }
 0x41c   :  { %v900_v26 = vsub.f32 %v4062_v8, %v884_v25  ;;  %v887_v29 = vpop.xlane.xlu1 %886 }
 0x41d   :  { %v901_v28 = vsub.f32 %v4065_v11, %v887_v29 }
 0x41e   :  { %v4152_v16 = vpop.eup %3399  ;;  %v906_v33 = vmul.f32 1.442695, %v900_v26 }
 0x41f   :  { %v600_v17 = vsel %vm386_vm7, %v4152_v16, 0.0  ;;  %v4156_v58 = vpop.eup %3401  ;;  %v908_v8 = vmul.f32 1.442695, %v901_v28 }
 0x420   :  { %601 = vadd.xlane.f32.xlu0 %v600_v17  ;;  %v438_v47 = vsel %vm386_vm7, %v4156_v58, 0.0  ;;  %3405 = vpow2.f32 %v906_v33  ;;  %v4172_v56 = vpop.eup %3403 }
 0x421   :  { %v435_v40 = vsel %vm386_vm7, %v4172_v56, 0.0 }
 0x423   :  { %v734_v0 = vpop.xlane.xlu0 %733 }
 0x424   :  { %v893_v63 = vpop.xlane.xlu1 %892 }
 0x425   :  { %v903_v44 = vsub.f32 %v4074_v20, %v893_v63 }
 0x426   :  { %v4174_v1 = vpop.eup %3405 }
 0x427   :  { %v918_v21 = vsel %vm386_vm7, %v4174_v1, 0.0  ;;  %v912_v11 = vmul.f32 1.442695, %v903_v44 }
 0x428   :  { %439 = vadd.xlane.f32.xlu0 %v438_v47 }
 0x430   :  { %790 = vrot.lane.b32.xlu2 %v3876_v12, %s3675_s24 }
 0x432   :  { %955 = vrot.lane.b32.xlu1 %v3876_v12, %s3676_s25  ;;  %v586_v12 = vmul.f32 1.442695, %v575_v38 }
 0x434   :  { %3407 = vpow2.f32 %v586_v12 }
 0x435   :  { %3409 = vpow2.f32 %v745_v36 }
 0x436   :  { %3411 = vpow2.f32 %v908_v8 }
 0x437   :  { %3413 = vpow2.f32 %v912_v11 }
 0x43a   :  { %v4181_v49 = vpop.eup %3407 }
 0x43b   :  { %v4183_v46 = vpop.eup %3409  ;;  %v603_v50 = vsel %vm386_vm7, %v4181_v49, 0.0 }
 0x43c   :  { %788 = vrot.lane.b32.xlu0 %v3872_v4, %s3675_s24  ;;  %v759_v52 = vsel %vm386_vm7, %v4183_v46, 0.0  ;;  %v4191_v53 = vpop.eup %3411 }
 0x43d   :  { %v921_v54 = vsel %vm386_vm7, %v4191_v53, 0.0  ;;  %v4195_v57 = vpop.eup %3413 }
 0x43e   :  { %v927_v10 = vsel %vm386_vm7, %v4195_v57, 0.0 }
 0x459   :  { %436 = vadd.xlane.f32.xlu2 %v435_v40 }
 0x45c   :  { %919 = vadd.xlane.f32.xlu1 %v918_v21 }
 0x461   :  { %604 = vadd.xlane.f32.xlu2 %v603_v50  ;;  %v738_v50 = vsub.f32 %v4015_v39, %v4111_v41 }
 0x463   :  { %v4187_v20 = vpop.xlane.xlu2 %589 }
 0x464   :  { %760 = vadd.xlane.f32.xlu1 %v759_v52  ;;  %v740_v52 = vsub.f32 %v4072_v18, %v734_v0 }
 0x466   :  { %922 = vadd.xlane.f32.xlu0 %v921_v54 }
 0x46b   :  { %v896_v3 = vpop.xlane.xlu2 %895  ;;  %v4200_v17 = vpop.xlane.xlu0 %592 }
 0x46c   :  { %v904_v13 = vsub.f32 %v4088_v60, %v896_v3  ;;  %928 = vadd.xlane.f32.xlu1 %v927_v10  ;;  %v425_v47 = vpop.xlane.xlu1 %424  ;;  %v747_v3 = vmul.f32 1.442695, %v738_v50 }
 0x46e   :  { %v914_v55 = vmul.f32 1.442695, %v904_v13 }
 0x470   :  { %3415 = vpow2.f32 %v914_v55 }
 0x471   :  { %3417 = vrcp.f32 %v425_v47 }
 0x474   :  { %v731_v60 = vpop.xlane.xlu1 %730 }
 0x476   :  { %v4202_v7 = vpop.eup %3415 }
 0x477   :  { %v930_v25 = vsel %vm386_vm7, %v4202_v7, 0.0  ;;  %v3418_v26 = vpop.eup %3417 }
 0x478   :  { %931 = vadd.xlane.f32.xlu1 %v930_v25  ;;  %v447_v29 = vmul.f32 %v3418_v26, %v4094_v6 }
 0x479   :  { %953 = vrot.lane.b32.xlu2 %v3872_v4, %s3676_s25 }
 0x47a   :  { %951 = vrot.lane.b32.xlu0 %v3868_v51, %s3676_s25 }
 0x47b   :  { %v428_v32 = vpop.xlane.xlu0 %427 }
 0x47c   :  { %3419 = vrcp.f32 %v428_v32  ;;  %v431_v4 = vpop.xlane.xlu1 %430 }
 0x47d   :  { %v4214_v38 = vpop.xlane.xlu2 %598  ;;  %3421 = vrcp.f32 %v431_v4 }
 0x481   :  { %786 = vrot.lane.b32.xlu2 %v3868_v51, %s3675_s24  ;;  %v902_v51 = vsub.f32 %v4053_v61, %v890_v34  ;;  %v751_v34 = vmul.f32 1.442695, %v740_v52 }
 0x482   :  { %v3420_v24 = vpop.eup %3419 }
 0x483   :  { %v448_v33 = vmul.f32 %v3420_v24, %v4114_v45  ;;  %v4217_v12 = vpop.xlane.xlu0 %595  ;;  %v3422_v28 = vpop.eup %3421  ;;  %v910_v11 = vmul.f32 1.442695, %v902_v51 }
 0x484   :  { %v899_v63 = vpop.xlane.xlu1 %898  ;;  %v449_v45 = vmul.f32 %v3422_v28, %v4117_v22  ;;  %v739_v22 = vsub.f32 %v4104_v59, %v731_v60 }
 0x485   :  { %v453_v14 = vpack.c.bf16 %v448_v33, %v447_v29  ;;  %v905_v55 = vsub.f32 %v4129_v62, %v899_v63 }
 0x486   :  { %v749_v39 = vmul.f32 1.442695, %v739_v22 }
 0x487   :  { %3028 = vmatmul.msk.bf16.vlgmr.msra.gmra.mxu3 %vm386_vm7, %v453_v14  ;;  %v916_v25 = vmul.f32 1.442695, %v905_v55 }
 0x48b   :  { %v434_v36 = vpop.xlane.xlu2 %433  ;;  %v758_v44 = vpop.xlane.xlu0 %757 }
 0x48c   :  { %3423 = vrcp.f32 %v434_v36  ;;  %v755_v54 = vpop.xlane.xlu1 %754 }
 0x48d   :  { %3425 = vpow2.f32 %v910_v11 }
 0x48e   :  { %3427 = vpow2.f32 %v747_v3 }
 0x48f   :  { %3429 = vpow2.f32 %v751_v34 }
 0x490   :  { %3431 = vpow2.f32 %v749_v39 }
 0x491   :  { %3433 = vpow2.f32 %v916_v25 }
 0x492   :  { %v3424_v8 = vpop.eup %3423 }
 0x493   :  { %v791_v6 = vpop.permute.xlu2 %790  ;;  %v450_v40 = vmul.f32 %v3424_v8, %v4145_v2  ;;  %v4226_v61 = vpop.xlane.xlu0 %601 }
 0x494   :  { %809 = vmatpush.bf16.msra.mxu2 %v791_v6  ;;  %v4228_v10 = vpop.eup %3425 }
 0x495   :  { %v454_v21 = vpack.c.bf16 %v450_v40, %v449_v45  ;;  %v924_v13 = vsel %vm386_vm7, %v4228_v10, 0.0  ;;  %v4233_v41 = vpop.eup %3427 }
 0x496   :  { %v4235_v0 = vpop.eup %3429  ;;  %v762_v47 = vsel %vm386_vm7, %v4233_v41, 0.0 }
 0x497   :  { %3029 = vmatmul.msk.bf16.gmra.mxu3 %vm386_vm7, %v454_v21  ;;  %v768_v59 = vsel %vm386_vm7, %v4235_v0, 0.0  ;;  %v4242_v32 = vpop.eup %3431 }
 0x498   :  { %v765_v26 = vsel %vm386_vm7, %v4242_v32, 0.0  ;;  %v4246_v24 = vpop.eup %3433 }
 0x499   :  { %v933_v62 = vsel %vm386_vm7, %v4246_v24, 0.0 }
 0x49b   :  { %v440_v18 = vpop.xlane.xlu0 %439 }
 0x49c   :  { %3435 = vrcp.f32 %v440_v18 }
 0x4a2   :  { %v3436_v33 = vpop.eup %3435 }
 0x4a3   :  { %v452_v28 = vmul.f32 %v3436_v33, %v4156_v58 }
 0x4a4   :  { %v956_v2 = vpop.permute.xlu1 %955  ;;  %925 = vadd.xlane.f32.xlu0 %v924_v13 }
 0x4a5   :  { %974 = vmatpush.bf16.msra.mxu3 %v956_v2 }
 0x4aa   :  { %763 = vadd.xlane.f32.xlu2 %v762_v47 }
 0x4ac   :  { %769 = vadd.xlane.f32.xlu0 %v768_v59 }
 0x4ae   :  { %v789_v60 = vpop.permute.xlu0 %788 }
 0x4af   :  { %810 = vmatpush.bf16.msra.mxu2 %v789_v60 }
 0x4b2   :  { %766 = vadd.xlane.f32.xlu2 %v765_v26 }
 0x4ba   :  { %934 = vadd.xlane.f32.xlu2 %v933_v62 }
 0x4cc   :  { %v437_v29 = vpop.xlane.xlu2 %436 }
 0x4cd   :  { %3437 = vrcp.f32 %v437_v29 }
 0x4ce   :  { %3439 = vrcp.f32 %v4200_v17 }
 0x4cf   :  { %3441 = vrcp.f32 %v758_v44  ;;  %v920_v22 = vpop.xlane.xlu1 %919 }
 0x4d0   :  { %3443 = vrcp.f32 %v755_v54 }
 0x4d1   :  { %3445 = vrcp.f32 %v4187_v20 }
 0x4d2   :  { %3447 = vrcp.f32 %v4217_v12 }
 0x4d3   :  { %v3438_v14 = vpop.eup %3437  ;;  %3449 = vrcp.f32 %v4214_v38 }
 0x4d4   :  { %v605_v4 = vpop.xlane.xlu2 %604  ;;  %v451_v36 = vmul.f32 %v3438_v14, %v4172_v56  ;;  %v3440_v51 = vpop.eup %3439 }
 0x4d5   :  { %v3442_v6 = vpop.eup %3441  ;;  %v613_v21 = vmul.f32 %v3440_v51, %v4092_v9  ;;  %3451 = vrcp.f32 %v605_v4 }
 0x4d6   :  { %v455_v63 = vpack.c.bf16 %v452_v28, %v451_v36  ;;  %v3444_v45 = vpop.eup %3443  ;;  %v778_v58 = vmul.f32 %v3442_v6, %v4138_v5  ;;  %3453 = vrcp.f32 %v4226_v61 }
 0x4d7   :  { %v3446_v40 = vpop.eup %3445  ;;  %v777_v56 = vmul.f32 %v3444_v45, %v4141_v48 }
 0x4d8   :  { %3030 = vmatmul.msk.bf16.gmra.mxu3 %vm386_vm7, %v455_v63  ;;  %v612_v17 = vmul.f32 %v3446_v40, %v4083_v37  ;;  %v3448_v48 = vpop.eup %3447 }
 0x4d9   :  { %v923_v44 = vpop.xlane.xlu0 %922  ;;  %v783_v50 = vpack.c.bf16 %v778_v58, %v777_v56  ;;  %v3450_v20 = vpop.eup %3449  ;;  %v614_v5 = vmul.f32 %v3448_v48, %v4132_v42 }
 0x4da   :  { %v618_v52 = vpack.c.bf16 %v613_v21, %v612_v17  ;;  %v615_v37 = vmul.f32 %v3450_v20, %v4122_v30  ;;  %3455 = vrcp.f32 %v923_v44  ;;  %v761_v42 = vpop.xlane.xlu1 %760 }
 0x4db   :  { %v3452_v3 = vpop.eup %3451  ;;  %3457 = vrcp.f32 %v920_v22 }
 0x4dc   :  { %v954_v8 = vpop.permute.xlu2 %953  ;;  %v619_v54 = vpack.c.bf16 %v615_v37, %v614_v5  ;;  %v3454_v34 = vpop.eup %3453  ;;  %v617_v12 = vmul.f32 %v3452_v3, %v4181_v49 }
 0x4dd   :  { %975 = vmatpush.bf16.msra.mxu3 %v954_v8  ;;  %v616_v38 = vmul.f32 %v3454_v34, %v4152_v16 }
 0x4df   :  { %v620_v2 = vpack.c.bf16 %v617_v12, %v616_v38 }
 0x4e0   :  { %v3456_v30 = vpop.eup %3455 }
 0x4e1   :  { %v3458_v13 = vpop.eup %3457  ;;  %v943_v39 = vmul.f32 %v3456_v30, %v4191_v53 }
 0x4e2   :  { %v942_v18 = vmul.f32 %v3458_v13, %v4174_v1  ;;  %v929_v47 = vpop.xlane.xlu1 %928 }
 0x4e4   :  { %v787_v11 = vpop.permute.xlu2 %786  ;;  %v948_v61 = vpack.c.bf16 %v943_v39, %v942_v18 }
 0x4e5   :  { %811 = vmatpush.bf16.msra.mxu2 %v787_v11 }
 0x4e8   :  { %3034 = vmatmul.msk.bf16.vlgmr.msrb.gmra.mxu3 %vm386_vm7, %v618_v52  ;;  %3040 = vmatmul.msk.bf16.vlgmr.msra.gmra.mxu2 %vm386_vm7, %v783_v50 }
 0x4eb   :  { %v932_v4 = vpop.xlane.xlu1 %931 }
 0x4ec   :  { %v952_v9 = vpop.permute.xlu0 %951 }
 0x4ed   :  { %976 = vmatpush.bf16.msra.mxu3 %v952_v9 }
 0x4f8   :  { %3035 = vmatmul.msk.bf16.gmra.mxu3 %vm386_vm7, %v619_v54 }
 0x508   :  { %3036 = vmatmul.msk.bf16.gmra.mxu3 %vm386_vm7, %v620_v2 }
 0x517   :  { %v926_v55 = vpop.xlane.xlu0 %925 }
 0x518   :  { %3046 = vmatmul.msk.bf16.vlgmr.msra.gmra.mxu3 %vm386_vm7, %v948_v61  ;;  %3459 = vrcp.f32 %v926_v55 }
 0x519   :  { %3461 = vrcp.f32 %v929_v47 }
 0x51a   :  { %3463 = vrcp.f32 %v761_v42 }
 0x51d   :  { %v764_v16 = vpop.xlane.xlu2 %763 }
 0x51e   :  { %3465 = vrcp.f32 %v764_v16  ;;  %v3460_v49 = vpop.eup %3459 }
 0x51f   :  { %v3462_v59 = vpop.eup %3461  ;;  %v944_v60 = vmul.f32 %v3460_v49, %v4228_v10  ;;  %v770_v36 = vpop.xlane.xlu0 %769  ;;  %v3208_v49 = vld [vmem:[%s5166_s2 + $0x38] sm:$0xff] }
 0x520   :  { %v3464_v25 = vpop.eup %3463  ;;  %v945_v53 = vmul.f32 %v3462_v59, %v4195_v57  ;;  %1121 = vmatpush.bf16.msrb.mxu0 %v3208_v49  ;;  %v3207_v59 = vld [vmem:[%s5166_s2 + $0x30] sm:$0xff] }
 0x521   :  { %v779_v1 = vmul.f32 %v3464_v25, %v4183_v46 }
 0x522   :  { %v949_v33 = vpack.c.bf16 %v945_v53, %v944_v60 }
 0x524   :  { %v3466_v26 = vpop.eup %3465  ;;  %1122 = vmatpush.bf16.msrb.mxu0 %v3207_v59 }
 0x525   :  { %v767_v62 = vpop.xlane.xlu2 %766  ;;  %v780_v29 = vmul.f32 %v3466_v26, %v4233_v41  ;;  %v4280_v41 = vpop.f32.mrf.mxu3 }
 0x526   :  { %3467 = vrcp.f32 %v767_v62 }
 0x527   :  { %v784_v14 = vpack.c.bf16 %v780_v29, %v779_v1  ;;  %3469 = vrcp.f32 %v932_v4 }
 0x528   :  { %3047 = vmatmul.msk.bf16.gmra.mxu3 %vm386_vm7, %v949_v33  ;;  %3471 = vrcp.f32 %v770_v36 }
 0x529   :  { %3041 = vmatmul.msk.bf16.gmra.mxu2 %vm386_vm7, %v784_v14 }
 0x52c   :  { %v3468_v28 = vpop.eup %3467 }
 0x52d   :  { %v935_v10 = vpop.xlane.xlu2 %934  ;;  %v3470_v57 = vpop.eup %3469  ;;  %v781_v46 = vmul.f32 %v3468_v28, %v4242_v32 }
 0x52e   :  { %3473 = vrcp.f32 %v935_v10  ;;  %v3472_v63 = vpop.eup %3471  ;;  %v946_v6 = vmul.f32 %v3470_v57, %v4202_v7  ;;  %v485_v56 = vpop.f32.mrf.mxu3 }
 0x52f   :  { %v782_v51 = vmul.f32 %v3472_v63, %v4235_v0 }
 0x531   :  { %v785_v40 = vpack.c.bf16 %v782_v51, %v781_v46 }
 0x534   :  { %v3474_v8 = vpop.eup %3473 }
 0x535   :  { %v947_v45 = vmul.f32 %v3474_v8, %v4246_v24 }
 0x536   :  { %v4287_v58 = vpop.f32.mrf.mxu3 }
 0x537   :  { %v950_v21 = vpack.c.bf16 %v947_v45, %v946_v6 }
 0x539   :  { %3042 = vmatmul.msk.bf16.gmra.mxu2 %vm386_vm7, %v785_v40  ;;  %3048 = vmatmul.msk.bf16.gmra.mxu3 %vm386_vm7, %v950_v21 }
 0x53e   :  { %v4289_v17 = vpop.f32.mrf.mxu3 }
 0x55b   :  { %v4291_v32 = vpop.f32.mrf.mxu3 }
 0x563   :  { %v4293_v44 = vpop.f32.mrf.mxu3 }
 0x56b   :  { %v648_v0 = vpop.f32.mrf.mxu3  ;;  %v813_v11 = vpop.f32.mrf.mxu2 }
 0x573   :  { %v650_v7 = vpop.f32.mrf.mxu3  ;;  %v815_v50 = vpop.f32.mrf.mxu2 }
 0x574   :  { %v3256_v24 = vpack.i.bf16 %v650_v7, %v648_v0  ;;  %v3261_v52 = vpack.i.bf16 %v815_v50, %v813_v11 }
 0x576   :  { %3257 = vrot.lane.b32.xlu0 %v3256_v24, %s3677_s26  ;;  %3262 = vrot.lane.b32.xlu1 %v3261_v52, %s3678_s27 }
 0x57b   :  { %v653_v9 = vpop.f32.mrf.mxu3 }
 0x583   :  { %v655_v48 = vpop.f32.mrf.mxu3 }
 0x584   :  { %v3271_v20 = vpack.i.bf16 %v655_v48, %v653_v9 }
 0x586   :  { %3272 = vrot.lane.b32.xlu0 %v3271_v20, %s3677_s26 }
 0x58b   :  { %v658_v5 = vpop.f32.mrf.mxu3 }
 0x593   :  { %v660_v37 = vpop.f32.mrf.mxu3 }
 0x594   :  { %v3286_v54 = vpack.i.bf16 %v660_v37, %v658_v5 }
 0x596   :  { %3287 = vrot.lane.b32.xlu1 %v3286_v54, %s3677_s26 }
 0x59b   :  { %v978_v3 = vpop.f32.mrf.mxu3 }
 0x5a3   :  { %v980_v34 = vpop.f32.mrf.mxu3 }
 0x5a4   :  { %v3266_v12 = vpack.i.bf16 %v980_v34, %v978_v3 }
 0x5a6   :  { %3267 = vrot.lane.b32.xlu2 %v3266_v12, %s3679_s28 }
 0x5ab   :  { %v983_v22 = vpop.f32.mrf.mxu3 }
 0x5ac   :  { %v818_v38 = vpop.f32.mrf.mxu2 }
 0x5b3   :  { %v985_v2 = vpop.f32.mrf.mxu3 }
 0x5b4   :  { %v3281_v42 = vpack.i.bf16 %v985_v2, %v983_v22  ;;  %v820_v30 = vpop.f32.mrf.mxu2 }
 0x5b5   :  { %v3276_v13 = vpack.i.bf16 %v820_v30, %v818_v38 }
 0x5b6   :  { %3282 = vrot.lane.b32.xlu2 %v3281_v42, %s3679_s28 }
 0x5b7   :  { %3277 = vrot.lane.b32.xlu0 %v3276_v13, %s3678_s27 }
 0x5bc   :  { %v823_v39 = vpop.f32.mrf.mxu2  ;;  %v988_v18 = vpop.f32.mrf.mxu3 }
 0x5c4   :  { %v825_v61 = vpop.f32.mrf.mxu2  ;;  %v990_v55 = vpop.f32.mrf.mxu3 }
 0x5c5   :  { %v3291_v47 = vpack.i.bf16 %v825_v61, %v823_v39  ;;  %v3296_v16 = vpack.i.bf16 %v990_v55, %v988_v18 }
 0x5c7   :  { %3297 = vrot.lane.b32.xlu2 %v3296_v16, %s3679_s28  ;;  %3292 = vrot.lane.b32.xlu0 %v3291_v47, %s3678_s27 }
 0x5e8   :  { %v3258_v25 = vpop.permute.xlu0 %3257  ;;  %v3263_v60 = vpop.permute.xlu1 %3262 }
 0x5e9   :  { %v3260_v26 = vunpack.i.h.bf16 %v3258_v25  ;;  %v3259_v53 = vunpack.i.l.bf16 %v3258_v25  ;;  %v3265_v62 = vunpack.i.h.bf16 %v3263_v60  ;;  %v3264_v1 = vunpack.i.l.bf16 %v3263_v60 }
 0x5eb   :  { %v1066_v29 = vsel %vm343_vm6, %v485_v56, %v3260_v26  ;;  %v1065_v33 = vsel %vm343_vm6, %v4280_v41, %v3259_v53 }
 0x5ec   :  { %v1072_v10 = vsel %vm1071_vm8, %v1065_v33, %v3264_v1  ;;  %v1073_v28 = vsel %vm1071_vm8, %v1066_v29, %v3265_v62 }
 0x5f8   :  { %v3273_v8 = vpop.permute.xlu0 %3272 }
 0x5f9   :  { %v3275_v51 = vunpack.i.h.bf16 %v3273_v8  ;;  %v3274_v6 = vunpack.i.l.bf16 %v3273_v8 }
 0x5fb   :  { %v1068_v56 = vsel %vm343_vm6, %v4289_v17, %v3275_v51  ;;  %v1067_v0 = vsel %vm343_vm6, %v4287_v58, %v3274_v6 }
 0x600   :  { %v3268_v14 = vpop.permute.xlu2 %3267 }
 0x601   :  { %v3270_v4 = vunpack.i.h.bf16 %v3268_v14  ;;  %v3269_v36 = vunpack.i.l.bf16 %v3268_v14 }
 0x603   :  { %v1079_v57 = vsel %vm1078_vm9, %v1072_v10, %v3269_v36  ;;  %v1080_v63 = vsel %vm1078_vm9, %v1073_v28, %v3270_v4 }
 0x604   :  { %v1085_v46 = vpack.c.bf16 %v1080_v63, %v1079_v57 }
 0x606   :  { %3057 = vmatmul.msk.bf16.vlgmr.msrb.gmra.mxu0 %vm108_vm1, %v1085_v46 }
 0x608   :  { %v3288_v20 = vpop.permute.xlu1 %3287 }
 0x609   :  { %v3290_v5 = vunpack.i.h.bf16 %v3288_v20  ;;  %v3289_v37 = vunpack.i.l.bf16 %v3288_v20 }
 0x60b   :  { %v1070_v34 = vsel %vm343_vm6, %v4293_v44, %v3290_v5  ;;  %v1069_v12 = vsel %vm343_vm6, %v4291_v32, %v3289_v37  ;;  %v3349_v44 = vld [vmem:[%s5167_s3 + $0x35] ss:$0 sm:$0xff] }
 0x610   :  { %v3283_v41 = vpop.permute.xlu2 %3282 }
 0x611   :  { %v3285_v11 = vunpack.i.h.bf16 %v3283_v41  ;;  %v3284_v7 = vunpack.i.l.bf16 %v3283_v41 }
 0x621   :  { %v3298_v17 = vpop.permute.xlu2 %3297 }
 0x622   :  { %v3300_v22 = vunpack.i.h.bf16 %v3298_v17  ;;  %v3299_v38 = vunpack.i.l.bf16 %v3298_v17 }
 0x629   :  { %v3278_v45 = vpop.permute.xlu0 %3277 }
 0x62a   :  { %v3280_v40 = vunpack.i.h.bf16 %v3278_v45  ;;  %v3279_v21 = vunpack.i.l.bf16 %v3278_v45 }
 0x62c   :  { %v1074_v50 = vsel %vm1071_vm8, %v1067_v0, %v3279_v21  ;;  %v1075_v24 = vsel %vm1071_vm8, %v1068_v56, %v3280_v40 }
 0x62d   :  { %v1081_v52 = vsel %vm1078_vm9, %v1074_v50, %v3284_v7  ;;  %v1082_v9 = vsel %vm1078_vm9, %v1075_v24, %v3285_v11 }
 0x62e   :  { %v1086_v48 = vpack.c.bf16 %v1082_v9, %v1081_v52 }
 0x630   :  { %3058 = vmatmul.msk.bf16.gmra.mxu0 %vm108_vm1, %v1086_v48 }
 0x639   :  { %v3293_v54 = vpop.permute.xlu0 %3292 }
 0x63a   :  { %v3295_v3 = vunpack.i.h.bf16 %v3293_v54  ;;  %v3294_v58 = vunpack.i.l.bf16 %v3293_v54 }
 0x63c   :  { %v1077_v2 = vsel %vm1071_vm8, %v1070_v34, %v3295_v3  ;;  %v1076_v42 = vsel %vm1071_vm8, %v1069_v12, %v3294_v58  ;;  %v3210_v12 = vld [vmem:[%s5166_s2 + $0x48] sm:$0xff] }
 0x63d   :  { %v1083_v30 = vsel %vm1078_vm9, %v1076_v42, %v3299_v38  ;;  %v1084_v13 = vsel %vm1078_vm9, %v1077_v2, %v3300_v22  ;;  %1329 = vmatpush.bf16.msrb.mxu2 %v3210_v12  ;;  %v3209_v2 = vld [vmem:[%s5166_s2 + $0x40] sm:$0xff] }
 0x63e   :  { %v1087_v39 = vpack.c.bf16 %v1084_v13, %v1083_v30 }
 0x640   :  { %3059 = vmatmul.msk.bf16.gmra.mxu0 %vm108_vm1, %v1087_v39 }
 0x641   :  { %1330 = vmatpush.bf16.msrb.mxu2 %v3209_v2 }
 0x683   :  { %v1124_v18 = vpop.f32.mrf.mxu0 }
 0x684   :  { %v1125_v61 = vadd.f32 %v3349_v44, %v1124_v18 }
 0x686   :  { %v4340_v32 = vadd.f32 %v1125_v61, %v3739_v15 }
 0x688   :  { %v1147_v55 = vsel %vm108_vm1, %v4340_v32, 0.0 }
 0x689   :  { %1148 = vadd.xlane.f32.xlu1 %v1147_v55 }
 0x68b   :  { %v1126_v47 = vpop.f32.mrf.mxu0 }
 0x68c   :  { %v1127_v16 = vadd.f32 %v3349_v44, %v1126_v47 }
 0x68e   :  { %v4345_v49 = vadd.f32 %v1127_v16, %v3746_v19 }
 0x690   :  { %v1150_v59 = vsel %vm108_vm1, %v4345_v49, 0.0 }
 0x691   :  { %1151 = vadd.xlane.f32.xlu0 %v1150_v59 }
 0x6ad   :  { %v1129_v25 = vpop.f32.mrf.mxu0 }
 0x6ae   :  { %v1130_v60 = vadd.f32 %v3349_v44, %v1129_v25 }
 0x6b0   :  { %v4350_v26 = vadd.f32 %v1130_v60, %v3753_v23 }
 0x6b2   :  { %v1153_v15 = vsel %vm108_vm1, %v4350_v26, 0.0 }
 0x6b3   :  { %1154 = vadd.xlane.f32.xlu2 %v1153_v15 }
 0x6b5   :  { %v1131_v53 = vpop.f32.mrf.mxu0 }
 0x6b6   :  { %v1132_v62 = vadd.f32 %v3349_v44, %v1131_v53 }
 0x6b8   :  { %v4355_v1 = vadd.f32 %v1132_v62, %v3760_v27 }
 0x6ba   :  { %v1156_v19 = vsel %vm108_vm1, %v4355_v1, 0.0 }
 0x6bb   :  { %1157 = vadd.xlane.f32.xlu1 %v1156_v19  ;;  %v4422_v19 = vld [vmem:[%s5167_s3 + $0x32] ss:$0 sm:$0xff] }
 0x6bd   :  { %v1134_v29 = vpop.f32.mrf.mxu0 }
 0x6be   :  { %v1135_v33 = vadd.f32 %v3349_v44, %v1134_v29 }
 0x6c0   :  { %v4360_v14 = vadd.f32 %v1135_v33, %v3767_v31 }
 0x6c2   :  { %v1159_v23 = vsel %vm108_vm1, %v4360_v14, 0.0 }
 0x6c3   :  { %1160 = vadd.xlane.f32.xlu2 %v1159_v23 }
 0x6c5   :  { %v1136_v4 = vpop.f32.mrf.mxu0 }
 0x6c6   :  { %v1137_v36 = vadd.f32 %v3349_v44, %v1136_v4  ;;  %v4428_v4 = vld [vmem:[%s5167_s3 + $0x33] ss:$0 sm:$0xff] }
 0x6c8   :  { %v4365_v10 = vadd.f32 %v1137_v36, %v3774_v35 }
 0x6ca   :  { %v1162_v27 = vsel %vm108_vm1, %v4365_v10, 0.0 }
 0x6cb   :  { %1163 = vadd.xlane.f32.xlu0 %v1162_v27 }
 0x6fc   :  { %v1149_v28 = vpop.xlane.xlu1 %1148 }
 0x6fd   :  { %v1165_v57 = vmul.f32 %v1149_v28, %v3778_v43 }
 0x6ff   :  { %v4371_v63 = vsub.f32 %v4340_v32, %v1165_v57 }
 0x701   :  { %v1177_v31 = vmul.f32 %v4371_v63, %v4371_v63 }
 0x703   :  { %v1183_v46 = vsel %vm108_vm1, %v1177_v31, 0.0 }
 0x704   :  { %v1152_v8 = vpop.xlane.xlu0 %1151  ;;  %1184 = vadd.xlane.f32.xlu1 %v1183_v46 }
 0x705   :  { %v1166_v35 = vmul.f32 %v1152_v8, %v3778_v43 }
 0x707   :  { %v4378_v51 = vsub.f32 %v4345_v49, %v1166_v35 }
 0x709   :  { %v1178_v6 = vmul.f32 %v4378_v51, %v4378_v51 }
 0x70b   :  { %v1186_v41 = vsel %vm108_vm1, %v1178_v6, 0.0 }
 0x70c   :  { %1187 = vadd.xlane.f32.xlu2 %v1186_v41 }
 0x726   :  { %v1155_v45 = vpop.xlane.xlu2 %1154 }
 0x727   :  { %v1167_v40 = vmul.f32 %v1155_v45, %v3778_v43 }
 0x729   :  { %v4385_v21 = vsub.f32 %v4350_v26, %v1167_v40 }
 0x72b   :  { %v1179_v56 = vmul.f32 %v4385_v21, %v4385_v21 }
 0x72d   :  { %v1189_v0 = vsel %vm108_vm1, %v1179_v56, 0.0 }
 0x72e   :  { %1190 = vadd.xlane.f32.xlu0 %v1189_v0  ;;  %v1158_v11 = vpop.xlane.xlu1 %1157 }
 0x72f   :  { %v1168_v7 = vmul.f32 %v1158_v11, %v3778_v43 }
 0x731   :  { %v4392_v50 = vsub.f32 %v4355_v1, %v1168_v7 }
 0x733   :  { %v1180_v24 = vmul.f32 %v4392_v50, %v4392_v50 }
 0x735   :  { %v1192_v52 = vsel %vm108_vm1, %v1180_v24, 0.0 }
 0x736   :  { %v1161_v9 = vpop.xlane.xlu2 %1160  ;;  %1193 = vadd.xlane.f32.xlu1 %v1192_v52 }
 0x737   :  { %v1169_v48 = vmul.f32 %v1161_v9, %v3778_v43 }
 0x739   :  { %v4399_v20 = vsub.f32 %v4360_v14, %v1169_v48 }
 0x73b   :  { %v1181_v5 = vmul.f32 %v4399_v20, %v4399_v20 }
 0x73d   :  { %v1195_v37 = vsel %vm108_vm1, %v1181_v5, 0.0 }
 0x73e   :  { %1196 = vadd.xlane.f32.xlu2 %v1195_v37  ;;  %v1164_v17 = vpop.xlane.xlu0 %1163 }
 0x73f   :  { %v1170_v54 = vmul.f32 %v1164_v17, %v3778_v43 }
 0x741   :  { %v4406_v3 = vsub.f32 %v4365_v10, %v1170_v54 }
 0x743   :  { %v1182_v58 = vmul.f32 %v4406_v3, %v4406_v3 }
 0x745   :  { %v1198_v34 = vsel %vm108_vm1, %v1182_v58, 0.0 }
 0x746   :  { %1199 = vadd.xlane.f32.xlu0 %v1198_v34 }
 0x777   :  { %v1185_v22 = vpop.xlane.xlu1 %1184 }
 0x778   :  { %v1201_v38 = vmul.f32 %v1185_v22, %v3778_v43 }
 0x77a   :  { %v1207_v42 = vadd.f32 1e-06, %v1201_v38 }
 0x77c   :  { %3475 = vrsqrt.f32 %v1207_v42  ;;  %vm1219_vm11 = vweird.f32 %v1207_v42 }
 0x77f   :  { %v1188_v30 = vpop.xlane.xlu2 %1187 }
 0x780   :  { %v1202_v13 = vmul.f32 %v1188_v30, %v3778_v43 }
 0x782   :  { %v3476_v39 = vpop.eup %3475  ;;  %v1208_v44 = vadd.f32 1e-06, %v1202_v13 }
 0x783   :  { %v1214_v18 = vmul.f32 %v3476_v39, %v1207_v42  ;;  %vm1220_vm10 = vweird.f32 %v3476_v39 }
 0x784   :  { %3477 = vrsqrt.f32 %v1208_v44  ;;  %vm1221_vm12 = vmor %vm1219_vm11, %vm1220_vm10  ;;  %vm1229_vm14 = vweird.f32 %v1208_v44 }
 0x785   :  { %v1215_v61 = vmul.f32 %v3476_v39, %v1214_v18 }
 0x787   :  { %v1216_v55 = vmul.f32 0.5, %v1215_v61 }
 0x789   :  { %v1217_v47 = vsub.f32 1.5, %v1216_v55 }
 0x78a   :  { %v3478_v16 = vpop.eup %3477 }
 0x78b   :  { %v1218_v59 = vmul.f32 %v3476_v39, %v1217_v47  ;;  %v1224_v25 = vmul.f32 %v3478_v16, %v1208_v44  ;;  %vm1230_vm13 = vweird.f32 %v3478_v16 }
 0x78c   :  { %vm1231_vm15 = vmor %vm1229_vm14, %vm1230_vm13 }
 0x78d   :  { %v1225_v60 = vmul.f32 %v3478_v16, %v1224_v25  ;;  %v1222_v15 = vsel %vm1221_vm12, %v3476_v39, %v1218_v59 }
 0x78e   :  { %v1273_v29 = vmul.f32 %v1222_v15, %v4371_v63 }
 0x78f   :  { %v1226_v53 = vmul.f32 0.5, %v1225_v60 }
 0x790   :  { %v1280_v36 = vmul.f32 %v4422_v19, %v1273_v29 }
 0x791   :  { %v1227_v62 = vsub.f32 1.5, %v1226_v53 }
 0x792   :  { %v1287_v57 = vadd.f32 %v4428_v4, %v1280_v36 }
 0x793   :  { %v1228_v33 = vmul.f32 %v3478_v16, %v1227_v62 }
 0x795   :  { %v1232_v23 = vsel %vm1231_vm15, %v3478_v16, %v1228_v33 }
 0x796   :  { %v1274_v27 = vmul.f32 %v1232_v23, %v4378_v51 }
 0x798   :  { %v1281_v28 = vmul.f32 %v4422_v19, %v1274_v27 }
 0x79a   :  { %v1288_v31 = vadd.f32 %v4428_v4, %v1281_v28 }
 0x79c   :  { %v1293_v63 = vpack.c.bf16 %v1288_v31, %v1287_v57 }
 0x79e   :  { %3068 = vmatmul.msk.bf16.vlgmr.msrb.gmra.mxu2 %vm108_vm1, %v1293_v63 }
 0x7a1   :  { %v1191_v46 = vpop.xlane.xlu0 %1190 }
 0x7a2   :  { %v1203_v8 = vmul.f32 %v1191_v46, %v3778_v43 }
 0x7a4   :  { %v1209_v35 = vadd.f32 1e-06, %v1203_v8  ;;  %v3214_v8 = vld [vmem:[%s5166_s2 + $0x68] sm:$0xff] }
 0x7a6   :  { %3479 = vrsqrt.f32 %v1209_v35  ;;  %vm1239_vm2 = vweird.f32 %v1209_v35 }
 0x7a9   :  { %v1194_v6 = vpop.xlane.xlu1 %1193 }
 0x7aa   :  { %v1204_v41 = vmul.f32 %v1194_v6, %v3778_v43  ;;  %v3212_v6 = vld [vmem:[%s5166_s2 + $0x58] sm:$0xff] }
 0x7ac   :  { %v3480_v45 = vpop.eup %3479  ;;  %v1210_v40 = vadd.f32 1e-06, %v1204_v41  ;;  %v3352_v41 = vld [vmem:[%s5167_s3 + $0x36] ss:$0 sm:$0xff] }
 0x7ad   :  { %v1234_v51 = vmul.f32 %v3480_v45, %v1209_v35  ;;  %vm1240_vm0 = vweird.f32 %v3480_v45  ;;  %v3213_v35 = vld [vmem:[%s5166_s2 + $0x60] sm:$0xff] }
 0x7ae   :  { %3481 = vrsqrt.f32 %v1210_v40  ;;  %vm1241_vm3 = vmor %vm1239_vm2, %vm1240_vm0  ;;  %vm1249_vm5 = vweird.f32 %v1210_v40 }
 0x7af   :  { %v1235_v56 = vmul.f32 %v3480_v45, %v1234_v51 }
 0x7b1   :  { %v1236_v0 = vmul.f32 0.5, %v1235_v56  ;;  %v1197_v11 = vpop.xlane.xlu2 %1196 }
 0x7b2   :  { %v1205_v7 = vmul.f32 %v1197_v11, %v3778_v43 }
 0x7b3   :  { %v1237_v24 = vsub.f32 1.5, %v1236_v0 }
 0x7b4   :  { %v3482_v52 = vpop.eup %3481  ;;  %v1211_v9 = vadd.f32 1e-06, %v1205_v7 }
 0x7b5   :  { %v1238_v48 = vmul.f32 %v3480_v45, %v1237_v24  ;;  %v1244_v5 = vmul.f32 %v3482_v52, %v1210_v40  ;;  %vm1250_vm4 = vweird.f32 %v3482_v52 }
 0x7b6   :  { %3483 = vrsqrt.f32 %v1211_v9  ;;  %vm1251_vm10 = vmor %vm1249_vm5, %vm1250_vm4  ;;  %vm1259_vm12 = vweird.f32 %v1211_v9 }
 0x7b7   :  { %v1245_v37 = vmul.f32 %v3482_v52, %v1244_v5  ;;  %v1242_v17 = vsel %vm1241_vm3, %v3480_v45, %v1238_v48  ;;  %v3211_v45 = vld [vmem:[%s5166_s2 + $0x50] sm:$0xff] }
 0x7b8   :  { %v1275_v38 = vmul.f32 %v1242_v17, %v4385_v21 }
 0x7b9   :  { %v1246_v54 = vmul.f32 0.5, %v1245_v37  ;;  %v1200_v58 = vpop.xlane.xlu0 %1199 }
 0x7ba   :  { %v1206_v34 = vmul.f32 %v1200_v58, %v3778_v43  ;;  %v1282_v18 = vmul.f32 %v4422_v19, %v1275_v38 }
 0x7bb   :  { %v1247_v12 = vsub.f32 1.5, %v1246_v54 }
 0x7bc   :  { %v3484_v22 = vpop.eup %3483  ;;  %v1212_v2 = vadd.f32 1e-06, %v1206_v34  ;;  %v1289_v59 = vadd.f32 %v4428_v4, %v1282_v18 }
 0x7bd   :  { %v1248_v42 = vmul.f32 %v3482_v52, %v1247_v12  ;;  %v1254_v30 = vmul.f32 %v3484_v22, %v1211_v9  ;;  %vm1260_vm11 = vweird.f32 %v3484_v22 }
 0x7be   :  { %3485 = vrsqrt.f32 %v1212_v2  ;;  %vm1261_vm13 = vmor %vm1259_vm12, %vm1260_vm11  ;;  %vm1269_vm15 = vweird.f32 %v1212_v2 }
 0x7bf   :  { %v1252_v13 = vsel %vm1251_vm10, %v3482_v52, %v1248_v42  ;;  %v1255_v39 = vmul.f32 %v3484_v22, %v1254_v30 }
 0x7c0   :  { %v1276_v44 = vmul.f32 %v1252_v13, %v4392_v50 }
 0x7c1   :  { %v1256_v61 = vmul.f32 0.5, %v1255_v39 }
 0x7c2   :  { %v1283_v55 = vmul.f32 %v4422_v19, %v1276_v44 }
 0x7c3   :  { %v1257_v47 = vsub.f32 1.5, %v1256_v61 }
 0x7c4   :  { %v3486_v16 = vpop.eup %3485  ;;  %v1290_v21 = vadd.f32 %v4428_v4, %v1283_v55 }
 0x7c5   :  { %v1258_v25 = vmul.f32 %v3484_v22, %v1257_v47  ;;  %v1264_v60 = vmul.f32 %v3486_v16, %v1212_v2  ;;  %vm1270_vm14 = vweird.f32 %v3486_v16 }
 0x7c6   :  { %v1294_v15 = vpack.c.bf16 %v1290_v21, %v1289_v59  ;;  %vm1271_vm0 = vmor %vm1269_vm15, %vm1270_vm14 }
 0x7c7   :  { %v1265_v53 = vmul.f32 %v3486_v16, %v1264_v60  ;;  %v1262_v50 = vsel %vm1261_vm13, %v3484_v22, %v1258_v25 }
 0x7c8   :  { %3069 = vmatmul.msk.bf16.gmra.mxu2 %vm108_vm1, %v1294_v15  ;;  %v1277_v33 = vmul.f32 %v1262_v50, %v4399_v20  ;;  %v3218_v20 = vld [vmem:[%s5166_s2 + $0x88] sm:$0xff] }
 0x7c9   :  { %v1266_v62 = vmul.f32 0.5, %v1265_v53  ;;  %1468 = vmatpush.bf16.msrb.mxu1 %v3218_v20 }
 0x7ca   :  { %v1284_v28 = vmul.f32 %v4422_v19, %v1277_v33 }
 0x7cb   :  { %v1267_v29 = vsub.f32 1.5, %v1266_v62 }
 0x7cc   :  { %v1291_v31 = vadd.f32 %v4428_v4, %v1284_v28 }
 0x7cd   :  { %v1268_v23 = vmul.f32 %v3486_v16, %v1267_v29 }
 0x7cf   :  { %v1272_v36 = vsel %vm1271_vm0, %v3486_v16, %v1268_v23 }
 0x7d0   :  { %v1278_v27 = vmul.f32 %v1272_v36, %v4406_v3  ;;  %v3217_v3 = vld [vmem:[%s5166_s2 + $0x80] sm:$0xff] }
 0x7d1   :  { %1469 = vmatpush.bf16.msrb.mxu1 %v3217_v3 }
 0x7d2   :  { %v1285_v57 = vmul.f32 %v4422_v19, %v1278_v27  ;;  %v3216_v19 = vld [vmem:[%s5166_s2 + $0x78] sm:$0xff] }
 0x7d4   :  { %v1292_v63 = vadd.f32 %v4428_v4, %v1285_v57  ;;  %v3215_v4 = vld [vmem:[%s5166_s2 + $0x70] sm:$0xff] }
 0x7d5   :  { %1470 = vmatpush.bf16.msrb.mxu1 %v3216_v19 }
 0x7d6   :  { %v1295_v46 = vpack.c.bf16 %v1292_v63, %v1291_v31 }
 0x7d8   :  { %3070 = vmatmul.msk.bf16.gmra.mxu2 %vm108_vm1, %v1295_v46 }
 0x7d9   :  { %1471 = vmatpush.bf16.msrb.mxu1 %v3215_v4 }
 0x7dd   :  { %1472 = vmatpush.bf16.msrb.mxu1 %v3214_v8 }
 0x7e1   :  { %1473 = vmatpush.bf16.msrb.mxu1 %v3213_v35 }
 0x7e5   :  { %1474 = vmatpush.bf16.msrb.mxu1 %v3212_v6 }
 0x7e9   :  { %1475 = vmatpush.bf16.msrb.mxu1 %v3211_v45 }
 0x821   :  { %v1332_v40 = vpop.f32.mrf.mxu2 }
 0x822   :  { %v1333_v51 = vadd.f32 %v3352_v41, %v1332_v40 }
 0x824   :  { %v1347_v56 = vmul.f32 %v1333_v51, %v1333_v51 }
 0x826   :  { %v1353_v0 = vmul.f32 %v1347_v56, %v1333_v51 }
 0x828   :  { %v1359_v11 = vmul.f32 0.044715, %v1353_v0 }
 0x829   :  { %v1334_v7 = vpop.f32.mrf.mxu2 }
 0x82a   :  { %v1365_v24 = vadd.f32 %v1359_v11, %v1333_v51  ;;  %v1335_v52 = vadd.f32 %v3352_v41, %v1334_v7 }
 0x82c   :  { %v1371_v9 = vmul.f32 0.7978846, %v1365_v24  ;;  %v1348_v48 = vmul.f32 %v1335_v52, %v1335_v52 }
 0x82e   :  { %v1354_v5 = vmul.f32 %v1348_v48, %v1335_v52  ;;  %3487 = vtanh.f32 %v1371_v9 }
 0x830   :  { %v1360_v37 = vmul.f32 0.044715, %v1354_v5 }
 0x832   :  { %v1366_v17 = vadd.f32 %v1360_v37, %v1335_v52 }
 0x834   :  { %v1372_v54 = vmul.f32 0.7978846, %v1366_v17  ;;  %v3488_v58 = vpop.eup %3487  ;;  %v3353_v17 = vld [vmem:[%s5167_s3 + $0x37] ss:$0 sm:$0xff] }
 0x835   :  { %v1383_v34 = vadd.f32 1.0, %v3488_v58 }
 0x836   :  { %3489 = vtanh.f32 %v1372_v54 }
 0x837   :  { %v1389_v22 = vmul.f32 0.5, %v1383_v34 }
 0x839   :  { %v1395_v42 = vmul.f32 %v1389_v22, %v1333_v51 }
 0x83c   :  { %v3490_v12 = vpop.eup %3489 }
 0x83d   :  { %v1384_v38 = vadd.f32 1.0, %v3490_v12 }
 0x83f   :  { %v1390_v2 = vmul.f32 0.5, %v1384_v38 }
 0x841   :  { %v1396_v30 = vmul.f32 %v1390_v2, %v1335_v52 }
 0x843   :  { %v1401_v13 = vpack.c.bf16 %v1396_v30, %v1395_v42 }
 0x845   :  { %1476 = vmatmul.bf16.vlgmr.msrb.gmra.mxu1 %v1401_v13 }
 0x84b   :  { %v1337_v39 = vpop.f32.mrf.mxu2 }
 0x84c   :  { %v1338_v44 = vadd.f32 %v3352_v41, %v1337_v39 }
 0x84e   :  { %v1349_v18 = vmul.f32 %v1338_v44, %v1338_v44 }
 0x850   :  { %v1355_v61 = vmul.f32 %v1349_v18, %v1338_v44 }
 0x852   :  { %v1361_v55 = vmul.f32 0.044715, %v1355_v61 }
 0x853   :  { %v1339_v47 = vpop.f32.mrf.mxu2 }
 0x854   :  { %v1367_v16 = vadd.f32 %v1361_v55, %v1338_v44  ;;  %v1340_v59 = vadd.f32 %v3352_v41, %v1339_v47 }
 0x856   :  { %v1350_v21 = vmul.f32 %v1340_v59, %v1340_v59  ;;  %v1373_v25 = vmul.f32 0.7978846, %v1367_v16 }
 0x858   :  { %v1356_v60 = vmul.f32 %v1350_v21, %v1340_v59  ;;  %3491 = vtanh.f32 %v1373_v25 }
 0x85a   :  { %v1362_v15 = vmul.f32 0.044715, %v1356_v60 }
 0x85b   :  { %v1342_v53 = vpop.f32.mrf.mxu2 }
 0x85c   :  { %v1368_v50 = vadd.f32 %v1362_v15, %v1340_v59  ;;  %v1343_v62 = vadd.f32 %v3352_v41, %v1342_v53 }
 0x85e   :  { %v1351_v29 = vmul.f32 %v1343_v62, %v1343_v62  ;;  %v1374_v33 = vmul.f32 0.7978846, %v1368_v50  ;;  %v3492_v23 = vpop.eup %3491 }
 0x85f   :  { %v1385_v57 = vadd.f32 1.0, %v3492_v23 }
 0x860   :  { %v1357_v36 = vmul.f32 %v1351_v29, %v1343_v62  ;;  %3493 = vtanh.f32 %v1374_v33 }
 0x861   :  { %v1391_v4 = vmul.f32 0.5, %v1385_v57 }
 0x862   :  { %v1363_v27 = vmul.f32 0.044715, %v1357_v36 }
 0x863   :  { %v1344_v28 = vpop.f32.mrf.mxu2  ;;  %v1397_v45 = vmul.f32 %v1391_v4, %v1338_v44 }
 0x864   :  { %v1369_v31 = vadd.f32 %v1363_v27, %v1343_v62  ;;  %v1345_v63 = vadd.f32 %v3352_v41, %v1344_v28 }
 0x866   :  { %v3494_v46 = vpop.eup %3493  ;;  %v1352_v20 = vmul.f32 %v1345_v63, %v1345_v63  ;;  %v1375_v3 = vmul.f32 0.7978846, %v1369_v31 }
 0x867   :  { %v1386_v19 = vadd.f32 1.0, %v3494_v46 }
 0x868   :  { %v1358_v8 = vmul.f32 %v1352_v20, %v1345_v63  ;;  %3495 = vtanh.f32 %v1375_v3 }
 0x869   :  { %v1392_v35 = vmul.f32 0.5, %v1386_v19 }
 0x86a   :  { %v1364_v6 = vmul.f32 0.044715, %v1358_v8 }
 0x86b   :  { %v1398_v40 = vmul.f32 %v1392_v35, %v1340_v59 }
 0x86c   :  { %v1370_v51 = vadd.f32 %v1364_v6, %v1345_v63 }
 0x86d   :  { %v1402_v56 = vpack.c.bf16 %v1398_v40, %v1397_v45 }
 0x86e   :  { %v1376_v0 = vmul.f32 0.7978846, %v1370_v51  ;;  %v3496_v11 = vpop.eup %3495 }
 0x86f   :  { %1481 = vmatmul.bf16.gmra.mxu1 %v1402_v56  ;;  %v1387_v7 = vadd.f32 1.0, %v3496_v11 }
 0x870   :  { %3497 = vtanh.f32 %v1376_v0 }
 0x871   :  { %v1393_v52 = vmul.f32 0.5, %v1387_v7  ;;  %v3220_v7 = vld [vmem:[%s5166_s2 + $0x98] sm:$0xff] }
 0x872   :  { %1690 = vmatpush.bf16.msrb.mxu3 %v3220_v7 }
 0x873   :  { %v1399_v48 = vmul.f32 %v1393_v52, %v1343_v62  ;;  %v3219_v52 = vld [vmem:[%s5166_s2 + $0x90] sm:$0xff] }
 0x876   :  { %v3498_v24 = vpop.eup %3497  ;;  %1691 = vmatpush.bf16.msrb.mxu3 %v3219_v52 }
 0x877   :  { %v1388_v41 = vadd.f32 1.0, %v3498_v24 }
 0x879   :  { %v1394_v9 = vmul.f32 0.5, %v1388_v41 }
 0x87b   :  { %v1400_v5 = vmul.f32 %v1394_v9, %v1345_v63 }
 0x87d   :  { %v1403_v37 = vpack.c.bf16 %v1400_v5, %v1399_v48 }
 0x87f   :  { %1486 = vmatmul.bf16.gmra.mxu1 %v1403_v37 }
 0x8c2   :  { %v1477_v54 = vpop.f32.mrf.mxu1 }
 0x8c3   :  { %v1492_v58 = vadd.f32 %v1477_v54, %v4340_v32 }
 0x8c5   :  { %v4485_v34 = vadd.f32 %v3353_v17, %v1492_v58 }
 0x8c7   :  { %v1508_v12 = vsel %vm108_vm1, %v4485_v34, 0.0 }
 0x8c8   :  { %1509 = vadd.xlane.f32.xlu1 %v1508_v12 }
 0x8ca   :  { %v1479_v22 = vpop.f32.mrf.mxu1 }
 0x8cb   :  { %v1493_v38 = vadd.f32 %v1479_v22, %v4345_v49 }
 0x8cd   :  { %v4490_v2 = vadd.f32 %v3353_v17, %v1493_v38 }
 0x8cf   :  { %v1511_v42 = vsel %vm108_vm1, %v4490_v2, 0.0 }
 0x8d0   :  { %1512 = vadd.xlane.f32.xlu2 %v1511_v42 }
 0x8ec   :  { %v1482_v30 = vpop.f32.mrf.mxu1 }
 0x8ed   :  { %v1494_v13 = vadd.f32 %v1482_v30, %v4350_v26 }
 0x8ef   :  { %v4495_v39 = vadd.f32 %v3353_v17, %v1494_v13 }
 0x8f1   :  { %v1514_v32 = vsel %vm108_vm1, %v4495_v39, 0.0 }
 0x8f2   :  { %1515 = vadd.xlane.f32.xlu0 %v1514_v32 }
 0x8f4   :  { %v1484_v44 = vpop.f32.mrf.mxu1 }
 0x8f5   :  { %v1495_v18 = vadd.f32 %v1484_v44, %v4355_v1 }
 0x8f7   :  { %v4500_v61 = vadd.f32 %v3353_v17, %v1495_v18 }
 0x8f9   :  { %v1517_v49 = vsel %vm108_vm1, %v4500_v61, 0.0 }
 0x8fa   :  { %1518 = vadd.xlane.f32.xlu1 %v1517_v49  ;;  %v4567_v49 = vld [vmem:[%s5167_s3 + $0x38] ss:$0 sm:$0xff] }
 0x8fc   :  { %v1487_v55 = vpop.f32.mrf.mxu1 }
 0x8fd   :  { %v1496_v47 = vadd.f32 %v1487_v55, %v4360_v14 }
 0x8ff   :  { %v4505_v16 = vadd.f32 %v3353_v17, %v1496_v47 }
 0x901   :  { %v1520_v26 = vsel %vm108_vm1, %v4505_v16, 0.0 }
 0x902   :  { %1521 = vadd.xlane.f32.xlu2 %v1520_v26 }
 0x904   :  { %v1489_v59 = vpop.f32.mrf.mxu1 }
 0x905   :  { %v1497_v21 = vadd.f32 %v1489_v59, %v4365_v10  ;;  %v4573_v59 = vld [vmem:[%s5167_s3 + $0x39] ss:$0 sm:$0xff] }
 0x907   :  { %v4510_v25 = vadd.f32 %v3353_v17, %v1497_v21 }
 0x909   :  { %v1523_v1 = vsel %vm108_vm1, %v4510_v25, 0.0 }
 0x90a   :  { %1524 = vadd.xlane.f32.xlu0 %v1523_v1 }
 0x93b   :  { %v1510_v60 = vpop.xlane.xlu1 %1509 }
 0x93c   :  { %v1526_v15 = vmul.f32 %v1510_v60, %v3778_v43 }
 0x93e   :  { %v4516_v14 = vsub.f32 %v4485_v34, %v1526_v15 }
 0x940   :  { %v1538_v53 = vmul.f32 %v4516_v14, %v4516_v14 }
 0x942   :  { %v1544_v50 = vsel %vm108_vm1, %v1538_v53, 0.0 }
 0x943   :  { %v1513_v62 = vpop.xlane.xlu2 %1512  ;;  %1545 = vadd.xlane.f32.xlu1 %v1544_v50 }
 0x944   :  { %v1527_v10 = vmul.f32 %v1513_v62, %v3778_v43 }
 0x946   :  { %v4523_v29 = vsub.f32 %v4490_v2, %v1527_v10 }
 0x948   :  { %v1539_v33 = vmul.f32 %v4523_v29, %v4523_v29 }
 0x94a   :  { %v1547_v23 = vsel %vm108_vm1, %v1539_v33, 0.0 }
 0x94b   :  { %1548 = vadd.xlane.f32.xlu2 %v1547_v23 }
 0x965   :  { %v1516_v36 = vpop.xlane.xlu0 %1515 }
 0x966   :  { %v1528_v27 = vmul.f32 %v1516_v36, %v3778_v43 }
 0x968   :  { %v4530_v28 = vsub.f32 %v4495_v39, %v1528_v27 }
 0x96a   :  { %v1540_v57 = vmul.f32 %v4530_v28, %v4530_v28 }
 0x96c   :  { %v1550_v31 = vsel %vm108_vm1, %v1540_v57, 0.0 }
 0x96d   :  { %1551 = vadd.xlane.f32.xlu0 %v1550_v31  ;;  %v1519_v63 = vpop.xlane.xlu1 %1518 }
 0x96e   :  { %v1529_v46 = vmul.f32 %v1519_v63, %v3778_v43 }
 0x970   :  { %v4537_v20 = vsub.f32 %v4500_v61, %v1529_v46 }
 0x972   :  { %v1541_v3 = vmul.f32 %v4537_v20, %v4537_v20 }
 0x974   :  { %v1553_v19 = vsel %vm108_vm1, %v1541_v3, 0.0 }
 0x975   :  { %v1522_v4 = vpop.xlane.xlu2 %1521  ;;  %1554 = vadd.xlane.f32.xlu1 %v1553_v19 }
 0x976   :  { %v1530_v8 = vmul.f32 %v1522_v4, %v3778_v43 }
 0x978   :  { %v4544_v35 = vsub.f32 %v4505_v16, %v1530_v8 }
 0x97a   :  { %v1542_v6 = vmul.f32 %v4544_v35, %v4544_v35 }
 0x97c   :  { %v1556_v45 = vsel %vm108_vm1, %v1542_v6, 0.0 }
 0x97d   :  { %1557 = vadd.xlane.f32.xlu2 %v1556_v45  ;;  %v1525_v40 = vpop.xlane.xlu0 %1524 }
 0x97e   :  { %v1531_v51 = vmul.f32 %v1525_v40, %v3778_v43 }
 0x980   :  { %v4551_v56 = vsub.f32 %v4510_v25, %v1531_v51 }
 0x982   :  { %v1543_v0 = vmul.f32 %v4551_v56, %v4551_v56 }
 0x984   :  { %v1559_v11 = vsel %vm108_vm1, %v1543_v0, 0.0 }
 0x985   :  { %1560 = vadd.xlane.f32.xlu0 %v1559_v11 }
 0x9b6   :  { %v1546_v24 = vpop.xlane.xlu1 %1545 }
 0x9b7   :  { %v1562_v41 = vmul.f32 %v1546_v24, %v3778_v43 }
 0x9b9   :  { %v1568_v9 = vadd.f32 1e-06, %v1562_v41 }
 0x9bb   :  { %3499 = vrsqrt.f32 %v1568_v9  ;;  %vm1580_vm3 = vweird.f32 %v1568_v9 }
 0x9be   :  { %v1549_v48 = vpop.xlane.xlu2 %1548 }
 0x9bf   :  { %v1563_v5 = vmul.f32 %v1549_v48, %v3778_v43 }
 0x9c1   :  { %v3500_v37 = vpop.eup %3499  ;;  %v1569_v17 = vadd.f32 1e-06, %v1563_v5 }
 0x9c2   :  { %v1575_v54 = vmul.f32 %v3500_v37, %v1568_v9  ;;  %vm1581_vm2 = vweird.f32 %v3500_v37 }
 0x9c3   :  { %3501 = vrsqrt.f32 %v1569_v17  ;;  %vm1582_vm4 = vmor %vm1580_vm3, %vm1581_vm2  ;;  %vm1590_vm10 = vweird.f32 %v1569_v17 }
 0x9c4   :  { %v1576_v58 = vmul.f32 %v3500_v37, %v1575_v54 }
 0x9c6   :  { %v1577_v12 = vmul.f32 0.5, %v1576_v58 }
 0x9c8   :  { %v1578_v22 = vsub.f32 1.5, %v1577_v12 }
 0x9c9   :  { %v3502_v38 = vpop.eup %3501 }
 0x9ca   :  { %v1579_v42 = vmul.f32 %v3500_v37, %v1578_v22  ;;  %v1585_v30 = vmul.f32 %v3502_v38, %v1569_v17  ;;  %vm1591_vm5 = vweird.f32 %v3502_v38 }
 0x9cb   :  { %vm1592_vm11 = vmor %vm1590_vm10, %vm1591_vm5 }
 0x9cc   :  { %v1586_v13 = vmul.f32 %v3502_v38, %v1585_v30  ;;  %v1583_v32 = vsel %vm1582_vm4, %v3500_v37, %v1579_v42 }
 0x9cd   :  { %v1634_v55 = vmul.f32 %v1583_v32, %v4516_v14 }
 0x9ce   :  { %v1587_v44 = vmul.f32 0.5, %v1586_v13 }
 0x9cf   :  { %v1641_v21 = vmul.f32 %v4567_v49, %v1634_v55 }
 0x9d0   :  { %v1588_v18 = vsub.f32 1.5, %v1587_v44 }
 0x9d1   :  { %v1648_v15 = vadd.f32 %v4573_v59, %v1641_v21 }
 0x9d2   :  { %v1589_v47 = vmul.f32 %v3502_v38, %v1588_v18 }
 0x9d4   :  { %v1593_v26 = vsel %vm1592_vm11, %v3502_v38, %v1589_v47 }
 0x9d5   :  { %v1635_v1 = vmul.f32 %v1593_v26, %v4523_v29 }
 0x9d7   :  { %v1642_v60 = vmul.f32 %v4567_v49, %v1635_v1 }
 0x9d9   :  { %v1649_v53 = vadd.f32 %v4573_v59, %v1642_v60 }
 0x9db   :  { %v1654_v14 = vpack.c.bf16 %v1649_v53, %v1648_v15 }
 0x9dd   :  { %3111 = vmatmul.msk.bf16.vlgmr.msrb.gmra.mxu3 %vm108_vm1, %v1654_v14 }
 0x9e0   :  { %v1552_v50 = vpop.xlane.xlu0 %1551 }
 0x9e1   :  { %v1564_v62 = vmul.f32 %v1552_v50, %v3778_v43 }
 0x9e3   :  { %v1570_v10 = vadd.f32 1e-06, %v1564_v62 }
 0x9e5   :  { %3503 = vrsqrt.f32 %v1570_v10  ;;  %vm1600_vm13 = vweird.f32 %v1570_v10 }
 0x9e8   :  { %v1555_v33 = vpop.xlane.xlu1 %1554 }
 0x9e9   :  { %v1565_v23 = vmul.f32 %v1555_v33, %v3778_v43  ;;  %v3356_v33 = vld [vmem:[%s5167_s3 + $0x3c] ss:$0 sm:$0xff] }
 0x9eb   :  { %v3504_v36 = vpop.eup %3503  ;;  %v1571_v27 = vadd.f32 1e-06, %v1565_v23 }
 0x9ec   :  { %v1595_v29 = vmul.f32 %v3504_v36, %v1570_v10  ;;  %vm1601_vm12 = vweird.f32 %v3504_v36 }
 0x9ed   :  { %3505 = vrsqrt.f32 %v1571_v27  ;;  %vm1602_vm14 = vmor %vm1600_vm13, %vm1601_vm12  ;;  %vm1610_vm0 = vweird.f32 %v1571_v27 }
 0x9ee   :  { %v1596_v57 = vmul.f32 %v3504_v36, %v1595_v29 }
 0x9f0   :  { %v1597_v31 = vmul.f32 0.5, %v1596_v57  ;;  %v1558_v63 = vpop.xlane.xlu2 %1557 }
 0x9f1   :  { %v1566_v46 = vmul.f32 %v1558_v63, %v3778_v43 }
 0x9f2   :  { %v1598_v3 = vsub.f32 1.5, %v1597_v31 }
 0x9f3   :  { %v3506_v19 = vpop.eup %3505  ;;  %v1572_v4 = vadd.f32 1e-06, %v1566_v46 }
 0x9f4   :  { %v1599_v8 = vmul.f32 %v3504_v36, %v1598_v3  ;;  %v1605_v6 = vmul.f32 %v3506_v19, %v1571_v27  ;;  %vm1611_vm15 = vweird.f32 %v3506_v19 }
 0x9f5   :  { %3507 = vrsqrt.f32 %v1572_v4  ;;  %vm1612_vm2 = vmor %vm1610_vm0, %vm1611_vm15  ;;  %vm1620_vm4 = vweird.f32 %v1572_v4 }
 0x9f6   :  { %v1606_v45 = vmul.f32 %v3506_v19, %v1605_v6  ;;  %v1603_v40 = vsel %vm1602_vm14, %v3504_v36, %v1599_v8 }
 0x9f7   :  { %v1636_v41 = vmul.f32 %v1603_v40, %v4530_v28 }
 0x9f8   :  { %v1607_v51 = vmul.f32 0.5, %v1606_v45  ;;  %v1561_v0 = vpop.xlane.xlu0 %1560 }
 0x9f9   :  { %v1567_v11 = vmul.f32 %v1561_v0, %v3778_v43  ;;  %v1643_v54 = vmul.f32 %v4567_v49, %v1636_v41 }
 0x9fa   :  { %v1608_v7 = vsub.f32 1.5, %v1607_v51 }
 0x9fb   :  { %v3508_v24 = vpop.eup %3507  ;;  %v1573_v52 = vadd.f32 1e-06, %v1567_v11  ;;  %v1650_v42 = vadd.f32 %v4573_v59, %v1643_v54 }
 0x9fc   :  { %v1609_v9 = vmul.f32 %v3506_v19, %v1608_v7  ;;  %v1615_v48 = vmul.f32 %v3508_v24, %v1572_v4  ;;  %vm1621_vm3 = vweird.f32 %v3508_v24 }
 0x9fd   :  { %3509 = vrsqrt.f32 %v1573_v52  ;;  %vm1622_vm5 = vmor %vm1620_vm4, %vm1621_vm3  ;;  %vm1630_vm11 = vweird.f32 %v1573_v52 }
 0x9fe   :  { %v1613_v5 = vsel %vm1612_vm2, %v3506_v19, %v1609_v9  ;;  %v1616_v37 = vmul.f32 %v3508_v24, %v1615_v48 }
 0x9ff   :  { %v1637_v17 = vmul.f32 %v1613_v5, %v4537_v20 }
 0xa00   :  { %v1617_v58 = vmul.f32 0.5, %v1616_v37 }
 0xa01   :  { %v1644_v12 = vmul.f32 %v4567_v49, %v1637_v17 }
 0xa02   :  { %v1618_v22 = vsub.f32 1.5, %v1617_v58 }
 0xa03   :  { %v3510_v38 = vpop.eup %3509  ;;  %v1651_v28 = vadd.f32 %v4573_v59, %v1644_v12 }
 0xa04   :  { %v1619_v30 = vmul.f32 %v3508_v24, %v1618_v22  ;;  %v1625_v13 = vmul.f32 %v3510_v38, %v1573_v52  ;;  %vm1631_vm10 = vweird.f32 %v3510_v38 }
 0xa05   :  { %v1655_v32 = vpack.c.bf16 %v1651_v28, %v1650_v42  ;;  %vm1632_vm12 = vmor %vm1630_vm11, %vm1631_vm10 }
 0xa06   :  { %v1626_v44 = vmul.f32 %v3510_v38, %v1625_v13  ;;  %v1623_v20 = vsel %vm1622_vm5, %v3508_v24, %v1619_v30 }
 0xa07   :  { %3112 = vmatmul.msk.bf16.gmra.mxu3 %vm108_vm1, %v1655_v32  ;;  %v1638_v47 = vmul.f32 %v1623_v20, %v4544_v35 }
 0xa08   :  { %v1627_v18 = vmul.f32 0.5, %v1626_v44 }
 0xa09   :  { %v1645_v60 = vmul.f32 %v4567_v49, %v1638_v47 }
 0xa0a   :  { %v1628_v55 = vsub.f32 1.5, %v1627_v18 }
 0xa0b   :  { %v1652_v53 = vadd.f32 %v4573_v59, %v1645_v60 }
 0xa0c   :  { %v1629_v26 = vmul.f32 %v3510_v38, %v1628_v55 }
 0xa0e   :  { %v1633_v21 = vsel %vm1632_vm12, %v3510_v38, %v1629_v26 }
 0xa0f   :  { %v1639_v1 = vmul.f32 %v1633_v21, %v4551_v56 }
 0xa11   :  { %v1646_v15 = vmul.f32 %v4567_v49, %v1639_v1 }
 0xa13   :  { %v1653_v14 = vadd.f32 %v4573_v59, %v1646_v15 }
 0xa15   :  { %v1656_v50 = vpack.c.bf16 %v1653_v14, %v1652_v53 }
 0xa17   :  { %3113 = vmatmul.msk.bf16.gmra.mxu3 %vm108_vm1, %v1656_v50 }
 0xa60   :  { %v1693_v62 = vpop.f32.mrf.mxu3 }
 0xa61   :  { %v1694_v57 = vadd.f32 %v3356_v33, %v1693_v62 }
 0xa63   :  { %v1708_v19 = vpack.c.bf16 %v1694_v57, %v1694_v57 }
 0xa65   :  { %v1720_v8 = vunpack.c.l.b16 %v1708_v19 }
 0xa68   :  { %v1695_v10 = vpop.f32.mrf.mxu3 }
 0xa69   :  { %v1696_v29 = vadd.f32 %v3356_v33, %v1695_v10 }
 0xa6b   :  { %v1709_v59 = vpack.c.bf16 %v1696_v29, %v1696_v29 }
 0xa6d   :  { %v1721_v4 = vunpack.c.l.b16 %v1709_v59 }
 0xa6f   :  { %v4606_v45 = vpack.c.b16 %v1721_v4, %v1720_v8 }
 0xa8a   :  { %v1698_v35 = vpop.f32.mrf.mxu3 }
 0xa8b   :  { %v1699_v23 = vadd.f32 %v3356_v33, %v1698_v35 }
 0xa8d   :  { %v1710_v36 = vpack.c.bf16 %v1699_v23, %v1699_v23 }
 0xa8f   :  { %v1722_v31 = vunpack.c.l.b16 %v1710_v36 }
 0xa92   :  { %v1700_v56 = vpop.f32.mrf.mxu3 }
 0xa93   :  { %v1701_v27 = vadd.f32 %v3356_v33, %v1700_v56 }
 0xa95   :  { %v1711_v49 = vpack.c.bf16 %v1701_v27, %v1701_v27 }
 0xa97   :  { %v1723_v63 = vunpack.c.l.b16 %v1711_v49 }
 0xa99   :  { %v4602_v46 = vpack.c.b16 %v1723_v63, %v1722_v31  ;;  %v3633_v63 = vld [vmem:[%s5165_s1] sm:$0xff] }
 0xa9a   :  { %v1703_v3 = vpop.f32.mrf.mxu3 }
 0xa9b   :  { %1731 = vrot.lane.b32.xlu0 %v4602_v46, %s3666_s30  ;;  %v1704_v6 = vadd.f32 %v3356_v33, %v1703_v3 }
 0xa9d   :  { %v1712_v51 = vpack.c.bf16 %v1704_v6, %v1704_v6 }
 0xa9f   :  { %v1724_v7 = vunpack.c.l.b16 %v1712_v51 }
 0xaa2   :  { %v1705_v40 = vpop.f32.mrf.mxu3 }
 0xaa3   :  { %v1706_v0 = vadd.f32 %v3356_v33, %v1705_v40  ;;  %1729 = vrot.lane.b32.xlu0 %v4606_v45, %s3666_s30  ;;  %v3634_v40 = vld [vmem:[%s5165_s1 + $0x8] sm:$0xff] }
 0xaa5   :  { %v1713_v11 = vpack.c.bf16 %v1706_v0, %v1706_v0 }
 0xaa7   :  { %v1725_v24 = vunpack.c.l.b16 %v1713_v11 }
 0xaa9   :  { %v4610_v41 = vpack.c.b16 %v1725_v24, %v1724_v7 }
 0xaab   :  { %1898 = vrot.lane.b32.xlu2 %v4610_v41, %s3668_s6  ;;  %1733 = vrot.lane.b32.xlu1 %v4610_v41, %s3666_s30  ;;  %s2984_s30 = sshll.u32 %s3680_s15, 4  ;;  %s2985_s30 = int_to_ptr.vmem [resolvable:$true] %s2984_s30 }
 0xaac   :  { %1890 = vrot.lane.b32.xlu0 %v4602_v46, %s3670_s8 }
 0xab3   :  { %1894 = vrot.lane.b32.xlu2 %v4606_v45, %s3668_s6  ;;  %1896 = vrot.lane.b32.xlu1 %v4602_v46, %s3668_s6 }
 0xab4   :  { %2061 = vrot.lane.b32.xlu0 %v4602_v46, %s3667_s5 }
 0xabb   :  { %2063 = vrot.lane.b32.xlu2 %v4610_v41, %s3667_s5  ;;  %1888 = vrot.lane.b32.xlu1 %v4606_v45, %s3670_s8 }
 0xabc   :  { %2059 = vrot.lane.b32.xlu0 %v4606_v45, %s3667_s5 }
 0xac3   :  { %1892 = vrot.lane.b32.xlu2 %v4610_v41, %s3670_s8  ;;  %2228 = vrot.lane.b32.xlu1 %v4610_v41, %s3671_s9  ;;  %s2986_s8 = sshll.u32 %s5168_s4, 4  ;;  %s2987_s8 = int_to_ptr.hbm [resolvable:$true] %s2986_s8 }
 0xac4   :  { %2218 = vrot.lane.b32.xlu0 %v4606_v45, %s3672_s10 }
 0xacb   :  { %2224 = vrot.lane.b32.xlu2 %v4606_v45, %s3671_s9  ;;  %2226 = vrot.lane.b32.xlu1 %v4602_v46, %s3671_s9 }
 0xacc   :  { %2013 = vrot.lane.b32.xlu0 %v4602_v46, %s3673_s11 }
 0xad3   :  { %2055 = vrot.lane.b32.xlu2 %v4602_v46, %s3669_s7  ;;  %2053 = vrot.lane.b32.xlu1 %v4606_v45, %s3669_s7 }
 0xad4   :  { %1846 = vrot.lane.b32.xlu0 %v4606_v45, %s3674_s12 }
 0xadb   :  { %2011 = vrot.lane.b32.xlu2 %v4606_v45, %s3673_s11  ;;  %2220 = vrot.lane.b32.xlu1 %v4602_v46, %s3672_s10 }
 0xadc   :  { %1850 = vrot.lane.b32.xlu0 %v4610_v41, %s3674_s12 }
 0xae3   :  { %2015 = vrot.lane.b32.xlu2 %v4610_v41, %s3673_s11  ;;  %1848 = vrot.lane.b32.xlu1 %v4602_v46, %s3674_s12 }
 0xae4   :  { %2345 = vrot.lane.b32.xlu0 %v4610_v41, %s3676_s25 }
 0xaeb   :  { %2180 = vrot.lane.b32.xlu2 %v4610_v41, %s3675_s24 }
 0xb05   :  { %v1899_v52 = vpop.permute.xlu2 %1898 }
 0xb06   :  { %v1916_v9 = vsel %vm343_vm6, %v1899_v52, 0 }
 0xb07   :  { %1923 = vmatpush.bf16.xpose.msra.mxu1 %v1916_v9  ;;  %v3635_v9 = vld [vmem:[%s5165_s1 + $0x10] sm:$0xff] }
 0xb0d   :  { %v1895_v48 = vpop.permute.xlu2 %1894  ;;  %v1732_v5 = vpop.permute.xlu0 %1731 }
 0xb0e   :  { %v1748_v28 = vsel %vm343_vm6, %v1732_v5, 0  ;;  %v1910_v20 = vsel %vm343_vm6, %v1895_v48, 0 }
 0xb15   :  { %v2064_v37 = vpop.permute.xlu2 %2063  ;;  %v1730_v17 = vpop.permute.xlu0 %1729 }
 0xb16   :  { %v1745_v18 = vsel %vm343_vm6, %v1730_v17, 0  ;;  %v2081_v47 = vsel %vm343_vm6, %v2064_v37, 0 }
 0xb1d   :  { %v1893_v54 = vpop.permute.xlu2 %1892  ;;  %v1734_v58 = vpop.permute.xlu1 %1733 }
 0xb1e   :  { %v1751_v12 = vsel %vm343_vm6, %v1734_v58, 0  ;;  %v1891_v22 = vpop.permute.xlu0 %1890 }
 0xb1f   :  { %1758 = vmatpush.bf16.xpose.msra.mxu0 %v1751_v12  ;;  %v3636_v12 = vld [vmem:[%s5165_s1 + $0x18] sm:$0xff] }
 0xb25   :  { %v2225_v38 = vpop.permute.xlu2 %2224  ;;  %v1897_v42 = vpop.permute.xlu1 %1896 }
 0xb26   :  { %v1913_v30 = vsel %vm343_vm6, %v1897_v42, 0  ;;  %v2062_v13 = vpop.permute.xlu0 %2061  ;;  %v2240_v33 = vsel %vm343_vm6, %v2225_v38, 0 }
 0xb27   :  { %1759 = vmatpush.bf16.xpose.msra.mxu0 %v1748_v28  ;;  %1924 = vmatpush.bf16.xpose.msra.mxu1 %v1913_v30  ;;  %v2078_v15 = vsel %vm343_vm6, %v2062_v13, 0  ;;  %v4734_v13 = vld [vmem:[%s5165_s1 + $0x20] sm:$0xff] }
 0xb2d   :  { %v2056_v32 = vpop.permute.xlu2 %2055  ;;  %v1889_v44 = vpop.permute.xlu1 %1888 }
 0xb2e   :  { %v2060_v55 = vpop.permute.xlu0 %2059 }
 0xb2f   :  { %1760 = vmatpush.bf16.xpose.msra.mxu0 %v1745_v18  ;;  %1925 = vmatpush.bf16.xpose.msra.mxu1 %v1910_v20  ;;  %v2075_v10 = vsel %vm343_vm6, %v2060_v55, 0 }
 0xb35   :  { %v2012_v26 = vpop.permute.xlu2 %2011  ;;  %v2229_v21 = vpop.permute.xlu1 %2228 }
 0xb36   :  { %v2246_v1 = vsel %vm343_vm6, %v2229_v21, 0  ;;  %v2219_v60 = vpop.permute.xlu0 %2218  ;;  %3114 = vmatmul.msk.bf16.vlgmr.msra.gmra.mxu0 %vm343_vm6, %v4606_v45  ;;  %3120 = vmatmul.msk.bf16.vlgmr.msra.gmra.mxu1 %vm343_vm6, %v1889_v44 }
 0xb37   :  { %2088 = vmatpush.bf16.xpose.msrb.mxu0 %v2081_v47  ;;  %2253 = vmatpush.bf16.xpose.msrb.mxu1 %v2246_v1 }
 0xb3d   :  { %v2016_v53 = vpop.permute.xlu2 %2015  ;;  %v2227_v14 = vpop.permute.xlu1 %2226 }
 0xb3e   :  { %v2243_v50 = vsel %vm343_vm6, %v2227_v14, 0  ;;  %v2014_v62 = vpop.permute.xlu0 %2013  ;;  %2034 = vmatpush.bf16.msra.mxu3 %v2016_v53 }
 0xb3f   :  { %2089 = vmatpush.bf16.xpose.msrb.mxu0 %v2078_v15  ;;  %2254 = vmatpush.bf16.xpose.msrb.mxu1 %v2243_v50 }
 0xb42   :  { %2035 = vmatpush.bf16.msra.mxu3 %v2014_v62 }
 0xb45   :  { %v2054_v35 = vpop.permute.xlu1 %2053  ;;  %v2181_v49 = vpop.permute.xlu2 %2180 }
 0xb46   :  { %v1847_v23 = vpop.permute.xlu0 %1846  ;;  %3115 = vmatmul.msk.bf16.gmra.mxu0 %vm343_vm6, %v4602_v46  ;;  %3121 = vmatmul.msk.bf16.gmra.mxu1 %vm343_vm6, %v1891_v22 }
 0xb47   :  { %2090 = vmatpush.bf16.xpose.msrb.mxu0 %v2075_v10  ;;  %2036 = vmatpush.bf16.msra.mxu3 %v2012_v26  ;;  %v4749_v26 = vld [vmem:[%s5165_s1 + $0x28] sm:$0xff] }
 0xb48   :  { %2255 = vmatpush.bf16.xpose.msrb.mxu1 %v2240_v33 }
 0xb4d   :  { %v2221_v56 = vpop.permute.xlu1 %2220 }
 0xb4e   :  { %v1851_v36 = vpop.permute.xlu0 %1850 }
 0xb4f   :  { %1869 = vmatpush.bf16.msra.mxu2 %v1851_v36 }
 0xb55   :  { %v1849_v27 = vpop.permute.xlu1 %1848 }
 0xb56   :  { %v2346_v29 = vpop.permute.xlu0 %2345  ;;  %3116 = vmatmul.msk.bf16.gmra.mxu0 %vm343_vm6, %v4610_v41  ;;  %1870 = vmatpush.bf16.msra.mxu2 %v1849_v27 }
 0xb57   :  { %3122 = vmatmul.msk.bf16.gmra.mxu1 %vm343_vm6, %v1893_v54  ;;  %2364 = vmatpush.bf16.msrb.mxu3 %v2346_v29 }
 0xb5a   :  { %1871 = vmatpush.bf16.msra.mxu2 %v1847_v23 }
 0xb5e   :  { %2199 = vmatpush.bf16.msrb.mxu2 %v2181_v49 }
 0xb66   :  { %3126 = vmatmul.msk.bf16.vlgmr.msrb.gmra.mxu0 %vm343_vm6, %v2054_v35 }
 0xb67   :  { %3132 = vmatmul.msk.bf16.vlgmr.msrb.gmra.mxu1 %vm343_vm6, %v2219_v60 }
 0xb76   :  { %3127 = vmatmul.msk.bf16.gmra.mxu0 %vm343_vm6, %v2056_v32 }
 0xb77   :  { %3133 = vmatmul.msk.bf16.gmra.mxu1 %vm343_vm6, %v2221_v56 }
 0xbb3   :  { %v1762_v57 = vpop.f32.mrf.mxu0  ;;  %v1927_v31 = vpop.f32.mrf.mxu1 }
 0xbb4   :  { %v4690_v59 = vadd.f32 %v3633_v63, %v1762_v57  ;;  %v4692_v3 = vadd.f32 %v3633_v63, %v1927_v31 }
 0xbb6   :  { %v1942_v19 = vsel %vm386_vm7, %v4692_v3, -inf  ;;  %v1777_v4 = vsel %vm386_vm7, %v4690_v59, -inf }
 0xbb7   :  { %1943 = vmax.xlane.f32.xlu1 %v1942_v19  ;;  %1778 = vmax.xlane.f32.xlu0 %v1777_v4 }
 0xbbb   :  { %v1764_v8 = vpop.f32.mrf.mxu0  ;;  %v1929_v6 = vpop.f32.mrf.mxu1 }
 0xbbc   :  { %v4701_v51 = vadd.f32 %v3634_v40, %v1764_v8  ;;  %v4703_v0 = vadd.f32 %v3634_v40, %v1929_v6 }
 0xbbe   :  { %v1780_v11 = vsel %vm386_vm7, %v4701_v51, -inf  ;;  %v1945_v7 = vsel %vm386_vm7, %v4703_v0, -inf }
 0xbbf   :  { %1781 = vmax.xlane.f32.xlu2 %v1780_v11  ;;  %1946 = vmax.xlane.f32.xlu0 %v1945_v7 }
 0xbc3   :  { %v1767_v24 = vpop.f32.mrf.mxu0  ;;  %v1932_v52 = vpop.f32.mrf.mxu1 }
 0xbc4   :  { %v4712_v48 = vadd.f32 %v3635_v9, %v1767_v24  ;;  %v4714_v5 = vadd.f32 %v3635_v9, %v1932_v52 }
 0xbc6   :  { %v1783_v37 = vsel %vm386_vm7, %v4712_v48, -inf  ;;  %v1948_v17 = vsel %vm386_vm7, %v4714_v5, -inf }
 0xbc7   :  { %1784 = vmax.xlane.f32.xlu2 %v1783_v37  ;;  %1949 = vmax.xlane.f32.xlu0 %v1948_v17 }
 0xbcb   :  { %v1769_v54 = vpop.f32.mrf.mxu0  ;;  %v1934_v58 = vpop.f32.mrf.mxu1 }
 0xbcc   :  { %v4723_v22 = vadd.f32 %v3636_v12, %v1769_v54  ;;  %v4725_v38 = vadd.f32 %v3636_v12, %v1934_v58 }
 0xbce   :  { %v1786_v42 = vsel %vm386_vm7, %v4723_v22, -inf  ;;  %v1951_v28 = vsel %vm386_vm7, %v4725_v38, -inf }
 0xbcf   :  { %1787 = vmax.xlane.f32.xlu1 %v1786_v42  ;;  %1952 = vmax.xlane.f32.xlu2 %v1951_v28 }
 0xbd3   :  { %v1772_v30 = vpop.f32.mrf.mxu0 }
 0xbd4   :  { %v4737_v32 = vadd.f32 %v4734_v13, %v1772_v30  ;;  %v1937_v44 = vpop.f32.mrf.mxu1 }
 0xbd5   :  { %v4740_v20 = vadd.f32 %v4734_v13, %v1937_v44 }
 0xbd6   :  { %v1789_v18 = vsel %vm386_vm7, %v4737_v32, -inf }
 0xbd7   :  { %1790 = vmax.xlane.f32.xlu1 %v1789_v18  ;;  %v1954_v55 = vsel %vm386_vm7, %v4740_v20, -inf }
 0xbd8   :  { %1955 = vmax.xlane.f32.xlu2 %v1954_v55 }
 0xbdb   :  { %v1774_v47 = vpop.f32.mrf.mxu0 }
 0xbdc   :  { %v4752_v21 = vadd.f32 %v4749_v26, %v1774_v47  ;;  %v1939_v1 = vpop.f32.mrf.mxu1 }
 0xbdd   :  { %v4755_v60 = vadd.f32 %v4749_v26, %v1939_v1 }
 0xbde   :  { %v1792_v15 = vsel %vm386_vm7, %v4752_v21, -inf }
 0xbdf   :  { %v1957_v53 = vsel %vm386_vm7, %v4755_v60, -inf  ;;  %1793 = vmax.xlane.f32.xlu0 %v1792_v15 }
 0xbe0   :  { %1958 = vmax.xlane.f32.xlu1 %v1957_v53 }
 0xbe3   :  { %v2092_v14 = vpop.f32.mrf.mxu0 }
 0xbe4   :  { %v4761_v50 = vadd.f32 %v3633_v63, %v2092_v14  ;;  %v2257_v62 = vpop.f32.mrf.mxu1 }
 0xbe5   :  { %v4763_v10 = vadd.f32 %v3633_v63, %v2257_v62 }
 0xbe6   :  { %v2107_v35 = vsel %vm386_vm7, %v4761_v50, -inf }
 0xbe7   :  { %2108 = vmax.xlane.f32.xlu0 %v2107_v35  ;;  %v2272_v33 = vsel %vm386_vm7, %v4763_v10, -inf }
 0xbe8   :  { %2273 = vmax.xlane.f32.xlu1 %v2272_v33 }
 0xbeb   :  { %v2094_v23 = vpop.f32.mrf.mxu0 }
 0xbec   :  { %v4769_v56 = vadd.f32 %v3634_v40, %v2094_v23  ;;  %v2259_v36 = vpop.f32.mrf.mxu1 }
 0xbed   :  { %v4771_v27 = vadd.f32 %v3634_v40, %v2259_v36 }
 0xbee   :  { %v2110_v29 = vsel %vm386_vm7, %v4769_v56, -inf }
 0xbef   :  { %2111 = vmax.xlane.f32.xlu2 %v2110_v29  ;;  %v2275_v49 = vsel %vm386_vm7, %v4771_v27, -inf }
 0xbf0   :  { %2276 = vmax.xlane.f32.xlu0 %v2275_v49 }
 0xbf3   :  { %v2097_v57 = vpop.f32.mrf.mxu0 }
 0xbf4   :  { %v4777_v31 = vadd.f32 %v3635_v9, %v2097_v57  ;;  %v2262_v63 = vpop.f32.mrf.mxu1 }
 0xbf5   :  { %v4779_v19 = vadd.f32 %v3635_v9, %v2262_v63 }
 0xbf6   :  { %v2113_v4 = vsel %vm386_vm7, %v4777_v31, -inf }
 0xbf7   :  { %v2278_v8 = vsel %vm386_vm7, %v4779_v19, -inf }
 0xbf8   :  { %2279 = vmax.xlane.f32.xlu2 %v2278_v8  ;;  %2114 = vmax.xlane.f32.xlu0 %v2113_v4 }
 0xbfb   :  { %v2099_v6 = vpop.f32.mrf.mxu0 }
 0xbfc   :  { %v4785_v40 = vadd.f32 %v3636_v12, %v2099_v6  ;;  %v2264_v11 = vpop.f32.mrf.mxu1 }
 0xbfd   :  { %v4787_v7 = vadd.f32 %v3636_v12, %v2264_v11 }
 0xbfe   :  { %v2116_v24 = vsel %vm386_vm7, %v4785_v40, -inf }
 0xbff   :  { %v2281_v52 = vsel %vm386_vm7, %v4787_v7, -inf  ;;  %2117 = vmax.xlane.f32.xlu1 %v2116_v24 }
 0xc00   :  { %2282 = vmax.xlane.f32.xlu0 %v2281_v52 }
 0xc2a   :  { %v1779_v9 = vpop.xlane.xlu0 %1778  ;;  %v1944_v37 = vpop.xlane.xlu1 %1943 }
 0xc2b   :  { %v1795_v17 = vsub.f32 %v4690_v59, %v1779_v9  ;;  %v1960_v58 = vsub.f32 %v4692_v3, %v1944_v37 }
 0xc2d   :  { %v1801_v54 = vmul.f32 1.442695, %v1795_v17  ;;  %v1966_v42 = vmul.f32 1.442695, %v1960_v58 }
 0xc2f   :  { %3511 = vpow2.f32 %v1801_v54 }
 0xc30   :  { %3513 = vpow2.f32 %v1966_v42 }
 0xc32   :  { %v1782_v28 = vpop.xlane.xlu2 %1781  ;;  %v1947_v12 = vpop.xlane.xlu0 %1946 }
 0xc33   :  { %v1796_v30 = vsub.f32 %v4701_v51, %v1782_v28  ;;  %v1961_v18 = vsub.f32 %v4703_v0, %v1947_v12 }
 0xc35   :  { %v1803_v44 = vmul.f32 1.442695, %v1796_v30  ;;  %v4797_v55 = vpop.eup %3511  ;;  %v1968_v59 = vmul.f32 1.442695, %v1961_v18 }
 0xc36   :  { %v1813_v47 = vsel %vm386_vm7, %v4797_v55, 0.0  ;;  %v4802_v53 = vpop.eup %3513 }
 0xc37   :  { %3515 = vpow2.f32 %v1803_v44  ;;  %1814 = vadd.xlane.f32.xlu2 %v1813_v47  ;;  %v1978_v35 = vsel %vm386_vm7, %v4802_v53, 0.0 }
 0xc38   :  { %3517 = vpow2.f32 %v1968_v59 }
 0xc3a   :  { %v1785_v1 = vpop.xlane.xlu2 %1784  ;;  %v1950_v3 = vpop.xlane.xlu0 %1949 }
 0xc3b   :  { %v1962_v15 = vsub.f32 %v4714_v5, %v1950_v3  ;;  %v1797_v51 = vsub.f32 %v4712_v48, %v1785_v1 }
 0xc3d   :  { %v4804_v14 = vpop.eup %3515  ;;  %v1970_v0 = vmul.f32 1.442695, %v1962_v15  ;;  %v1805_v33 = vmul.f32 1.442695, %v1797_v51 }
 0xc3e   :  { %v1816_v62 = vsel %vm386_vm7, %v4804_v14, 0.0  ;;  %v4811_v36 = vpop.eup %3517 }
 0xc3f   :  { %1817 = vadd.xlane.f32.xlu1 %v1816_v62  ;;  %3519 = vpow2.f32 %v1970_v0  ;;  %1979 = vadd.xlane.f32.xlu2 %v1978_v35  ;;  %v1981_v63 = vsel %vm386_vm7, %v4811_v36, 0.0 }
 0xc40   :  { %3521 = vpow2.f32 %v1805_v33 }
 0xc42   :  { %v1788_v23 = vpop.xlane.xlu1 %1787  ;;  %v1953_v5 = vpop.xlane.xlu2 %1952 }
 0xc43   :  { %v1798_v29 = vsub.f32 %v4723_v22, %v1788_v23  ;;  %v1963_v48 = vsub.f32 %v4725_v38, %v1953_v5 }
 0xc45   :  { %v1807_v49 = vmul.f32 1.442695, %v1798_v29  ;;  %v4815_v57 = vpop.eup %3519  ;;  %v1972_v8 = vmul.f32 1.442695, %v1963_v48 }
 0xc46   :  { %v1984_v4 = vsel %vm386_vm7, %v4815_v57, 0.0  ;;  %v4821_v11 = vpop.eup %3521 }
 0xc47   :  { %3523 = vpow2.f32 %v1807_v49  ;;  %1982 = vadd.xlane.f32.xlu1 %v1981_v63  ;;  %1985 = vadd.xlane.f32.xlu0 %v1984_v4  ;;  %v1819_v17 = vsel %vm386_vm7, %v4821_v11, 0.0 }
 0xc48   :  { %3525 = vpow2.f32 %v1972_v8 }
 0xc4a   :  { %v1791_v6 = vpop.xlane.xlu1 %1790 }
 0xc4b   :  { %v1799_v22 = vsub.f32 %v4737_v32, %v1791_v6  ;;  %v1956_v24 = vpop.xlane.xlu2 %1955 }
 0xc4c   :  { %v1964_v9 = vsub.f32 %v4740_v20, %v1956_v24 }
 0xc4d   :  { %v4824_v52 = vpop.eup %3523  ;;  %v1809_v38 = vmul.f32 1.442695, %v1799_v22 }
 0xc4e   :  { %v1822_v37 = vsel %vm386_vm7, %v4824_v52, 0.0  ;;  %v1974_v54 = vmul.f32 1.442695, %v1964_v9  ;;  %v4831_v42 = vpop.eup %3525 }
 0xc4f   :  { %3527 = vpow2.f32 %v1809_v38  ;;  %1823 = vadd.xlane.f32.xlu2 %v1822_v37  ;;  %1820 = vadd.xlane.f32.xlu1 %v1819_v17  ;;  %v1987_v47 = vsel %vm386_vm7, %v4831_v42, 0.0 }
 0xc50   :  { %3529 = vpow2.f32 %v1974_v54 }
 0xc52   :  { %v1794_v58 = vpop.xlane.xlu0 %1793 }
 0xc53   :  { %v1959_v32 = vpop.xlane.xlu1 %1958  ;;  %v1800_v28 = vsub.f32 %v4752_v21, %v1794_v58 }
 0xc54   :  { %v1965_v12 = vsub.f32 %v4755_v60, %v1959_v32 }
 0xc55   :  { %v4835_v30 = vpop.eup %3527  ;;  %v1811_v20 = vmul.f32 1.442695, %v1800_v28 }
 0xc56   :  { %v1976_v44 = vmul.f32 1.442695, %v1965_v12  ;;  %v1825_v18 = vsel %vm386_vm7, %v4835_v30, 0.0  ;;  %v4841_v1 = vpop.eup %3529 }
 0xc57   :  { %3531 = vpow2.f32 %v1811_v20  ;;  %1826 = vadd.xlane.f32.xlu2 %v1825_v18  ;;  %1988 = vadd.xlane.f32.xlu1 %v1987_v47  ;;  %v1990_v62 = vsel %vm386_vm7, %v4841_v1, 0.0 }
 0xc58   :  { %3533 = vpow2.f32 %v1976_v44 }
 0xc5a   :  { %v2109_v59 = vpop.xlane.xlu0 %2108 }
 0xc5b   :  { %v2274_v21 = vpop.xlane.xlu1 %2273  ;;  %v2125_v60 = vsub.f32 %v4761_v50, %v2109_v59 }
 0xc5c   :  { %v2290_v15 = vsub.f32 %v4763_v10, %v2274_v21 }
 0xc5d   :  { %v4844_v3 = vpop.eup %3531  ;;  %v2131_v51 = vmul.f32 1.442695, %v2125_v60 }
 0xc5e   :  { %v4847_v0 = vpop.eup %3533  ;;  %v1828_v35 = vsel %vm386_vm7, %v4844_v3, 0.0  ;;  %v2296_v50 = vmul.f32 1.442695, %v2290_v15 }
 0xc5f   :  { %3535 = vpow2.f32 %v2131_v51  ;;  %v1993_v33 = vsel %vm386_vm7, %v4847_v0, 0.0  ;;  %1991 = vadd.xlane.f32.xlu1 %v1990_v62  ;;  %1829 = vadd.xlane.f32.xlu0 %v1828_v35 }
 0xc60   :  { %1994 = vadd.xlane.f32.xlu2 %v1993_v33  ;;  %3537 = vpow2.f32 %v2296_v50 }
 0xc62   :  { %v2112_v23 = vpop.xlane.xlu2 %2111 }
 0xc63   :  { %v2126_v10 = vsub.f32 %v4769_v56, %v2112_v23  ;;  %v2277_v5 = vpop.xlane.xlu0 %2276 }
 0xc64   :  { %v2291_v48 = vsub.f32 %v4771_v27, %v2277_v5 }
 0xc65   :  { %v4856_v29 = vpop.eup %3535  ;;  %v2133_v49 = vmul.f32 1.442695, %v2126_v10 }
 0xc66   :  { %v2143_v63 = vsel %vm386_vm7, %v4856_v29, 0.0  ;;  %v2298_v4 = vmul.f32 1.442695, %v2291_v48  ;;  %v4861_v8 = vpop.eup %3537 }
 0xc67   :  { %3539 = vpow2.f32 %v2133_v49  ;;  %2144 = vadd.xlane.f32.xlu0 %v2143_v63  ;;  %v2308_v22 = vsel %vm386_vm7, %v4861_v8, 0.0 }
 0xc68   :  { %3541 = vpow2.f32 %v2298_v4 }
 0xc6b   :  { %v2280_v38 = vpop.xlane.xlu2 %2279  ;;  %v2115_v9 = vpop.xlane.xlu0 %2114 }
 0xc6c   :  { %v2292_v37 = vsub.f32 %v4779_v19, %v2280_v38  ;;  %v2127_v54 = vsub.f32 %v4777_v31, %v2115_v9 }
 0xc6d   :  { %v4863_v6 = vpop.eup %3539 }
 0xc6e   :  { %v2146_v56 = vsel %vm386_vm7, %v4863_v6, 0.0  ;;  %v4869_v27 = vpop.eup %3541  ;;  %v2300_v17 = vmul.f32 1.442695, %v2292_v37  ;;  %v2135_v58 = vmul.f32 1.442695, %v2127_v54 }
 0xc6f   :  { %2147 = vadd.xlane.f32.xlu1 %v2146_v56  ;;  %2309 = vadd.xlane.f32.xlu0 %v2308_v22  ;;  %v2311_v24 = vsel %vm386_vm7, %v4869_v27, 0.0 }
 0xc70   :  { %3543 = vpow2.f32 %v2300_v17 }
 0xc71   :  { %3545 = vpow2.f32 %v2135_v58 }
 0xc72   :  { %v2118_v20 = vpop.xlane.xlu1 %2117 }
 0xc73   :  { %v2283_v32 = vpop.xlane.xlu0 %2282  ;;  %v2128_v44 = vsub.f32 %v4785_v40, %v2118_v20 }
 0xc74   :  { %v2293_v28 = vsub.f32 %v4787_v7, %v2283_v32 }
 0xc75   :  { %v2137_v31 = vmul.f32 1.442695, %v2128_v44 }
 0xc76   :  { %v4884_v12 = vpop.eup %3543 }
 0xc77   :  { %2312 = vadd.xlane.f32.xlu1 %v2311_v24  ;;  %v4889_v18 = vpop.eup %3545 }
 0xc78   :  { %2343 = vrot.lane.b32.xlu2 %v4602_v46, %s3676_s25  ;;  %v2149_v47 = vsel %vm386_vm7, %v4889_v18, 0.0 }
 0xc80   :  { %2341 = vrot.lane.b32.xlu2 %v4606_v45, %s3676_s25 }
 0xc83   :  { %2176 = vrot.lane.b32.xlu0 %v4606_v45, %s3675_s24  ;;  %v2302_v45 = vmul.f32 1.442695, %v2293_v28 }
 0xc85   :  { %3547 = vpow2.f32 %v2302_v45 }
 0xc86   :  { %3549 = vpow2.f32 %v2137_v31 }
 0xc8b   :  { %v4893_v7 = vpop.eup %3547 }
 0xc8c   :  { %v2317_v40 = vsel %vm386_vm7, %v4893_v7, 0.0  ;;  %v4897_v21 = vpop.eup %3549 }
 0xc8d   :  { %v2152_v62 = vsel %vm386_vm7, %v4897_v21, 0.0 }
 0xc90   :  { %2178 = vrot.lane.b32.xlu1 %v4602_v46, %s3675_s24  ;;  %v2314_v46 = vsel %vm386_vm7, %v4884_v12, 0.0 }
 0xca9   :  { %2315 = vadd.xlane.f32.xlu2 %v2314_v46 }
 0xcaa   :  { %v1815_v19 = vpop.xlane.xlu2 %1814 }
 0xcab   :  { %3551 = vrcp.f32 %v1815_v19 }
 0xcad   :  { %2150 = vadd.xlane.f32.xlu0 %v2149_v47 }
 0xcb1   :  { %v3552_v15 = vpop.eup %3551 }
 0xcb2   :  { %v1818_v59 = vpop.xlane.xlu1 %1817  ;;  %v1980_v60 = vpop.xlane.xlu2 %1979  ;;  %v1837_v35 = vmul.f32 %v3552_v15, %v4797_v55 }
 0xcb3   :  { %3553 = vrcp.f32 %v1818_v59 }
 0xcb4   :  { %3555 = vrcp.f32 %v1980_v60 }
 0xcb5   :  { %2318 = vadd.xlane.f32.xlu0 %v2317_v40 }
 0xcb9   :  { %v3554_v51 = vpop.eup %3553 }
 0xcba   :  { %v1838_v33 = vmul.f32 %v3554_v51, %v4804_v14  ;;  %v1983_v50 = vpop.xlane.xlu1 %1982  ;;  %2153 = vadd.xlane.f32.xlu1 %v2152_v62  ;;  %v3556_v10 = vpop.eup %3555 }
 0xcbb   :  { %3557 = vrcp.f32 %v1983_v50  ;;  %v2002_v49 = vmul.f32 %v3556_v10, %v4802_v53  ;;  %v1986_v14 = vpop.xlane.xlu0 %1985 }
 0xcbc   :  { %v1843_v23 = vpack.c.bf16 %v1838_v33, %v1837_v35 }
 0xcbe   :  { %3117 = vmatmul.msk.bf16.vlgmr.msra.gmra.mxu2 %vm386_vm7, %v1843_v23 }
 0xcc1   :  { %v3558_v5 = vpop.eup %3557  ;;  %2222 = vrot.lane.b32.xlu2 %v4610_v41, %s3672_s10 }
 0xcc2   :  { %v2003_v48 = vmul.f32 %v3558_v5, %v4811_v36  ;;  %v1824_v63 = vpop.xlane.xlu2 %1823  ;;  %v1821_v4 = vpop.xlane.xlu1 %1820 }
 0xcc3   :  { %3559 = vrcp.f32 %v1824_v63 }
 0xcc4   :  { %v2008_v55 = vpack.c.bf16 %v2003_v48, %v2002_v49  ;;  %3561 = vrcp.f32 %v1821_v4 }
 0xcc5   :  { %3563 = vrcp.f32 %v1986_v14 }
 0xcc6   :  { %3123 = vmatmul.msk.bf16.vlgmr.msra.gmra.mxu3 %vm386_vm7, %v2008_v55 }
 0xcc9   :  { %v3560_v56 = vpop.eup %3559 }
 0xcca   :  { %v3562_v22 = vpop.eup %3561  ;;  %v1827_v24 = vpop.xlane.xlu2 %1826  ;;  %v1840_v9 = vmul.f32 %v3560_v56, %v4824_v52 }
 0xccb   :  { %v1989_v38 = vpop.xlane.xlu1 %1988  ;;  %v1839_v37 = vmul.f32 %v3562_v22, %v4821_v11  ;;  %v3564_v36 = vpop.eup %3563 }
 0xccc   :  { %3565 = vrcp.f32 %v1989_v38  ;;  %v2004_v58 = vmul.f32 %v3564_v36, %v4815_v57 }
 0xccd   :  { %v1844_v53 = vpack.c.bf16 %v1840_v9, %v1839_v37  ;;  %3567 = vrcp.f32 %v1827_v24 }
 0xccf   :  { %3118 = vmatmul.msk.bf16.gmra.mxu2 %vm386_vm7, %v1844_v53 }
 0xcd2   :  { %v3566_v17 = vpop.eup %3565  ;;  %v1830_v54 = vpop.xlane.xlu0 %1829 }
 0xcd3   :  { %v2005_v32 = vmul.f32 %v3566_v17, %v4831_v42  ;;  %v1995_v28 = vpop.xlane.xlu2 %1994  ;;  %2057 = vrot.lane.b32.xlu1 %v4610_v41, %s3669_s7  ;;  %v1992_v20 = vpop.xlane.xlu1 %1991  ;;  %3569 = vrcp.f32 %v1830_v54 }
 0xcd4   :  { %3571 = vrcp.f32 %v1992_v20  ;;  %v3568_v11 = vpop.eup %3567 }
 0xcd5   :  { %v2009_v52 = vpack.c.bf16 %v2005_v32, %v2004_v58  ;;  %3573 = vrcp.f32 %v1995_v28  ;;  %v1841_v46 = vmul.f32 %v3568_v11, %v4835_v30 }
 0xcd7   :  { %3124 = vmatmul.msk.bf16.gmra.mxu3 %vm386_vm7, %v2009_v52 }
 0xcd9   :  { %v3570_v45 = vpop.eup %3569 }
 0xcda   :  { %v1842_v57 = vmul.f32 %v3570_v45, %v4844_v3  ;;  %v2145_v31 = vpop.xlane.xlu0 %2144  ;;  %v3572_v42 = vpop.eup %3571 }
 0xcdb   :  { %v2344_v44 = vpop.permute.xlu2 %2343  ;;  %v3574_v19 = vpop.eup %3573  ;;  %v2006_v59 = vmul.f32 %v3572_v42, %v4841_v1 }
 0xcdc   :  { %2365 = vmatpush.bf16.msrb.mxu3 %v2344_v44  ;;  %v1845_v47 = vpack.c.bf16 %v1842_v57, %v1841_v46  ;;  %v2007_v41 = vmul.f32 %v3574_v19, %v4847_v0 }
 0xcde   :  { %v2010_v15 = vpack.c.bf16 %v2007_v41, %v2006_v59 }
 0xcdf   :  { %3119 = vmatmul.msk.bf16.gmra.mxu2 %vm386_vm7, %v1845_v47 }
 0xce2   :  { %v2148_v40 = vpop.xlane.xlu1 %2147  ;;  %v2310_v51 = vpop.xlane.xlu0 %2309 }
 0xce3   :  { %v2342_v60 = vpop.permute.xlu2 %2341  ;;  %3575 = vrcp.f32 %v2310_v51 }
 0xce4   :  { %2366 = vmatpush.bf16.msrb.mxu3 %v2342_v60 }
 0xce7   :  { %3125 = vmatmul.msk.bf16.gmra.mxu3 %vm386_vm7, %v2010_v15 }
 0xce9   :  { %v3576_v3 = vpop.eup %3575 }
 0xcea   :  { %v2313_v30 = vpop.xlane.xlu1 %2312  ;;  %v2332_v35 = vmul.f32 %v3576_v3, %v4861_v8 }
 0xceb   :  { %3577 = vrcp.f32 %v2313_v30 }
 0xcec   :  { %3579 = vrcp.f32 %v2148_v40 }
 0xced   :  { %3581 = vrcp.f32 %v2145_v31 }
 0xcf1   :  { %v3578_v62 = vpop.eup %3577 }
 0xcf2   :  { %v2333_v33 = vmul.f32 %v3578_v62, %v4869_v27  ;;  %v3580_v1 = vpop.eup %3579 }
 0xcf3   :  { %v3582_v23 = vpop.eup %3581  ;;  %v2168_v10 = vmul.f32 %v3580_v1, %v4863_v6 }
 0xcf4   :  { %v2338_v50 = vpack.c.bf16 %v2333_v33, %v2332_v35  ;;  %v2167_v5 = vmul.f32 %v3582_v23, %v4856_v29  ;;  %v3222_v23 = vld [vmem:[%s5166_s2 + $0xa8] sm:$0xff] }
 0xcf5   :  { %v2177_v49 = vpop.permute.xlu0 %2176  ;;  %2509 = vmatpush.bf16.msra.mxu0 %v3222_v23 }
 0xcf6   :  { %v2173_v48 = vpack.c.bf16 %v2168_v10, %v2167_v5  ;;  %v3221_v10 = vld [vmem:[%s5166_s2 + $0xa0] sm:$0xff] }
 0xcf7   :  { %3135 = vmatmul.msk.bf16.vlgmr.msrb.gmra.mxu3 %vm386_vm7, %v2338_v50 }
 0xcf9   :  { %2510 = vmatpush.bf16.msra.mxu0 %v3221_v10 }
 0xd02   :  { %v2179_v0 = vpop.permute.xlu1 %2178 }
 0xd03   :  { %2200 = vmatpush.bf16.msrb.mxu2 %v2179_v0 }
 0xd07   :  { %2201 = vmatpush.bf16.msrb.mxu2 %v2177_v49 }
 0xd0a   :  { %3129 = vmatmul.msk.bf16.vlgmr.msrb.gmra.mxu2 %vm386_vm7, %v2173_v48 }
 0xd1c   :  { %v2316_v8 = vpop.xlane.xlu2 %2315 }
 0xd1d   :  { %3583 = vrcp.f32 %v2316_v8 }
 0xd20   :  { %v2151_v27 = vpop.xlane.xlu0 %2150 }
 0xd23   :  { %v3584_v55 = vpop.eup %3583 }
 0xd24   :  { %v2223_v63 = vpop.permute.xlu2 %2222  ;;  %v2334_v29 = vmul.f32 %v3584_v55, %v4884_v12 }
 0xd25   :  { %3134 = vmatmul.msk.bf16.gmra.mxu1 %vm343_vm6, %v2223_v63 }
 0xd28   :  { %v2319_v4 = vpop.xlane.xlu0 %2318 }
 0xd29   :  { %3585 = vrcp.f32 %v2319_v4 }
 0xd2a   :  { %3587 = vrcp.f32 %v2151_v27 }
 0xd2d   :  { %v2154_v14 = vpop.xlane.xlu1 %2153 }
 0xd2e   :  { %3589 = vrcp.f32 %v2154_v14 }
 0xd2f   :  { %v3586_v6 = vpop.eup %3585 }
 0xd30   :  { %v2335_v56 = vmul.f32 %v3586_v6, %v4893_v7  ;;  %v3588_v22 = vpop.eup %3587 }
 0xd31   :  { %v2169_v9 = vmul.f32 %v3588_v22, %v4889_v18 }
 0xd32   :  { %v2339_v24 = vpack.c.bf16 %v2335_v56, %v2334_v29 }
 0xd34   :  { %v3590_v38 = vpop.eup %3589  ;;  %3136 = vmatmul.msk.bf16.gmra.mxu3 %vm386_vm7, %v2339_v24 }
 0xd35   :  { %v2170_v37 = vmul.f32 %v3590_v38, %v4897_v21 }
 0xd37   :  { %v2174_v53 = vpack.c.bf16 %v2170_v37, %v2169_v9 }
 0xd39   :  { %3130 = vmatmul.msk.bf16.gmra.mxu2 %vm386_vm7, %v2174_v53 }
 0xd41   :  { %v1873_v58 = vpop.f32.mrf.mxu2 }
 0xd45   :  { %v2058_v36 = vpop.permute.xlu1 %2057 }
 0xd46   :  { %3128 = vmatmul.msk.bf16.gmra.mxu0 %vm343_vm6, %v2058_v36 }
 0xd49   :  { %v2038_v17 = vpop.f32.mrf.mxu3  ;;  %v1875_v32 = vpop.f32.mrf.mxu2 }
 0xd51   :  { %v2040_v54 = vpop.f32.mrf.mxu3 }
 0xd52   :  { %v3301_v12 = vpack.i.bf16 %v2040_v54, %v2038_v17  ;;  %v4939_v18 = vpop.f32.mrf.mxu2 }
 0xd54   :  { %3302 = vrot.lane.b32.xlu0 %v3301_v12, %s3677_s26 }
 0xd5a   :  { %v2043_v7 = vpop.f32.mrf.mxu3  ;;  %v4943_v52 = vpop.f32.mrf.mxu2 }
 0xd62   :  { %v2045_v28 = vpop.f32.mrf.mxu3  ;;  %v4949_v46 = vpop.f32.mrf.mxu2 }
 0xd63   :  { %v3316_v20 = vpack.i.bf16 %v2045_v28, %v2043_v7 }
 0xd65   :  { %3317 = vrot.lane.b32.xlu0 %v3316_v20, %s3677_s26 }
 0xd6a   :  { %v4941_v21 = vpop.f32.mrf.mxu3  ;;  %v4951_v42 = vpop.f32.mrf.mxu2 }
 0xd72   :  { %v4945_v11 = vpop.f32.mrf.mxu3 }
 0xd73   :  { %v3331_v45 = vpack.i.bf16 %v4945_v11, %v4941_v21 }
 0xd7a   :  { %v2368_v44 = vpop.f32.mrf.mxu3 }
 0xd82   :  { %v2370_v57 = vpop.f32.mrf.mxu3 }
 0xd83   :  { %v3311_v31 = vpack.i.bf16 %v2370_v57, %v2368_v44 }
 0xd85   :  { %3312 = vrot.lane.b32.xlu1 %v3311_v31, %s3679_s28 }
 0xd8d   :  { %v2203_v19 = vpop.f32.mrf.mxu2 }
 0xd95   :  { %v2205_v47 = vpop.f32.mrf.mxu2 }
 0xd96   :  { %v3306_v41 = vpack.i.bf16 %v2205_v47, %v2203_v19 }
 0xd98   :  { %3307 = vrot.lane.b32.xlu2 %v3306_v41, %s3678_s27 }
 0xda2   :  { %v2267_v60 = vpop.f32.mrf.mxu1 }
 0xda3   :  { %v2268_v5 = vadd.f32 %v4734_v13, %v2267_v60 }
 0xda5   :  { %v2284_v8 = vsel %vm386_vm7, %v2268_v5, -inf }
 0xdaa   :  { %v2269_v50 = vpop.f32.mrf.mxu1 }
 0xdab   :  { %v2270_v1 = vadd.f32 %v4749_v26, %v2269_v50 }
 0xdad   :  { %v2287_v0 = vsel %vm386_vm7, %v2270_v1, -inf }
 0xdb7   :  { %v2373_v59 = vpop.f32.mrf.mxu3 }
 0xdbc   :  { %v2208_v40 = vpop.f32.mrf.mxu2 }
 0xdbf   :  { %v2375_v15 = vpop.f32.mrf.mxu3 }
 0xdc0   :  { %v3326_v51 = vpack.i.bf16 %v2375_v15, %v2373_v59 }
 0xdc2   :  { %3327 = vrot.lane.b32.xlu1 %v3326_v51, %s3679_s28 }
 0xdc3   :  { %v2102_v30 = vpop.f32.mrf.mxu0 }
 0xdc4   :  { %v2103_v3 = vadd.f32 %v4734_v13, %v2102_v30  ;;  %v2210_v62 = vpop.f32.mrf.mxu2 }
 0xdc5   :  { %v3321_v35 = vpack.i.bf16 %v2210_v62, %v2208_v40 }
 0xdc6   :  { %v2119_v33 = vsel %vm386_vm7, %v2103_v3, -inf  ;;  %v3303_v63 = vpop.permute.xlu0 %3302 }
 0xdc7   :  { %2120 = vmax.xlane.f32.xlu0 %v2119_v33  ;;  %3322 = vrot.lane.b32.xlu2 %v3321_v35, %s3678_s27  ;;  %v3305_v55 = vunpack.i.h.bf16 %v3303_v63  ;;  %v3304_v14 = vunpack.i.l.bf16 %v3303_v63 }
 0xdc9   :  { %v2456_v22 = vsel %vm343_vm6, %v1875_v32, %v3305_v55  ;;  %v2455_v13 = vsel %vm343_vm6, %v1873_v58, %v3304_v14  ;;  %v4994_v55 = vld [vmem:[%s5167_s3 + $0x3d] ss:$0 sm:$0xff] }
 0xdcb   :  { %v2104_v49 = vpop.f32.mrf.mxu0 }
 0xdcc   :  { %v2105_v48 = vadd.f32 %v4749_v26, %v2104_v49 }
 0xdce   :  { %v2122_v27 = vsel %vm386_vm7, %v2105_v48, -inf }
 0xdcf   :  { %2288 = vmax.xlane.f32.xlu0 %v2287_v0 }
 0xdd7   :  { %v3318_v17 = vpop.permute.xlu0 %3317 }
 0xdd8   :  { %v3320_v12 = vunpack.i.h.bf16 %v3318_v17  ;;  %v3319_v7 = vunpack.i.l.bf16 %v3318_v17 }
 0xdda   :  { %v2458_v20 = vsel %vm343_vm6, %v4943_v52, %v3320_v12  ;;  %v2457_v44 = vsel %vm343_vm6, %v4939_v18, %v3319_v7 }
 0xdec   :  { %2285 = vmax.xlane.f32.xlu1 %v2284_v8 }
 0xdf0   :  { %2123 = vmax.xlane.f32.xlu2 %v2122_v27 }
 0xdf2   :  { %v3308_v4 = vpop.permute.xlu2 %3307 }
 0xdf3   :  { %v3310_v6 = vunpack.i.h.bf16 %v3308_v4  ;;  %v3309_v29 = vunpack.i.l.bf16 %v3308_v4 }
 0xdf5   :  { %v2461_v26 = vsel %vm1071_vm8, %v2455_v13, %v3309_v29  ;;  %v2462_v9 = vsel %vm1071_vm8, %v2456_v22, %v3310_v6 }
 0xdf7   :  { %v3313_v56 = vpop.permute.xlu1 %3312 }
 0xdf8   :  { %v3315_v24 = vunpack.i.h.bf16 %v3313_v56  ;;  %v3314_v38 = vunpack.i.l.bf16 %v3313_v56 }
 0xdfa   :  { %v2467_v37 = vsel %vm1078_vm9, %v2461_v26, %v3314_v38  ;;  %v2468_v53 = vsel %vm1078_vm9, %v2462_v9, %v3315_v24 }
 0xdfb   :  { %v2473_v36 = vpack.c.bf16 %v2468_v53, %v2467_v37 }
 0xdfd   :  { %3146 = vmatmul.msk.bf16.vlgmr.msra.gmra.mxu0 %vm108_vm1, %v2473_v36 }
 0xe21   :  { %v3323_v54 = vpop.permute.xlu2 %3322 }
 0xe22   :  { %v3325_v32 = vunpack.i.h.bf16 %v3323_v54  ;;  %v3324_v28 = vunpack.i.l.bf16 %v3323_v54 }
 0xe24   :  { %v2463_v19 = vsel %vm1071_vm8, %v2457_v44, %v3324_v28  ;;  %v2464_v47 = vsel %vm1071_vm8, %v2458_v20, %v3325_v32 }
 0xe34   :  { %v3328_v58 = vpop.permute.xlu1 %3327 }
 0xe35   :  { %v3330_v57 = vunpack.i.h.bf16 %v3328_v58  ;;  %v3329_v31 = vunpack.i.l.bf16 %v3328_v58 }
 0xe37   :  { %v2469_v41 = vsel %vm1078_vm9, %v2463_v19, %v3329_v31  ;;  %v2470_v59 = vsel %vm1078_vm9, %v2464_v47, %v3330_v57 }
 0xe38   :  { %v2474_v40 = vpack.c.bf16 %v2470_v59, %v2469_v41 }
 0xe3a   :  { %v2121_v60 = vpop.xlane.xlu0 %2120  ;;  %3147 = vmatmul.msk.bf16.gmra.mxu0 %vm108_vm1, %v2474_v40 }
 0xe3b   :  { %v2129_v15 = vsub.f32 %v2103_v3, %v2121_v60 }
 0xe3d   :  { %v2139_v51 = vmul.f32 1.442695, %v2129_v15 }
 0xe3f   :  { %3591 = vpow2.f32 %v2139_v51 }
 0xe42   :  { %v2289_v52 = vpop.xlane.xlu0 %2288 }
 0xe43   :  { %v2295_v30 = vsub.f32 %v2270_v1, %v2289_v52 }
 0xe45   :  { %v3592_v18 = vpop.eup %3591  ;;  %v2306_v62 = vmul.f32 1.442695, %v2295_v30 }
 0xe46   :  { %v2155_v35 = vsel %vm386_vm7, %v3592_v18, 0.0 }
 0xe47   :  { %3593 = vpow2.f32 %v2306_v62  ;;  %2156 = vadd.xlane.f32.xlu2 %v2155_v35 }
 0xe4d   :  { %v3594_v33 = vpop.eup %3593 }
 0xe4e   :  { %v2323_v50 = vsel %vm386_vm7, %v3594_v33, 0.0 }
 0xe4f   :  { %2324 = vadd.xlane.f32.xlu2 %v2323_v50 }
 0xe5f   :  { %v2286_v0 = vpop.xlane.xlu1 %2285 }
 0xe60   :  { %v2294_v23 = vsub.f32 %v2268_v5, %v2286_v0 }
 0xe62   :  { %v2304_v10 = vmul.f32 1.442695, %v2294_v23 }
 0xe63   :  { %v2124_v49 = vpop.xlane.xlu2 %2123 }
 0xe64   :  { %3595 = vpow2.f32 %v2304_v10  ;;  %v2130_v3 = vsub.f32 %v2105_v48, %v2124_v49 }
 0xe66   :  { %v2141_v8 = vmul.f32 1.442695, %v2130_v3 }
 0xe68   :  { %3597 = vpow2.f32 %v2141_v8 }
 0xe6a   :  { %v3596_v27 = vpop.eup %3595 }
 0xe6b   :  { %v2320_v1 = vsel %vm386_vm7, %v3596_v27, 0.0 }
 0xe6c   :  { %2321 = vadd.xlane.f32.xlu0 %v2320_v1  ;;  %v3223_v1 = vld [vmem:[%s5166_s2 + $0xb0] sm:$0xff] }
 0xe6e   :  { %v3598_v63 = vpop.eup %3597 }
 0xe6f   :  { %v2158_v4 = vsel %vm386_vm7, %v3598_v63, 0.0 }
 0xe70   :  { %2159 = vadd.xlane.f32.xlu1 %v2158_v4 }
 0xe7a   :  { %v2512_v5 = vpop.f32.mrf.mxu0 }
 0xe7b   :  { %v2513_v14 = vadd.f32 %v4994_v55, %v2512_v5 }
 0xe7d   :  { %v4998_v48 = vadd.f32 %v2513_v14, %v4485_v34 }
 0xe7f   :  { %v2535_v6 = vsel %vm108_vm1, %v4998_v48, 0.0 }
 0xe80   :  { %2536 = vadd.xlane.f32.xlu1 %v2535_v6 }
 0xe82   :  { %v2514_v29 = vpop.f32.mrf.mxu0 }
 0xe83   :  { %v2515_v56 = vadd.f32 %v4994_v55, %v2514_v29 }
 0xe85   :  { %v2528_v22 = vadd.f32 %v2515_v56, %v4490_v2 }
 0xe87   :  { %v2538_v13 = vsel %vm108_vm1, %v2528_v22, 0.0 }
 0xe88   :  { %2539 = vadd.xlane.f32.xlu0 %v2538_v13 }
 0xeb7   :  { %v2517_v24 = vpop.f32.mrf.mxu0 }
 0xeb8   :  { %v2518_v38 = vadd.f32 %v4994_v55, %v2517_v24 }
 0xeba   :  { %v2529_v26 = vadd.f32 %v2518_v38, %v4495_v39  ;;  %v2157_v36 = vpop.xlane.xlu2 %2156 }
 0xebc   :  { %v2541_v34 = vsel %vm108_vm1, %v2529_v26, 0.0 }
 0xebd   :  { %2542 = vadd.xlane.f32.xlu2 %v2541_v34 }
 0xebf   :  { %v2519_v9 = vpop.f32.mrf.mxu0 }
 0xec0   :  { %v2520_v37 = vadd.f32 %v4994_v55, %v2519_v9 }
 0xec2   :  { %v5010_v53 = vadd.f32 %v2520_v37, %v4500_v61  ;;  %v2325_v17 = vpop.xlane.xlu2 %2324 }
 0xec3   :  { %3599 = vrcp.f32 %v2325_v17 }
 0xec4   :  { %v2544_v2 = vsel %vm108_vm1, %v5010_v53, 0.0 }
 0xec5   :  { %2545 = vadd.xlane.f32.xlu1 %v2544_v2 }
 0xec9   :  { %v3600_v12 = vpop.eup %3599 }
 0xeca   :  { %v2337_v32 = vmul.f32 %v3600_v12, %v3594_v33  ;;  %v5051_v12 = vld [vmem:[%s5167_s3 + $0x3a] ss:$0 sm:$0xff] }
 0xedf   :  { %v2322_v54 = vpop.xlane.xlu0 %2321 }
 0xee0   :  { %3601 = vrcp.f32 %v2322_v54 }
 0xee1   :  { %3603 = vrcp.f32 %v2157_v36 }
 0xee3   :  { %v2160_v39 = vpop.xlane.xlu1 %2159 }
 0xee4   :  { %3605 = vrcp.f32 %v2160_v39 }
 0xee6   :  { %v3602_v7 = vpop.eup %3601 }
 0xee7   :  { %v2336_v28 = vmul.f32 %v3602_v7, %v3596_v27  ;;  %v3604_v58 = vpop.eup %3603 }
 0xee8   :  { %v2171_v44 = vmul.f32 %v3604_v58, %v3592_v18  ;;  %v5056_v58 = vld [vmem:[%s5167_s3 + $0x3b] ss:$0 sm:$0xff] }
 0xee9   :  { %v2340_v20 = vpack.c.bf16 %v2337_v32, %v2336_v28 }
 0xeea   :  { %v3606_v61 = vpop.eup %3605 }
 0xeeb   :  { %v2172_v57 = vmul.f32 %v3606_v61, %v3598_v63  ;;  %3137 = vmatmul.msk.bf16.gmra.mxu3 %vm386_vm7, %v2340_v20 }
 0xeed   :  { %v2175_v31 = vpack.c.bf16 %v2172_v57, %v2171_v44 }
 0xeef   :  { %3131 = vmatmul.msk.bf16.gmra.mxu2 %vm386_vm7, %v2175_v31 }
 0xef3   :  { %v2537_v19 = vpop.xlane.xlu1 %2536 }
 0xef4   :  { %v2553_v47 = vmul.f32 %v2537_v19, %v3778_v43 }
 0xef6   :  { %v2559_v41 = vsub.f32 %v4998_v48, %v2553_v47 }
 0xef8   :  { %v2565_v59 = vmul.f32 %v2559_v41, %v2559_v41 }
 0xefa   :  { %v2571_v40 = vsel %vm108_vm1, %v2565_v59, 0.0 }
 0xefb   :  { %v2540_v60 = vpop.xlane.xlu0 %2539  ;;  %2572 = vadd.xlane.f32.xlu0 %v2571_v40 }
 0xefc   :  { %v2554_v15 = vmul.f32 %v2540_v60, %v3778_v43 }
 0xefe   :  { %v2560_v51 = vsub.f32 %v2528_v22, %v2554_v15 }
 0xf00   :  { %v2566_v52 = vmul.f32 %v2560_v51, %v2560_v51 }
 0xf02   :  { %v2574_v30 = vsel %vm108_vm1, %v2566_v52, 0.0 }
 0xf03   :  { %2575 = vadd.xlane.f32.xlu2 %v2574_v30 }
 0xf1b   :  { %3332 = vrot.lane.b32.xlu2 %v3331_v45, %s3677_s26  ;;  %v3224_v45 = vld [vmem:[%s5166_s2 + $0xb8] sm:$0xff] }
 0xf1c   :  { %2717 = vmatpush.bf16.msra.mxu2 %v3224_v45 }
 0xf20   :  { %2718 = vmatpush.bf16.msra.mxu2 %v3223_v1 }
 0xf30   :  { %v2543_v18 = vpop.xlane.xlu2 %2542 }
 0xf31   :  { %v2555_v62 = vmul.f32 %v2543_v18, %v3778_v43 }
 0xf33   :  { %v5026_v35 = vsub.f32 %v2529_v26, %v2555_v62 }
 0xf35   :  { %v2567_v33 = vmul.f32 %v5026_v35, %v5026_v35 }
 0xf37   :  { %v2577_v50 = vsel %vm108_vm1, %v2567_v33, 0.0 }
 0xf38   :  { %2578 = vadd.xlane.f32.xlu1 %v2577_v50  ;;  %v2546_v0 = vpop.xlane.xlu1 %2545 }
 0xf39   :  { %v2556_v23 = vmul.f32 %v2546_v0, %v3778_v43 }
 0xf3b   :  { %v5033_v10 = vsub.f32 %v5010_v53, %v2556_v23 }
 0xf3d   :  { %v2568_v21 = vmul.f32 %v5033_v10, %v5033_v10 }
 0xf3f   :  { %v2580_v11 = vsel %vm108_vm1, %v2568_v21, 0.0 }
 0xf40   :  { %2581 = vadd.xlane.f32.xlu0 %v2580_v11 }
 0xf6e   :  { %v2573_v49 = vpop.xlane.xlu0 %2572  ;;  %v2378_v3 = vpop.f32.mrf.mxu3 }
 0xf6f   :  { %v2589_v8 = vmul.f32 %v2573_v49, %v3778_v43 }
 0xf71   :  { %v2595_v27 = vadd.f32 1e-06, %v2589_v8 }
 0xf72   :  { %v2213_v63 = vpop.f32.mrf.mxu2 }
 0xf73   :  { %3607 = vrsqrt.f32 %v2595_v27  ;;  %vm2607_vm13 = vweird.f32 %v2595_v27 }
 0xf76   :  { %v2576_v4 = vpop.xlane.xlu2 %2575  ;;  %v2380_v5 = vpop.f32.mrf.mxu3 }
 0xf77   :  { %v2590_v14 = vmul.f32 %v2576_v4, %v3778_v43  ;;  %v3341_v6 = vpack.i.bf16 %v2380_v5, %v2378_v3 }
 0xf79   :  { %v3608_v29 = vpop.eup %3607  ;;  %v2596_v56 = vadd.f32 1e-06, %v2590_v14  ;;  %3342 = vrot.lane.b32.xlu0 %v3341_v6, %s3679_s28 }
 0xf7a   :  { %v2602_v22 = vmul.f32 %v3608_v29, %v2595_v27  ;;  %v2215_v13 = vpop.f32.mrf.mxu2  ;;  %vm2608_vm7 = vweird.f32 %v3608_v29 }
 0xf7b   :  { %3609 = vrsqrt.f32 %v2596_v56  ;;  %v3336_v24 = vpack.i.bf16 %v2215_v13, %v2213_v63  ;;  %vm2609_vm14 = vmor %vm2607_vm13, %vm2608_vm7  ;;  %vm2617_vm0 = vweird.f32 %v2596_v56 }
 0xf7c   :  { %v2603_v38 = vmul.f32 %v3608_v29, %v2602_v22 }
 0xf7d   :  { %3337 = vrot.lane.b32.xlu1 %v3336_v24, %s3678_s27 }
 0xf7e   :  { %v2604_v26 = vmul.f32 0.5, %v2603_v38  ;;  %v3333_v6 = vpop.permute.xlu2 %3332 }
 0xf80   :  { %v2605_v34 = vsub.f32 1.5, %v2604_v26 }
 0xf81   :  { %v3610_v9 = vpop.eup %3609 }
 0xf82   :  { %v2606_v37 = vmul.f32 %v3608_v29, %v2605_v34  ;;  %v2612_v2 = vmul.f32 %v3610_v9, %v2596_v56  ;;  %vm2618_vm15 = vweird.f32 %v3610_v9 }
 0xf83   :  { %vm2619_vm2 = vmor %vm2617_vm0, %vm2618_vm15 }
 0xf84   :  { %v2613_v36 = vmul.f32 %v3610_v9, %v2612_v2  ;;  %v2610_v17 = vsel %vm2609_vm14, %v3608_v29, %v2606_v37  ;;  %v3335_v29 = vunpack.i.h.bf16 %v3333_v6 }
 0xf85   :  { %v2661_v7 = vmul.f32 %v2610_v17, %v2559_v41 }
 0xf86   :  { %v2614_v54 = vmul.f32 0.5, %v2613_v36 }
 0xf87   :  { %v2668_v20 = vmul.f32 %v5051_v12, %v2661_v7  ;;  %v3228_v7 = vld [vmem:[%s5166_s2 + $0xd8] sm:$0xff] }
 0xf88   :  { %v2615_v39 = vsub.f32 1.5, %v2614_v54  ;;  %v3230_v54 = vld [vmem:[%s5166_s2 + $0xe8] sm:$0xff] }
 0xf89   :  { %v2675_v57 = vadd.f32 %v5056_v58, %v2668_v20  ;;  %v5105_v20 = vld [vmem:[%s5167_s3 + $0x3e] ss:$0 sm:$0xff] }
 0xf8a   :  { %v2616_v32 = vmul.f32 %v3610_v9, %v2615_v39  ;;  %v3229_v39 = vld [vmem:[%s5166_s2 + $0xe0] sm:$0xff] }
 0xf8c   :  { %v2620_v28 = vsel %vm2619_vm2, %v3610_v9, %v2616_v32  ;;  %v3227_v32 = vld [vmem:[%s5166_s2 + $0xd0] sm:$0xff] }
 0xf8d   :  { %v2662_v61 = vmul.f32 %v2620_v28, %v2560_v51  ;;  %v3226_v28 = vld [vmem:[%s5166_s2 + $0xc8] sm:$0xff] }
 0xf8f   :  { %v2669_v44 = vmul.f32 %v5051_v12, %v2662_v61 }
 0xf91   :  { %v2676_v31 = vadd.f32 %v5056_v58, %v2669_v44  ;;  %v3225_v44 = vld [vmem:[%s5166_s2 + $0xc0] sm:$0xff] }
 0xf93   :  { %v2681_v19 = vpack.c.bf16 %v2676_v31, %v2675_v57 }
 0xf95   :  { %3157 = vmatmul.msk.bf16.vlgmr.msra.gmra.mxu2 %vm108_vm1, %v2681_v19 }
 0xfab   :  { %v2579_v47 = vpop.xlane.xlu1 %2578 }
 0xfac   :  { %v2591_v41 = vmul.f32 %v2579_v47, %v3778_v43 }
 0xfae   :  { %v2597_v59 = vadd.f32 1e-06, %v2591_v41 }
 0xfb0   :  { %3611 = vrsqrt.f32 %v2597_v59  ;;  %vm2627_vm4 = vweird.f32 %v2597_v59 }
 0xfb3   :  { %v2582_v40 = vpop.xlane.xlu0 %2581 }
 0xfb4   :  { %v2592_v60 = vmul.f32 %v2582_v40, %v3778_v43 }
 0xfb6   :  { %v3612_v15 = vpop.eup %3611  ;;  %v2598_v52 = vadd.f32 1e-06, %v2592_v60 }
 0xfb7   :  { %v2622_v51 = vmul.f32 %v3612_v15, %v2597_v59  ;;  %vm2628_vm3 = vweird.f32 %v3612_v15 }
 0xfb8   :  { %3613 = vrsqrt.f32 %v2598_v52  ;;  %vm2629_vm5 = vmor %vm2627_vm4, %vm2628_vm3  ;;  %vm2637_vm11 = vweird.f32 %v2598_v52 }
 0xfb9   :  { %v2623_v30 = vmul.f32 %v3612_v15, %v2622_v51 }
 0xfbb   :  { %v2624_v18 = vmul.f32 0.5, %v2623_v30 }
 0xfbd   :  { %v2625_v62 = vsub.f32 1.5, %v2624_v18 }
 0xfbe   :  { %v3614_v33 = vpop.eup %3613 }
 0xfbf   :  { %v2626_v50 = vmul.f32 %v3612_v15, %v2625_v62  ;;  %v2632_v0 = vmul.f32 %v3614_v33, %v2598_v52  ;;  %vm2638_vm10 = vweird.f32 %v3614_v33 }
 0xfc0   :  { %vm2639_vm12 = vmor %vm2637_vm11, %vm2638_vm10 }
 0xfc1   :  { %v2633_v23 = vmul.f32 %v3614_v33, %v2632_v0  ;;  %v2630_v21 = vsel %vm2629_vm5, %v3612_v15, %v2626_v50 }
 0xfc2   :  { %v2663_v49 = vmul.f32 %v2630_v21, %v5026_v35  ;;  %v3334_v35 = vunpack.i.l.bf16 %v3333_v6 }
 0xfc3   :  { %v2634_v11 = vmul.f32 0.5, %v2633_v23 }
 0xfc4   :  { %v2670_v1 = vmul.f32 %v5051_v12, %v2663_v49  ;;  %v2459_v38 = vsel %vm343_vm6, %v4949_v46, %v3334_v35  ;;  %v3231_v46 = vld [vmem:[%s5166_s2 + $0xf0] sm:$0xff] }
 0xfc5   :  { %v2635_v45 = vsub.f32 1.5, %v2634_v11 }
 0xfc6   :  { %v2677_v4 = vadd.f32 %v5056_v58, %v2670_v1 }
 0xfc7   :  { %v2636_v3 = vmul.f32 %v3614_v33, %v2635_v45 }
 0xfc9   :  { %v2640_v8 = vsel %vm2639_vm12, %v3614_v33, %v2636_v3 }
 0xfca   :  { %v2664_v27 = vmul.f32 %v2640_v8, %v5033_v10  ;;  %v2460_v10 = vsel %vm343_vm6, %v4951_v42, %v3335_v29  ;;  %v3232_v42 = vld [vmem:[%s5166_s2 + $0xf8] sm:$0xff]  ;;  %vm2887_vm6 = vcmask 1041409  }
 0xfcb   :  { %2856 = vmatpush.bf16.msra.mxu1 %v3232_v42 }
 0xfcc   :  { %v2671_v63 = vmul.f32 %v5051_v12, %v2664_v27 }
 0xfce   :  { %v2678_v5 = vadd.f32 %v5056_v58, %v2671_v63 }
 0xfcf   :  { %2857 = vmatpush.bf16.msra.mxu1 %v3231_v46 }
 0xfd0   :  { %v2682_v14 = vpack.c.bf16 %v2678_v5, %v2677_v4 }
 0xfd2   :  { %3158 = vmatmul.msk.bf16.gmra.mxu2 %vm108_vm1, %v2682_v14 }
 0xfd3   :  { %2858 = vmatpush.bf16.msra.mxu1 %v3230_v54 }
 0xfd7   :  { %2859 = vmatpush.bf16.msra.mxu1 %v3229_v39 }
 0xfdb   :  { %2860 = vmatpush.bf16.msra.mxu1 %v3228_v7 }
 0xfdf   :  { %2861 = vmatpush.bf16.msra.mxu1 %v3227_v32 }
 0xfe3   :  { %2862 = vmatpush.bf16.msra.mxu1 %v3226_v28 }
 0xfe7   :  { %2863 = vmatpush.bf16.msra.mxu1 %v3225_v44 }
 0xfeb   :  { %v3343_v56 = vpop.permute.xlu0 %3342 }
 0xfec   :  { %v3345_v26 = vunpack.i.h.bf16 %v3343_v56  ;;  %v3344_v34 = vunpack.i.l.bf16 %v3343_v56 }
 0xfef   :  { %v3338_v22 = vpop.permute.xlu1 %3337 }
 0xff0   :  { %v3340_v13 = vunpack.i.h.bf16 %v3338_v22  ;;  %v3339_v24 = vunpack.i.l.bf16 %v3338_v22 }
 0xff2   :  { %v2466_v9 = vsel %vm1071_vm8, %v2460_v10, %v3340_v13  ;;  %v2465_v37 = vsel %vm1071_vm8, %v2459_v38, %v3339_v24  ;;  %vm2890_vm8 = vcmask 254976  }
 0xff3   :  { %v2471_v2 = vsel %vm1078_vm9, %v2465_v37, %v3344_v34  ;;  %v2472_v36 = vsel %vm1078_vm9, %v2466_v9, %v3345_v26 }
 0xff4   :  { %v2475_v17 = vpack.c.bf16 %v2472_v36, %v2471_v2 }
 0xff6   :  { %3148 = vmatmul.msk.bf16.gmra.mxu0 %vm108_vm1, %v2475_v17 }
0x1018   :  { %v2720_v61 = vpop.f32.mrf.mxu2 }
0x1019   :  { %v2721_v57 = vadd.f32 %v5105_v20, %v2720_v61 }
0x101b   :  { %v2735_v31 = vmul.f32 %v2721_v57, %v2721_v57 }
0x101d   :  { %v2741_v19 = vmul.f32 %v2735_v31, %v2721_v57 }
0x101f   :  { %v2747_v47 = vmul.f32 0.044715, %v2741_v19 }
0x1020   :  { %v2722_v41 = vpop.f32.mrf.mxu2 }
0x1021   :  { %v2753_v59 = vadd.f32 %v2747_v47, %v2721_v57  ;;  %v2723_v40 = vadd.f32 %v5105_v20, %v2722_v41 }
0x1023   :  { %v2759_v60 = vmul.f32 0.7978846, %v2753_v59  ;;  %v2736_v15 = vmul.f32 %v2723_v40, %v2723_v40 }
0x1025   :  { %v2742_v52 = vmul.f32 %v2736_v15, %v2723_v40  ;;  %3615 = vtanh.f32 %v2759_v60 }
0x1027   :  { %v2748_v51 = vmul.f32 0.044715, %v2742_v52 }
0x1029   :  { %v2754_v30 = vadd.f32 %v2748_v51, %v2723_v40  ;;  %v3361_v51 = vld [vmem:[%s5167_s3 + $0x3f] ss:$0 sm:$0xff] }
0x102b   :  { %v2760_v18 = vmul.f32 0.7978846, %v2754_v30  ;;  %v3616_v62 = vpop.eup %3615 }
0x102c   :  { %v2771_v33 = vadd.f32 1.0, %v3616_v62 }
0x102d   :  { %3617 = vtanh.f32 %v2760_v18 }
0x102e   :  { %v2777_v0 = vmul.f32 0.5, %v2771_v33 }
0x1030   :  { %v2783_v11 = vmul.f32 %v2777_v0, %v2721_v57 }
0x1033   :  { %v3618_v50 = vpop.eup %3617 }
0x1034   :  { %v2772_v23 = vadd.f32 1.0, %v3618_v50 }
0x1036   :  { %v2778_v21 = vmul.f32 0.5, %v2772_v23 }
0x1038   :  { %v2784_v45 = vmul.f32 %v2778_v21, %v2723_v40 }
0x103a   :  { %v2789_v49 = vpack.c.bf16 %v2784_v45, %v2783_v11 }
0x103c   :  { %2864 = vmatmul.bf16.vlgmr.msra.gmra.mxu1 %v2789_v49 }
0x1055   :  { %v2725_v3 = vpop.f32.mrf.mxu2 }
0x1056   :  { %v2726_v8 = vadd.f32 %v5105_v20, %v2725_v3 }
0x1058   :  { %v2737_v27 = vmul.f32 %v2726_v8, %v2726_v8 }
0x105a   :  { %v2743_v1 = vmul.f32 %v2737_v27, %v2726_v8 }
0x105c   :  { %v2749_v63 = vmul.f32 0.044715, %v2743_v1 }
0x105d   :  { %v2727_v4 = vpop.f32.mrf.mxu2 }
0x105e   :  { %v2755_v5 = vadd.f32 %v2749_v63, %v2726_v8  ;;  %v2728_v14 = vadd.f32 %v5105_v20, %v2727_v4 }
0x1060   :  { %v2761_v6 = vmul.f32 0.7978846, %v2755_v5  ;;  %v2738_v29 = vmul.f32 %v2728_v14, %v2728_v14 }
0x1062   :  { %v2744_v35 = vmul.f32 %v2738_v29, %v2728_v14  ;;  %3619 = vtanh.f32 %v2761_v6 }
0x1064   :  { %v2750_v56 = vmul.f32 0.044715, %v2744_v35 }
0x1066   :  { %v2756_v22 = vadd.f32 %v2750_v56, %v2728_v14 }
0x1068   :  { %v2762_v13 = vmul.f32 0.7978846, %v2756_v22  ;;  %v3620_v24 = vpop.eup %3619 }
0x1069   :  { %v2773_v10 = vadd.f32 1.0, %v3620_v24 }
0x106a   :  { %3621 = vtanh.f32 %v2762_v13 }
0x106b   :  { %v2779_v34 = vmul.f32 0.5, %v2773_v10 }
0x106d   :  { %v2785_v36 = vmul.f32 %v2779_v34, %v2726_v8 }
0x1070   :  { %v3622_v38 = vpop.eup %3621 }
0x1071   :  { %v2774_v26 = vadd.f32 1.0, %v3622_v38 }
0x1073   :  { %v2522_v9 = vpop.f32.mrf.mxu0  ;;  %v2780_v37 = vmul.f32 0.5, %v2774_v26 }
0x1074   :  { %v2523_v2 = vadd.f32 %v4994_v55, %v2522_v9 }
0x1075   :  { %v2786_v17 = vmul.f32 %v2780_v37, %v2728_v14 }
0x1076   :  { %v2531_v42 = vadd.f32 %v2523_v2, %v4505_v16 }
0x1077   :  { %v2790_v46 = vpack.c.bf16 %v2786_v17, %v2785_v36 }
0x1078   :  { %v2547_v54 = vsel %vm108_vm1, %v2531_v42, 0.0 }
0x1079   :  { %2868 = vmatmul.bf16.gmra.mxu1 %v2790_v46  ;;  %2548 = vadd.xlane.f32.xlu2 %v2547_v54 }
0x107b   :  { %v2524_v39 = vpop.f32.mrf.mxu0 }
0x107c   :  { %v2525_v7 = vadd.f32 %v4994_v55, %v2524_v39 }
0x107e   :  { %v2532_v32 = vadd.f32 %v2525_v7, %v4510_v25 }
0x1080   :  { %v2550_v28 = vsel %vm108_vm1, %v2532_v32, 0.0 }
0x1081   :  { %2551 = vadd.xlane.f32.xlu0 %v2550_v28 }
0x10b9   :  { %v2865_v61 = vpop.f32.mrf.mxu1 }
0x10ba   :  { %v2876_v52 = vadd.f32 %v2865_v61, %v4998_v48 }
0x10bc   :  { %v2880_v62 = vadd.f32 %v3361_v51, %v2876_v52 }
0x10c1   :  { %v2867_v44 = vpop.f32.mrf.mxu1 }
0x10c2   :  { %v3234_v44 = vld [vmem:[%s5166_s2 + $0x108] sm:$0xff] }
0x10c3   :  { %2971 = vmatpush.bf16.msra.mxu3 %v3234_v44 }
0x10ec   :  { %v2549_v57 = vpop.xlane.xlu2 %2548 }
0x10ed   :  { %v2557_v31 = vmul.f32 %v2549_v57, %v3778_v43 }
0x10ef   :  { %v2563_v19 = vsub.f32 %v2531_v42, %v2557_v31 }
0x10f1   :  { %v2569_v16 = vmul.f32 %v2563_v19, %v2563_v19 }
0x10f3   :  { %v2583_v47 = vsel %vm108_vm1, %v2569_v16, 0.0 }
0x10f4   :  { %v2552_v41 = vpop.xlane.xlu0 %2551  ;;  %2584 = vadd.xlane.f32.xlu1 %v2583_v47 }
0x10f5   :  { %v2558_v59 = vmul.f32 %v2552_v41, %v3778_v43 }
0x10f6   :  { %v2869_v40 = vpop.f32.mrf.mxu1 }
0x10f7   :  { %v2564_v55 = vsub.f32 %v2532_v32, %v2558_v59  ;;  %v3363_v40 = vld [vmem:[%s5167_s3 + $0x41] ss:$0 sm:$0xff] }
0x10f9   :  { %v2570_v60 = vmul.f32 %v2564_v55, %v2564_v55 }
0x10fb   :  { %v2586_v25 = vsel %vm108_vm1, %v2570_v60, 0.0 }
0x10fc   :  { %2587 = vadd.xlane.f32.xlu2 %v2586_v25 }
0x10fe   :  { %v2870_v15 = vpop.f32.mrf.mxu1 }
0x10ff   :  { %v2877_v30 = vadd.f32 %v2870_v15, %v5010_v53 }
0x1101   :  { %v2881_v18 = vadd.f32 %v3361_v51, %v2877_v30 }
0x1103   :  { %v2886_v33 = vrot.slane %v2881_v18, 7 }
0x1105   :  { %v2888_v50 = vsel %vm2887_vm6, %v2886_v33, %v2880_v62 }
0x1106   :  { %v2891_v0 = vsel %vm2890_vm8, %v2888_v50, 0.0 }
0x1107   :  { %2892 = vadd.xlane.f32.xlu0 %v2891_v0 }
0x1167   :  { %v2585_v23 = vpop.xlane.xlu1 %2584 }
0x1168   :  { %v2593_v21 = vmul.f32 %v2585_v23, %v3778_v43 }
0x116a   :  { %v2599_v48 = vadd.f32 1e-06, %v2593_v21 }
0x116c   :  { %3623 = vrsqrt.f32 %v2599_v48  ;;  %vm2647_vm7 = vweird.f32 %v2599_v48 }
0x116f   :  { %v2588_v11 = vpop.xlane.xlu2 %2587 }
0x1170   :  { %v2594_v45 = vmul.f32 %v2588_v11, %v3778_v43 }
0x1172   :  { %v3624_v49 = vpop.eup %3623  ;;  %v2600_v53 = vadd.f32 1e-06, %v2594_v45 }
0x1173   :  { %v2642_v3 = vmul.f32 %v3624_v49, %v2599_v48  ;;  %vm2648_vm9 = vweird.f32 %v3624_v49 }
0x1174   :  { %3625 = vrsqrt.f32 %v2600_v53  ;;  %vm2649_vm13 = vmor %vm2647_vm7, %vm2648_vm9  ;;  %vm2657_vm15 = vweird.f32 %v2600_v53 }
0x1175   :  { %v2643_v8 = vmul.f32 %v3624_v49, %v2642_v3 }
0x1177   :  { %v2644_v27 = vmul.f32 0.5, %v2643_v8 }
0x1179   :  { %v2645_v1 = vsub.f32 1.5, %v2644_v27 }
0x117a   :  { %v3626_v63 = vpop.eup %3625  ;;  %v2893_v4 = vpop.xlane.xlu0 %2892 }
0x117b   :  { %v2646_v5 = vmul.f32 %v3624_v49, %v2645_v1  ;;  %v2652_v14 = vmul.f32 %v3626_v63, %v2600_v53  ;;  %v2894_v6 = vmul.f32 %v2893_v4, %v3778_v43  ;;  %vm2658_vm14 = vweird.f32 %v3626_v63 }
0x117c   :  { %vm2659_vm0 = vmor %vm2657_vm15, %vm2658_vm14 }
0x117d   :  { %v2653_v29 = vmul.f32 %v3626_v63, %v2652_v14  ;;  %v2896_v35 = vrot.slane %v2894_v6, 1  ;;  %v2650_v56 = vsel %vm2649_vm13, %v3624_v49, %v2646_v5  ;;  %v2899_v13 = vsub.f32 %v2880_v62, %v2894_v6 }
0x117e   :  { %v2665_v26 = vmul.f32 %v2650_v56, %v2563_v19 }
0x117f   :  { %v2654_v22 = vmul.f32 0.5, %v2653_v29  ;;  %v2900_v24 = vsub.f32 %v2881_v18, %v2896_v35  ;;  %v2901_v9 = vmul.f32 %v2899_v13, %v2899_v13 }
0x1180   :  { %v2672_v46 = vmul.f32 %v5051_v12, %v2665_v26  ;;  %v3364_v26 = vld [vmem:[%s5167_s3 + $0x42] ss:$0 sm:$0xff] }
0x1181   :  { %v2655_v10 = vsub.f32 1.5, %v2654_v22  ;;  %v2902_v38 = vmul.f32 %v2900_v24, %v2900_v24 }
0x1182   :  { %v2679_v39 = vadd.f32 %v5056_v58, %v2672_v46 }
0x1183   :  { %v2656_v34 = vmul.f32 %v3626_v63, %v2655_v10  ;;  %v2905_v37 = vrot.slane %v2902_v38, 7 }
0x1185   :  { %v2660_v2 = vsel %vm2659_vm0, %v3626_v63, %v2656_v34  ;;  %v2906_v36 = vsel %vm2887_vm6, %v2905_v37, %v2901_v9 }
0x1186   :  { %v2666_v17 = vmul.f32 %v2660_v2, %v2564_v55  ;;  %v2908_v42 = vsel %vm2890_vm8, %v2906_v36, 0.0 }
0x1187   :  { %2909 = vadd.xlane.f32.xlu1 %v2908_v42 }
0x1188   :  { %v2673_v54 = vmul.f32 %v5051_v12, %v2666_v17  ;;  %v3233_v12 = vld [vmem:[%s5166_s2 + $0x100] sm:$0xff] }
0x1189   :  { %2972 = vmatpush.bf16.msra.mxu3 %v3233_v12 }
0x118a   :  { %v2680_v7 = vadd.f32 %v5056_v58, %v2673_v54 }
0x118c   :  { %v2683_v32 = vpack.c.bf16 %v2680_v7, %v2679_v39 }
0x118e   :  { %3159 = vmatmul.msk.bf16.gmra.mxu2 %vm108_vm1, %v2683_v32 }
0x11fa   :  { %v2910_v28 = vpop.xlane.xlu1 %2909 }
0x11fb   :  { %v2911_v61 = vmul.f32 %v2910_v28, %v3778_v43  ;;  %v3362_v43 = vld [vmem:[%s5167_s3 + $0x40] ss:$0 sm:$0xff] }
0x11fd   :  { %v2912_v57 = vadd.f32 1e-06, %v2911_v61 }
0x11ff   :  { %3627 = vrsqrt.f32 %v2912_v57  ;;  %vm2919_vm3 = vweird.f32 %v2912_v57 }
0x1205   :  { %v3628_v31 = vpop.eup %3627 }
0x1206   :  { %v2914_v58 = vmul.f32 %v3628_v31, %v2912_v57  ;;  %vm2920_vm2 = vweird.f32 %v3628_v31 }
0x1207   :  { %vm2921_vm4 = vmor %vm2919_vm3, %vm2920_vm2 }
0x1208   :  { %v2915_v19 = vmul.f32 %v3628_v31, %v2914_v58 }
0x120a   :  { %v2916_v16 = vmul.f32 0.5, %v2915_v19 }
0x120c   :  { %v2917_v47 = vsub.f32 1.5, %v2916_v16 }
0x120e   :  { %v2918_v41 = vmul.f32 %v3628_v31, %v2917_v47 }
0x1210   :  { %v2922_v59 = vsel %vm2921_vm4, %v3628_v31, %v2918_v41 }
0x1211   :  { %v2924_v55 = vrot.slane %v2922_v59, 1  ;;  %v2927_v60 = vmul.f32 %v2922_v59, %v2899_v13  ;;  %v2730_v25 = vpop.f32.mrf.mxu2 }
0x1212   :  { %v2731_v15 = vadd.f32 %v5105_v20, %v2730_v25 }
0x1213   :  { %v2928_v52 = vmul.f32 %v2924_v55, %v2900_v24  ;;  %v2930_v51 = vmul.f32 %v3362_v43, %v2927_v60 }
0x1214   :  { %v2739_v30 = vmul.f32 %v2731_v15, %v2731_v15 }
0x1215   :  { %v2931_v18 = vmul.f32 %v3362_v43, %v2928_v52  ;;  %v2933_v62 = vadd.f32 %v3363_v40, %v2930_v51 }
0x1216   :  { %v2745_v33 = vmul.f32 %v2739_v30, %v2731_v15 }
0x1217   :  { %v2934_v50 = vadd.f32 %v3363_v40, %v2931_v18  ;;  %v2935_v23 = vpack.c.bf16 %v2933_v62, %v2933_v62 }
0x1218   :  { %v2751_v0 = vmul.f32 0.044715, %v2745_v33 }
0x1219   :  { %v2936_v21 = vpack.c.bf16 %v2934_v50, %v2934_v50  ;;  %v2732_v48 = vpop.f32.mrf.mxu2  ;;  %v2945_v8 = vunpack.c.l.b16 %v2935_v23 }
0x121a   :  { %v2757_v11 = vadd.f32 %v2751_v0, %v2731_v15  ;;  %v2733_v45 = vadd.f32 %v5105_v20, %v2732_v48 }
0x121b   :  { %v2946_v49 = vunpack.c.l.b16 %v2936_v21 }
0x121c   :  { %v2763_v53 = vmul.f32 0.7978846, %v2757_v11  ;;  %v2740_v3 = vmul.f32 %v2733_v45, %v2733_v45 }
0x121d   :  { %v2947_v27 = vrot.slane %v2946_v49, 7 }
0x121e   :  { %v2746_v1 = vmul.f32 %v2740_v3, %v2733_v45  ;;  %3629 = vtanh.f32 %v2763_v53 }
0x121f   :  { %v2948_v63 = vsel %vm2887_vm6, %v2947_v27, %v2945_v8 }
0x1220   :  { %v2752_v4 = vmul.f32 0.044715, %v2746_v1  ;;  %v2949_v5 = vpack.c.b16 %v2948_v63, %v2948_v63 }
0x1222   :  { %v2758_v14 = vadd.f32 %v2752_v4, %v2733_v45  ;;  %3200 = vmatmul.msk.bf16.vlgmr.msra.gmra.mxu3 %vm108_vm1, %v2949_v5 }
0x1224   :  { %v2764_v6 = vmul.f32 0.7978846, %v2758_v14  ;;  %v3630_v29 = vpop.eup %3629 }
0x1225   :  { %v2775_v35 = vadd.f32 1.0, %v3630_v29 }
0x1226   :  { %3631 = vtanh.f32 %v2764_v6 }
0x1227   :  { %v2781_v22 = vmul.f32 0.5, %v2775_v35 }
0x1229   :  { %v2787_v24 = vmul.f32 %v2781_v22, %v2731_v15 }
0x122c   :  { %v3632_v56 = vpop.eup %3631 }
0x122d   :  { %v2776_v20 = vadd.f32 1.0, %v3632_v56 }
0x122f   :  { %v2782_v13 = vmul.f32 0.5, %v2776_v20 }
0x1231   :  { %v2788_v10 = vmul.f32 %v2782_v13, %v2733_v45 }
0x1233   :  { %v2791_v38 = vpack.c.bf16 %v2788_v10, %v2787_v24 }
0x1235   :  { %2872 = vmatmul.bf16.gmra.mxu1 %v2791_v38 }
0x12a5   :  { %v2974_v34 = vpop.f32.mrf.mxu3 }
0x12a6   :  { %v2975_v9 = vadd.f32 %v3364_v26, %v2974_v34 }
0x12a8   :  { %2978 = vst [vmem:[#allocation2] sm:$0x3] %v2975_v9 }
0x12a9   :  { %2989 = dma.vmem_to_hbm [thread:$0]  %s2985_s30, 32, %s2987_s8, [#allocation3]  }
0x12ad   :  { %v2976_v37 = vpop.f32.mrf.mxu3 }
0x12b2   :  { %v2873_v2 = vpop.f32.mrf.mxu1 }
0x12ba   :  { %v2874_v36 = vpop.f32.mrf.mxu1 }
0x12bb   :  { %3663 = dma.done.wait [#allocation3], 32  }
0x12bc   :  { %3664 = vsyncadd [#allocation3], 4294967264 }
0x12bd   :  { %2994 = vsyncpa [#allocation3], 1 }

</bundles_post_ra>
